<compile_context>
chip_gen: v7x
topology: tpu7x:2x2x1
jax: 0.10.0
libtpu: 0.0.40
codegen_flags: <defaults>
</compile_context>

<pallas_src>
import functools

import jax
import jax.numpy as jnp
from jax.experimental import pallas as pl
from jax.experimental.pallas import tpu as pltpu

_BN_EPS = 1e-5
_TARGET_M = 512          # target MXU M-rows per step (multiple of 128/256)
_VMEM_LIMIT = 48 * 1024 * 1024


def _round_up(x, m):
    return (x + m - 1) // m * m


# ----------------------------------------------------------------------------
# Pallas kernel: in-kernel im2col (per-tap matmuls, f32 accum) + bias + ReLU
# ----------------------------------------------------------------------------
def _cbr_kernel(x_ref, w_ref, b_ref, o_ref, *, kh, kw, stride, dilation, cin,
                th, wop, negative_slope):
    # x_ref: (Hs, s, Ws, s*Cin) bf16  -- whole phase-decomposed image (one n)
    # w_ref: (kh*kw, Cin, CoutT) bf16
    # b_ref: (1, CoutT) f32
    # o_ref: (TH, WoP, CoutT)
    i = pl.program_id(1)                       # output row-tile index
    m = th * wop
    cout_t = o_ref.shape[-1]

    acc = jnp.zeros((m, cout_t), jnp.float32)
    for ky in range(kh):
        dy, ry = divmod(ky * dilation, stride)
        for kx in range(kw):
            dx, rx = divmod(kx * dilation, stride)
            t = ky * kw + kx
            # Unstrided, static-offset slice of the resident image block:
            # output row oy -> phase row (i*TH + oy + dy, ry),
            # output col ox -> phase col (ox + dx, rx) -> channels rx*Cin..
            tap = x_ref[pl.ds(i * th + dy, th), ry,
                        pl.ds(dx, wop), pl.ds(rx * cin, cin)]
            acc += jnp.dot(tap.reshape(m, cin), w_ref[t],
                           preferred_element_type=jnp.float32)

    y = acc + b_ref[...]                       # (1, CoutT) broadcasts over M
    if negative_slope > 0.0:
        y = jnp.maximum(y, negative_slope * y)  # LeakyReLU (0 < slope < 1)
    else:
        y = jnp.maximum(y, 0.0)                 # ReLU
    o_ref[...] = y.reshape(th, wop, cout_t).astype(o_ref.dtype)


# ----------------------------------------------------------------------------
# Wrapper calling pallas_call
# ----------------------------------------------------------------------------
def conv2d_bn_act(x_nhwc, w_hwio, bias_eff, *, stride, padding, dilation,
                  negative_slope):
    """x: (N,H,W,Cin). w: (kH,kW,Cin,Cout) with BN scale folded in.
    bias_eff: (Cout,) f32 effective bias (conv bias + BN beta/mean folded)."""
    N, H, W, Cin = x_nhwc.shape
    kH, kW, _, Cout = w_hwio.shape
    s, p, d = stride, padding, dilation
    Ho = (H + 2 * p - d * (kH - 1) - 1) // s + 1
    Wo = (W + 2 * p - d * (kW - 1) - 1) // s + 1

    # ---- tile sizing --------------------------------------------------------
    WoP = _round_up(Wo, 16)                    # bf16 sublane pack -> cheap reshape
    TH = max(1, min(Ho, _TARGET_M // WoP))     # M = TH*WoP ~ 128..512
    HoP = _round_up(Ho, TH)
    n_i = HoP // TH

    # Lane-dense (128-multiple) Cout only when Cout is already large; small
    # Cout keeps its width to avoid 4-16x f32 writeback amplification.
    CoutP = _round_up(Cout, 128) if Cout >= 128 else Cout
    if CoutP <= 256:
        CoutT = CoutP
    elif CoutP % 256 == 0:
        CoutT = 256
    else:
        CoutT = 128
    n_j = CoutP // CoutT

    # ---- stride-phase decomposition of the padded input (free reshapes) ----
    dmax_y = (d * (kH - 1)) // s
    dmax_x = (d * (kW - 1)) // s
    Hs, Ws = HoP + dmax_y, WoP + dmax_x
    Hp, Wp = s * Hs, s * Ws

    xb = x_nhwc.astype(jnp.bfloat16)           # cast fused with pad by XLA
    xb = jnp.pad(xb, ((0, 0),
                      (p, max(0, Hp - H - p)),
                      (p, max(0, Wp - W - p)),
                      (0, 0)))
    xb = xb[:, :Hp, :Wp, :]
    x_r = xb.reshape(N, Hs, s, Ws, s * Cin)    # contiguous regrouping, no copy

    w_r = w_hwio.reshape(kH * kW, Cin, Cout)
    if CoutP > Cout:
        w_r = jnp.pad(w_r, ((0, 0), (0, 0), (0, CoutP - Cout)))
    w_r = w_r.astype(jnp.bfloat16)
    b_r = bias_eff.astype(jnp.float32)
    if CoutP > Cout:
        b_r = jnp.pad(b_r, (0, CoutP - Cout))
    b_r = b_r.reshape(1, CoutP)

    kernel = functools.partial(
        _cbr_kernel, kh=kH, kw=kW, stride=s, dilation=d, cin=Cin,
        th=TH, wop=WoP, negative_slope=float(negative_slope))

    grid = (N, n_i, n_j)
    x_spec = pl.BlockSpec((None, Hs, s, Ws, s * Cin),
                          lambda n, i, j: (n, 0, 0, 0, 0))
    out_spec = pl.BlockSpec((None, TH, WoP, CoutT),
                            lambda n, i, j: (n, i, 0, j))

    def _in_specs(single_buffer):
        extra = {"pipeline_mode": pl.Buffered(1)} if single_buffer else {}
        w_spec = pl.BlockSpec((kH * kW, Cin, CoutT),
                              lambda n, i, j: (0, 0, j), **extra)
        b_spec = pl.BlockSpec((1, CoutT), lambda n, i, j: (0, j), **extra)
        return [x_spec, w_spec, b_spec]

    cost = pl.CostEstimate(
        flops=int(2 * N * HoP * WoP * kH * kW * Cin * CoutP),
        transcendentals=0,
        bytes_accessed=int(x_r.size * 2 + w_r.size * 2 + b_r.size * 4
                           + N * HoP * WoP * CoutP * 4))

    def _call(single_buffer):
        return pl.pallas_call(
            kernel,
            out_shape=jax.ShapeDtypeStruct((N, HoP, WoP, CoutP), x_nhwc.dtype),
            grid=grid,
            in_specs=_in_specs(single_buffer),
            out_specs=out_spec,
            compiler_params=pltpu.CompilerParams(
                dimension_semantics=("parallel", "parallel", "parallel"),
                vmem_limit_bytes=_VMEM_LIMIT),
            cost_estimate=cost,
        )(x_r, w_r, b_r)

    single = (n_j == 1)    # weight/bias block index is constant -> 1 buffer
    try:
        out = _call(single)
    except Exception:      # Buffered(1) unsupported -> default double-buffer
        if not single:
            raise
        out = _call(False)

    return out[:, :Ho, :Wo, :Cout]             # drop row/col/Cout padding


# ----------------------------------------------------------------------------
# Module forward (conv2DBatchNormRelu)
# ----------------------------------------------------------------------------
def conv2d_batchnorm_relu(x_nchw, params, *, stride, padding, dilation=1,
                          groups=1, negative_slope=0.0, is_batchnorm=True):
    assert groups == 1, "TODO(synk): grouped conv not implemented"
    assert 0.0 <= negative_slope < 1.0, "LeakyReLU slope must be in [0, 1)"
    w = params['w']                            # (kH, kW, Cin, Cout) HWIO
    Cout = w.shape[-1]
    conv_b = params.get('conv_b')
    if conv_b is None:
        conv_b = jnp.zeros((Cout,), jnp.float32)
    if is_batchnorm:                           # inference-mode BN folded into w/b
        scale = params['gamma'] * jax.lax.rsqrt(params['var'] + _BN_EPS)
        bias = params['beta'] + (conv_b - params['mean']) * scale
        w_eff = w * scale.reshape(1, 1, 1, Cout)
    else:
        w_eff = w
        bias = conv_b
    x = jnp.transpose(x_nchw, (0, 2, 3, 1))    # NCHW -> NHWC
    y = conv2d_bn_act(x, w_eff, bias, stride=stride, padding=padding,
                      dilation=dilation, negative_slope=negative_slope)
    return jnp.transpose(y, (0, 3, 1, 2))      # NHWC -> NCHW


# ----------------------------------------------------------------------------
# Plain-JAX reference (mirrors the PyTorch math, inference-mode BN)
# ----------------------------------------------------------------------------
def conv2d_batchnorm_relu_ref(x_nchw, params, *, stride, padding, dilation=1,
                              negative_slope=0.0, is_batchnorm=True):
    w = params['w']
    Cout = w.shape[-1]
    conv_b = params.get('conv_b')
    if conv_b is None:
        conv_b = jnp.zeros((Cout,), jnp.float32)
    x = jnp.transpose(x_nchw, (0, 2, 3, 1))
    y = jax.lax.conv_general_dilated(
        x, w, (stride, stride), ((padding, padding), (padding, padding)),
        rhs_dilation=(dilation, dilation),
        dimension_numbers=('NHWC', 'HWIO', 'NHWC'),
        precision=jax.lax.Precision.HIGHEST)
    y = y + conv_b.reshape(1, 1, 1, -1)
    if is_batchnorm:
        scale = params['gamma'] * jax.lax.rsqrt(params['var'] + _BN_EPS)
        y = ((y - params['mean'].reshape(1, 1, 1, -1))
             * scale.reshape(1, 1, 1, -1) + params['beta'].reshape(1, 1, 1, -1))
    y = jnp.where(y > 0, y, negative_slope * y)
    return jnp.transpose(y, (0, 3, 1, 2))


# ----------------------------------------------------------------------------
# Deterministic synthetic parameters
# ----------------------------------------------------------------------------
def make_params(key, cin, cout, k, *, with_bias=True, with_bn=True):
    ks = jax.random.split(key, 6)
    p = {'w': jax.random.normal(ks[0], (k, k, cin, cout), jnp.float32)
              / jnp.sqrt(float(k * k * cin))}
    if with_bias:
        p['conv_b'] = 0.1 * jax.random.normal(ks[1], (cout,), jnp.float32)
    if with_bn:
        p['gamma'] = jax.random.uniform(ks[2], (cout,), jnp.float32, 0.5, 1.5)
        p['beta'] = 0.1 * jax.random.normal(ks[3], (cout,), jnp.float32)
        p['mean'] = 0.1 * jax.random.normal(ks[4], (cout,), jnp.float32)
        p['var'] = jax.random.uniform(ks[5], (cout,), jnp.float32, 0.5, 1.5)
    return p


# ----------------------------------------------------------------------------
if __name__ == "__main__":
    key = jax.random.PRNGKey(0)
    kx, kp1, kp2 = jax.random.split(key, 3)

    N, Cin, H, W = 2, 4, 16, 16
    x = jax.random.normal(kx, (N, Cin, H, W), jnp.float32)   # NCHW like PyTorch

    # Case 1: conv2DBatchNormRelu(4, 32, k=3, stride=2, padding=1, bias=True)
    Cout1 = 32
    p1 = make_params(kp1, Cin, Cout1, 3)
    out1 = jax.block_until_ready(
        conv2d_batchnorm_relu(x, p1, stride=2, padding=1))
    ref1 = conv2d_batchnorm_relu_ref(x, p1, stride=2, padding=1)
    assert out1.shape == (N, Cout1, H // 2, W // 2), out1.shape
    err1 = float(jnp.max(jnp.abs(out1 - ref1)) / (jnp.max(jnp.abs(ref1)) + 1e-6))
    assert err1 < 2e-2, f"case1 mismatch vs reference: rel err {err1}"

    # Case 2: conv2DBatchNormRelu(4, 8, k=1, stride=1, padding=0,
    #                             is_batchnorm=False, negative_slope=0.1)
    Cout2 = 8
    p2 = make_params(kp2, Cin, Cout2, 1, with_bn=False)
    out2 = jax.block_until_ready(
        conv2d_batchnorm_relu(x, p2, stride=1, padding=0,
                              negative_slope=0.1, is_batchnorm=False))
    ref2 = conv2d_batchnorm_relu_ref(x, p2, stride=1, padding=0,
                                     negative_slope=0.1, is_batchnorm=False)
    assert out2.shape == (N, Cout2, H, W), out2.shape
    err2 = float(jnp.max(jnp.abs(out2 - ref2)) / (jnp.max(jnp.abs(ref2)) + 1e-6))
    assert err2 < 2e-2, f"case2 mismatch vs reference: rel err {err2}"

    print("KERNEL_OK")
</pallas_src>

<mosaic_0001>
module attributes {stable_mosaic.version = 11 : i64} {
  func.func @_cbr_kernel(%arg0: i32, %arg1: i32, %arg2: i32, %arg3: memref<1x9x2x17x8xbf16, #tpu.memory_space<vmem>>, %arg4: memref<9x4x32xbf16, #tpu.memory_space<vmem>>, %arg5: memref<1x32xf32, #tpu.memory_space<vmem>>, %arg6: memref<1x8x16x32xf32, #tpu.memory_space<vmem>>) attributes {dimension_semantics = [#tpu.dimension_semantics<parallel>, #tpu.dimension_semantics<parallel>, #tpu.dimension_semantics<parallel>], iteration_bounds = array<i64: 2, 1, 1>, scalar_prefetch = 0 : i64, scratch_operands = 0 : i64, tpu.core_type = #tpu.core_type<tc>, window_params = [{transform_indices = @transform_0, window_bounds = array<i64: 1, 9, 2, 17, 8>}, {pipeline_mode = #tpu.pipeline_mode<synchronous>, transform_indices = @transform_1, window_bounds = array<i64: 9, 4, 32>}, {pipeline_mode = #tpu.pipeline_mode<synchronous>, transform_indices = @transform_2, window_bounds = array<i64: 1, 32>}, {transform_indices = @transform_3, window_bounds = array<i64: 1, 8, 16, 32>}]} {
    %cst = arith.constant 0.000000e+00 : f32
    %0 = vector.broadcast %cst : f32 to vector<128x32xf32>
    %c8_i32 = arith.constant 8 : i32
    %1 = arith.muli %arg1, %c8_i32 : i32
    %c0_i32 = arith.constant 0 : i32
    %2 = arith.addi %1, %c0_i32 : i32
    %c0 = arith.constant 0 : index
    %3 = arith.index_cast %2 : i32 to index
    %c0_0 = arith.constant 0 : index
    %c0_1 = arith.constant 0 : index
    %c0_2 = arith.constant 0 : index
    %4 = vector.load %arg3[%c0, %3, %c0_0, %c0_1, %c0_2] : memref<1x9x2x17x8xbf16, #tpu.memory_space<vmem>>, vector<1x8x1x16x4xbf16>
    %5 = vector.shape_cast %4 : vector<1x8x1x16x4xbf16> to vector<8x16x4xbf16>
    %6 = vector.shape_cast %5 : vector<8x16x4xbf16> to vector<128x4xbf16>
    %c0_3 = arith.constant 0 : index
    %c0_4 = arith.constant 0 : index
    %c0_5 = arith.constant 0 : index
    %7 = vector.load %arg4[%c0_3, %c0_4, %c0_5] : memref<9x4x32xbf16, #tpu.memory_space<vmem>>, vector<1x4x32xbf16>
    %8 = vector.shape_cast %7 : vector<1x4x32xbf16> to vector<4x32xbf16>
    %cst_6 = arith.constant dense<0.000000e+00> : vector<128x32xf32>
    %9 = tpu.matmul %6, %8, %cst_6 {dimension_numbers = #tpu.dot_dimension_numbers<[1], [0], [0], [1], [0, 0, 1, 1], [], []>} : vector<128x4xbf16>, vector<4x32xbf16>, vector<128x32xf32> -> vector<128x32xf32>
    %10 = arith.addf %0, %9 : vector<128x32xf32>
    %c8_i32_7 = arith.constant 8 : i32
    %11 = arith.muli %arg1, %c8_i32_7 : i32
    %c0_i32_8 = arith.constant 0 : i32
    %12 = arith.addi %11, %c0_i32_8 : i32
    %c0_9 = arith.constant 0 : index
    %13 = arith.index_cast %12 : i32 to index
    %c0_10 = arith.constant 0 : index
    %c0_11 = arith.constant 0 : index
    %c4 = arith.constant 4 : index
    %14 = vector.load %arg3[%c0_9, %13, %c0_10, %c0_11, %c4] : memref<1x9x2x17x8xbf16, #tpu.memory_space<vmem>>, vector<1x8x1x16x4xbf16>
    %15 = vector.shape_cast %14 : vector<1x8x1x16x4xbf16> to vector<8x16x4xbf16>
    %16 = vector.shape_cast %15 : vector<8x16x4xbf16> to vector<128x4xbf16>
    %c1 = arith.constant 1 : index
    %c0_12 = arith.constant 0 : index
    %c0_13 = arith.constant 0 : index
    %17 = vector.load %arg4[%c1, %c0_12, %c0_13] : memref<9x4x32xbf16, #tpu.memory_space<vmem>>, vector<1x4x32xbf16>
    %18 = vector.shape_cast %17 : vector<1x4x32xbf16> to vector<4x32xbf16>
    %cst_14 = arith.constant dense<0.000000e+00> : vector<128x32xf32>
    %19 = tpu.matmul %16, %18, %cst_14 {dimension_numbers = #tpu.dot_dimension_numbers<[1], [0], [0], [1], [0, 0, 1, 1], [], []>} : vector<128x4xbf16>, vector<4x32xbf16>, vector<128x32xf32> -> vector<128x32xf32>
    %20 = arith.addf %10, %19 : vector<128x32xf32>
    %c8_i32_15 = arith.constant 8 : i32
    %21 = arith.muli %arg1, %c8_i32_15 : i32
    %c0_i32_16 = arith.constant 0 : i32
    %22 = arith.addi %21, %c0_i32_16 : i32
    %c0_17 = arith.constant 0 : index
    %23 = arith.index_cast %22 : i32 to index
    %c0_18 = arith.constant 0 : index
    %c1_19 = arith.constant 1 : index
    %c0_20 = arith.constant 0 : index
    %24 = vector.load %arg3[%c0_17, %23, %c0_18, %c1_19, %c0_20] : memref<1x9x2x17x8xbf16, #tpu.memory_space<vmem>>, vector<1x8x1x16x4xbf16>
    %25 = vector.shape_cast %24 : vector<1x8x1x16x4xbf16> to vector<8x16x4xbf16>
    %26 = vector.shape_cast %25 : vector<8x16x4xbf16> to vector<128x4xbf16>
    %c2 = arith.constant 2 : index
    %c0_21 = arith.constant 0 : index
    %c0_22 = arith.constant 0 : index
    %27 = vector.load %arg4[%c2, %c0_21, %c0_22] : memref<9x4x32xbf16, #tpu.memory_space<vmem>>, vector<1x4x32xbf16>
    %28 = vector.shape_cast %27 : vector<1x4x32xbf16> to vector<4x32xbf16>
    %cst_23 = arith.constant dense<0.000000e+00> : vector<128x32xf32>
    %29 = tpu.matmul %26, %28, %cst_23 {dimension_numbers = #tpu.dot_dimension_numbers<[1], [0], [0], [1], [0, 0, 1, 1], [], []>} : vector<128x4xbf16>, vector<4x32xbf16>, vector<128x32xf32> -> vector<128x32xf32>
    %30 = arith.addf %20, %29 : vector<128x32xf32>
    %c8_i32_24 = arith.constant 8 : i32
    %31 = arith.muli %arg1, %c8_i32_24 : i32
    %c0_i32_25 = arith.constant 0 : i32
    %32 = arith.addi %31, %c0_i32_25 : i32
    %c0_26 = arith.constant 0 : index
    %33 = arith.index_cast %32 : i32 to index
    %c1_27 = arith.constant 1 : index
    %c0_28 = arith.constant 0 : index
    %c0_29 = arith.constant 0 : index
    %34 = vector.load %arg3[%c0_26, %33, %c1_27, %c0_28, %c0_29] : memref<1x9x2x17x8xbf16, #tpu.memory_space<vmem>>, vector<1x8x1x16x4xbf16>
    %35 = vector.shape_cast %34 : vector<1x8x1x16x4xbf16> to vector<8x16x4xbf16>
    %36 = vector.shape_cast %35 : vector<8x16x4xbf16> to vector<128x4xbf16>
    %c3 = arith.constant 3 : index
    %c0_30 = arith.constant 0 : index
    %c0_31 = arith.constant 0 : index
    %37 = vector.load %arg4[%c3, %c0_30, %c0_31] : memref<9x4x32xbf16, #tpu.memory_space<vmem>>, vector<1x4x32xbf16>
    %38 = vector.shape_cast %37 : vector<1x4x32xbf16> to vector<4x32xbf16>
    %cst_32 = arith.constant dense<0.000000e+00> : vector<128x32xf32>
    %39 = tpu.matmul %36, %38, %cst_32 {dimension_numbers = #tpu.dot_dimension_numbers<[1], [0], [0], [1], [0, 0, 1, 1], [], []>} : vector<128x4xbf16>, vector<4x32xbf16>, vector<128x32xf32> -> vector<128x32xf32>
    %40 = arith.addf %30, %39 : vector<128x32xf32>
    %c8_i32_33 = arith.constant 8 : i32
    %41 = arith.muli %arg1, %c8_i32_33 : i32
    %c0_i32_34 = arith.constant 0 : i32
    %42 = arith.addi %41, %c0_i32_34 : i32
    %c0_35 = arith.constant 0 : index
    %43 = arith.index_cast %42 : i32 to index
    %c1_36 = arith.constant 1 : index
    %c0_37 = arith.constant 0 : index
    %c4_38 = arith.constant 4 : index
    %44 = vector.load %arg3[%c0_35, %43, %c1_36, %c0_37, %c4_38] : memref<1x9x2x17x8xbf16, #tpu.memory_space<vmem>>, vector<1x8x1x16x4xbf16>
    %45 = vector.shape_cast %44 : vector<1x8x1x16x4xbf16> to vector<8x16x4xbf16>
    %46 = vector.shape_cast %45 : vector<8x16x4xbf16> to vector<128x4xbf16>
    %c4_39 = arith.constant 4 : index
    %c0_40 = arith.constant 0 : index
    %c0_41 = arith.constant 0 : index
    %47 = vector.load %arg4[%c4_39, %c0_40, %c0_41] : memref<9x4x32xbf16, #tpu.memory_space<vmem>>, vector<1x4x32xbf16>
    %48 = vector.shape_cast %47 : vector<1x4x32xbf16> to vector<4x32xbf16>
    %cst_42 = arith.constant dense<0.000000e+00> : vector<128x32xf32>
    %49 = tpu.matmul %46, %48, %cst_42 {dimension_numbers = #tpu.dot_dimension_numbers<[1], [0], [0], [1], [0, 0, 1, 1], [], []>} : vector<128x4xbf16>, vector<4x32xbf16>, vector<128x32xf32> -> vector<128x32xf32>
    %50 = arith.addf %40, %49 : vector<128x32xf32>
    %c8_i32_43 = arith.constant 8 : i32
    %51 = arith.muli %arg1, %c8_i32_43 : i32
    %c0_i32_44 = arith.constant 0 : i32
    %52 = arith.addi %51, %c0_i32_44 : i32
    %c0_45 = arith.constant 0 : index
    %53 = arith.index_cast %52 : i32 to index
    %c1_46 = arith.constant 1 : index
    %c1_47 = arith.constant 1 : index
    %c0_48 = arith.constant 0 : index
    %54 = vector.load %arg3[%c0_45, %53, %c1_46, %c1_47, %c0_48] : memref<1x9x2x17x8xbf16, #tpu.memory_space<vmem>>, vector<1x8x1x16x4xbf16>
    %55 = vector.shape_cast %54 : vector<1x8x1x16x4xbf16> to vector<8x16x4xbf16>
    %56 = vector.shape_cast %55 : vector<8x16x4xbf16> to vector<128x4xbf16>
    %c5 = arith.constant 5 : index
    %c0_49 = arith.constant 0 : index
    %c0_50 = arith.constant 0 : index
    %57 = vector.load %arg4[%c5, %c0_49, %c0_50] : memref<9x4x32xbf16, #tpu.memory_space<vmem>>, vector<1x4x32xbf16>
    %58 = vector.shape_cast %57 : vector<1x4x32xbf16> to vector<4x32xbf16>
    %cst_51 = arith.constant dense<0.000000e+00> : vector<128x32xf32>
    %59 = tpu.matmul %56, %58, %cst_51 {dimension_numbers = #tpu.dot_dimension_numbers<[1], [0], [0], [1], [0, 0, 1, 1], [], []>} : vector<128x4xbf16>, vector<4x32xbf16>, vector<128x32xf32> -> vector<128x32xf32>
    %60 = arith.addf %50, %59 : vector<128x32xf32>
    %c8_i32_52 = arith.constant 8 : i32
    %61 = arith.muli %arg1, %c8_i32_52 : i32
    %c1_i32 = arith.constant 1 : i32
    %62 = arith.addi %61, %c1_i32 : i32
    %c0_53 = arith.constant 0 : index
    %63 = arith.index_cast %62 : i32 to index
    %c0_54 = arith.constant 0 : index
    %c0_55 = arith.constant 0 : index
    %c0_56 = arith.constant 0 : index
    %64 = vector.load %arg3[%c0_53, %63, %c0_54, %c0_55, %c0_56] : memref<1x9x2x17x8xbf16, #tpu.memory_space<vmem>>, vector<1x8x1x16x4xbf16>
    %65 = vector.shape_cast %64 : vector<1x8x1x16x4xbf16> to vector<8x16x4xbf16>
    %66 = vector.shape_cast %65 : vector<8x16x4xbf16> to vector<128x4xbf16>
    %c6 = arith.constant 6 : index
    %c0_57 = arith.constant 0 : index
    %c0_58 = arith.constant 0 : index
    %67 = vector.load %arg4[%c6, %c0_57, %c0_58] : memref<9x4x32xbf16, #tpu.memory_space<vmem>>, vector<1x4x32xbf16>
    %68 = vector.shape_cast %67 : vector<1x4x32xbf16> to vector<4x32xbf16>
    %cst_59 = arith.constant dense<0.000000e+00> : vector<128x32xf32>
    %69 = tpu.matmul %66, %68, %cst_59 {dimension_numbers = #tpu.dot_dimension_numbers<[1], [0], [0], [1], [0, 0, 1, 1], [], []>} : vector<128x4xbf16>, vector<4x32xbf16>, vector<128x32xf32> -> vector<128x32xf32>
    %70 = arith.addf %60, %69 : vector<128x32xf32>
    %c8_i32_60 = arith.constant 8 : i32
    %71 = arith.muli %arg1, %c8_i32_60 : i32
    %c1_i32_61 = arith.constant 1 : i32
    %72 = arith.addi %71, %c1_i32_61 : i32
    %c0_62 = arith.constant 0 : index
    %73 = arith.index_cast %72 : i32 to index
    %c0_63 = arith.constant 0 : index
    %c0_64 = arith.constant 0 : index
    %c4_65 = arith.constant 4 : index
    %74 = vector.load %arg3[%c0_62, %73, %c0_63, %c0_64, %c4_65] : memref<1x9x2x17x8xbf16, #tpu.memory_space<vmem>>, vector<1x8x1x16x4xbf16>
    %75 = vector.shape_cast %74 : vector<1x8x1x16x4xbf16> to vector<8x16x4xbf16>
    %76 = vector.shape_cast %75 : vector<8x16x4xbf16> to vector<128x4xbf16>
    %c7 = arith.constant 7 : index
    %c0_66 = arith.constant 0 : index
    %c0_67 = arith.constant 0 : index
    %77 = vector.load %arg4[%c7, %c0_66, %c0_67] : memref<9x4x32xbf16, #tpu.memory_space<vmem>>, vector<1x4x32xbf16>
    %78 = vector.shape_cast %77 : vector<1x4x32xbf16> to vector<4x32xbf16>
    %cst_68 = arith.constant dense<0.000000e+00> : vector<128x32xf32>
    %79 = tpu.matmul %76, %78, %cst_68 {dimension_numbers = #tpu.dot_dimension_numbers<[1], [0], [0], [1], [0, 0, 1, 1], [], []>} : vector<128x4xbf16>, vector<4x32xbf16>, vector<128x32xf32> -> vector<128x32xf32>
    %80 = arith.addf %70, %79 : vector<128x32xf32>
    %c8_i32_69 = arith.constant 8 : i32
    %81 = arith.muli %arg1, %c8_i32_69 : i32
    %c1_i32_70 = arith.constant 1 : i32
    %82 = arith.addi %81, %c1_i32_70 : i32
    %c0_71 = arith.constant 0 : index
    %83 = arith.index_cast %82 : i32 to index
    %c0_72 = arith.constant 0 : index
    %c1_73 = arith.constant 1 : index
    %c0_74 = arith.constant 0 : index
    %84 = vector.load %arg3[%c0_71, %83, %c0_72, %c1_73, %c0_74] : memref<1x9x2x17x8xbf16, #tpu.memory_space<vmem>>, vector<1x8x1x16x4xbf16>
    %85 = vector.shape_cast %84 : vector<1x8x1x16x4xbf16> to vector<8x16x4xbf16>
    %86 = vector.shape_cast %85 : vector<8x16x4xbf16> to vector<128x4xbf16>
    %c8 = arith.constant 8 : index
    %c0_75 = arith.constant 0 : index
    %c0_76 = arith.constant 0 : index
    %87 = vector.load %arg4[%c8, %c0_75, %c0_76] : memref<9x4x32xbf16, #tpu.memory_space<vmem>>, vector<1x4x32xbf16>
    %88 = vector.shape_cast %87 : vector<1x4x32xbf16> to vector<4x32xbf16>
    %cst_77 = arith.constant dense<0.000000e+00> : vector<128x32xf32>
    %89 = tpu.matmul %86, %88, %cst_77 {dimension_numbers = #tpu.dot_dimension_numbers<[1], [0], [0], [1], [0, 0, 1, 1], [], []>} : vector<128x4xbf16>, vector<4x32xbf16>, vector<128x32xf32> -> vector<128x32xf32>
    %90 = arith.addf %80, %89 : vector<128x32xf32>
    %c0_78 = arith.constant 0 : index
    %c0_79 = arith.constant 0 : index
    %91 = vector.load %arg5[%c0_78, %c0_79] : memref<1x32xf32, #tpu.memory_space<vmem>>, vector<1x32xf32>
    %92 = vector.broadcast %91 : vector<1x32xf32> to vector<128x32xf32>
    %93 = arith.addf %90, %92 : vector<128x32xf32>
    %cst_80 = arith.constant 0.000000e+00 : f32
    %94 = vector.broadcast %cst_80 : f32 to vector<128x32xf32>
    %95 = arith.maximumf %93, %94 : vector<128x32xf32>
    %96 = vector.shape_cast %95 : vector<128x32xf32> to vector<8x16x32xf32>
    %c0_81 = arith.constant 0 : index
    %c0_82 = arith.constant 0 : index
    %c0_83 = arith.constant 0 : index
    %c0_84 = arith.constant 0 : index
    %97 = vector.load %arg6[%c0_81, %c0_82, %c0_83, %c0_84] : memref<1x8x16x32xf32, #tpu.memory_space<vmem>>, vector<1x8x16x32xf32>
    %98 = vector.shape_cast %97 : vector<1x8x16x32xf32> to vector<8x16x32xf32>
    %99 = vector.shape_cast %96 : vector<8x16x32xf32> to vector<1x8x16x32xf32>
    tpu.vector_store %arg6[%c0_81, %c0_82, %c0_83, %c0_84], %99 {strides = array<i32>} : memref<1x8x16x32xf32, #tpu.memory_space<vmem>>, vector<1x8x16x32xf32>,
    return
  }
  func.func @transform_0(%arg0: i32, %arg1: i32, %arg2: i32) -> (i32, i32, i32, i32, i32) {
    %c0_i32 = arith.constant 0 : i32
    %c0_i32_0 = arith.constant 0 : i32
    %c0_i32_1 = arith.constant 0 : i32
    %c0_i32_2 = arith.constant 0 : i32
    %c0_i32_3 = arith.constant 0 : i32
    return %arg0, %c0_i32, %c0_i32_0, %c0_i32_1, %c0_i32_2 : i32, i32, i32, i32, i32
  }
  func.func @transform_1(%arg0: i32, %arg1: i32, %arg2: i32) -> (i32, i32, i32) {
    %c0_i32 = arith.constant 0 : i32
    %c0_i32_0 = arith.constant 0 : i32
    %c0_i32_1 = arith.constant 0 : i32
    return %c0_i32, %c0_i32_0, %arg2 : i32, i32, i32
  }
  func.func @transform_2(%arg0: i32, %arg1: i32, %arg2: i32) -> (i32, i32) {
    %c0_i32 = arith.constant 0 : i32
    %c0_i32_0 = arith.constant 0 : i32
    return %c0_i32, %arg2 : i32, i32
  }
  func.func @transform_3(%arg0: i32, %arg1: i32, %arg2: i32) -> (i32, i32, i32, i32) {
    %c0_i32 = arith.constant 0 : i32
    %c0_i32_0 = arith.constant 0 : i32
    return %arg0, %arg1, %c0_i32, %arg2 : i32, i32, i32, i32
  }
}

module attributes {stable_mosaic.version = 11 : i64} {
  func.func @_cbr_kernel(%arg0: i32, %arg1: i32, %arg2: i32, %arg3: memref<1x9x2x17x8xbf16, #tpu.memory_space<vmem>>, %arg4: memref<9x4x32xbf16, #tpu.memory_space<vmem>>, %arg5: memref<1x32xf32, #tpu.memory_space<vmem>>, %arg6: memref<1x8x16x32xf32, #tpu.memory_space<vmem>>) attributes {dimension_semantics = [#tpu.dimension_semantics<parallel>, #tpu.dimension_semantics<parallel>, #tpu.dimension_semantics<parallel>], iteration_bounds = array<i64: 2, 1, 1>, scalar_prefetch = 0 : i64, scratch_operands = 0 : i64, tpu.core_type = #tpu.core_type<tc>, window_params = [{transform_indices = @transform_0, window_bounds = array<i64: 1, 9, 2, 17, 8>}, {transform_indices = @transform_1, window_bounds = array<i64: 9, 4, 32>}, {transform_indices = @transform_2, window_bounds = array<i64: 1, 32>}, {transform_indices = @transform_3, window_bounds = array<i64: 1, 8, 16, 32>}]} {
    %cst = arith.constant 0.000000e+00 : f32
    %0 = vector.broadcast %cst : f32 to vector<128x32xf32>
    %c8_i32 = arith.constant 8 : i32
    %1 = arith.muli %arg1, %c8_i32 : i32
    %c0_i32 = arith.constant 0 : i32
    %2 = arith.addi %1, %c0_i32 : i32
    %c0 = arith.constant 0 : index
    %3 = arith.index_cast %2 : i32 to index
    %c0_0 = arith.constant 0 : index
    %c0_1 = arith.constant 0 : index
    %c0_2 = arith.constant 0 : index
    %4 = vector.load %arg3[%c0, %3, %c0_0, %c0_1, %c0_2] : memref<1x9x2x17x8xbf16, #tpu.memory_space<vmem>>, vector<1x8x1x16x4xbf16>
    %5 = vector.shape_cast %4 : vector<1x8x1x16x4xbf16> to vector<8x16x4xbf16>
    %6 = vector.shape_cast %5 : vector<8x16x4xbf16> to vector<128x4xbf16>
    %c0_3 = arith.constant 0 : index
    %c0_4 = arith.constant 0 : index
    %c0_5 = arith.constant 0 : index
    %7 = vector.load %arg4[%c0_3, %c0_4, %c0_5] : memref<9x4x32xbf16, #tpu.memory_space<vmem>>, vector<1x4x32xbf16>
    %8 = vector.shape_cast %7 : vector<1x4x32xbf16> to vector<4x32xbf16>
    %cst_6 = arith.constant dense<0.000000e+00> : vector<128x32xf32>
    %9 = tpu.matmul %6, %8, %cst_6 {dimension_numbers = #tpu.dot_dimension_numbers<[1], [0], [0], [1], [0, 0, 1, 1], [], []>} : vector<128x4xbf16>, vector<4x32xbf16>, vector<128x32xf32> -> vector<128x32xf32>
    %10 = arith.addf %0, %9 : vector<128x32xf32>
    %c8_i32_7 = arith.constant 8 : i32
    %11 = arith.muli %arg1, %c8_i32_7 : i32
    %c0_i32_8 = arith.constant 0 : i32
    %12 = arith.addi %11, %c0_i32_8 : i32
    %c0_9 = arith.constant 0 : index
    %13 = arith.index_cast %12 : i32 to index
    %c0_10 = arith.constant 0 : index
    %c0_11 = arith.constant 0 : index
    %c4 = arith.constant 4 : index
    %14 = vector.load %arg3[%c0_9, %13, %c0_10, %c0_11, %c4] : memref<1x9x2x17x8xbf16, #tpu.memory_space<vmem>>, vector<1x8x1x16x4xbf16>
    %15 = vector.shape_cast %14 : vector<1x8x1x16x4xbf16> to vector<8x16x4xbf16>
    %16 = vector.shape_cast %15 : vector<8x16x4xbf16> to vector<128x4xbf16>
    %c1 = arith.constant 1 : index
    %c0_12 = arith.constant 0 : index
    %c0_13 = arith.constant 0 : index
    %17 = vector.load %arg4[%c1, %c0_12, %c0_13] : memref<9x4x32xbf16, #tpu.memory_space<vmem>>, vector<1x4x32xbf16>
    %18 = vector.shape_cast %17 : vector<1x4x32xbf16> to vector<4x32xbf16>
    %cst_14 = arith.constant dense<0.000000e+00> : vector<128x32xf32>
    %19 = tpu.matmul %16, %18, %cst_14 {dimension_numbers = #tpu.dot_dimension_numbers<[1], [0], [0], [1], [0, 0, 1, 1], [], []>} : vector<128x4xbf16>, vector<4x32xbf16>, vector<128x32xf32> -> vector<128x32xf32>
    %20 = arith.addf %10, %19 : vector<128x32xf32>
    %c8_i32_15 = arith.constant 8 : i32
    %21 = arith.muli %arg1, %c8_i32_15 : i32
    %c0_i32_16 = arith.constant 0 : i32
    %22 = arith.addi %21, %c0_i32_16 : i32
    %c0_17 = arith.constant 0 : index
    %23 = arith.index_cast %22 : i32 to index
    %c0_18 = arith.constant 0 : index
    %c1_19 = arith.constant 1 : index
    %c0_20 = arith.constant 0 : index
    %24 = vector.load %arg3[%c0_17, %23, %c0_18, %c1_19, %c0_20] : memref<1x9x2x17x8xbf16, #tpu.memory_space<vmem>>, vector<1x8x1x16x4xbf16>
    %25 = vector.shape_cast %24 : vector<1x8x1x16x4xbf16> to vector<8x16x4xbf16>
    %26 = vector.shape_cast %25 : vector<8x16x4xbf16> to vector<128x4xbf16>
    %c2 = arith.constant 2 : index
    %c0_21 = arith.constant 0 : index
    %c0_22 = arith.constant 0 : index
    %27 = vector.load %arg4[%c2, %c0_21, %c0_22] : memref<9x4x32xbf16, #tpu.memory_space<vmem>>, vector<1x4x32xbf16>
    %28 = vector.shape_cast %27 : vector<1x4x32xbf16> to vector<4x32xbf16>
    %cst_23 = arith.constant dense<0.000000e+00> : vector<128x32xf32>
    %29 = tpu.matmul %26, %28, %cst_23 {dimension_numbers = #tpu.dot_dimension_numbers<[1], [0], [0], [1], [0, 0, 1, 1], [], []>} : vector<128x4xbf16>, vector<4x32xbf16>, vector<128x32xf32> -> vector<128x32xf32>
    %30 = arith.addf %20, %29 : vector<128x32xf32>
    %c8_i32_24 = arith.constant 8 : i32
    %31 = arith.muli %arg1, %c8_i32_24 : i32
    %c0_i32_25 = arith.constant 0 : i32
    %32 = arith.addi %31, %c0_i32_25 : i32
    %c0_26 = arith.constant 0 : index
    %33 = arith.index_cast %32 : i32 to index
    %c1_27 = arith.constant 1 : index
    %c0_28 = arith.constant 0 : index
    %c0_29 = arith.constant 0 : index
    %34 = vector.load %arg3[%c0_26, %33, %c1_27, %c0_28, %c0_29] : memref<1x9x2x17x8xbf16, #tpu.memory_space<vmem>>, vector<1x8x1x16x4xbf16>
    %35 = vector.shape_cast %34 : vector<1x8x1x16x4xbf16> to vector<8x16x4xbf16>
    %36 = vector.shape_cast %35 : vector<8x16x4xbf16> to vector<128x4xbf16>
    %c3 = arith.constant 3 : index
    %c0_30 = arith.constant 0 : index
    %c0_31 = arith.constant 0 : index
    %37 = vector.load %arg4[%c3, %c0_30, %c0_31] : memref<9x4x32xbf16, #tpu.memory_space<vmem>>, vector<1x4x32xbf16>
    %38 = vector.shape_cast %37 : vector<1x4x32xbf16> to vector<4x32xbf16>
    %cst_32 = arith.constant dense<0.000000e+00> : vector<128x32xf32>
    %39 = tpu.matmul %36, %38, %cst_32 {dimension_numbers = #tpu.dot_dimension_numbers<[1], [0], [0], [1], [0, 0, 1, 1], [], []>} : vector<128x4xbf16>, vector<4x32xbf16>, vector<128x32xf32> -> vector<128x32xf32>
    %40 = arith.addf %30, %39 : vector<128x32xf32>
    %c8_i32_33 = arith.constant 8 : i32
    %41 = arith.muli %arg1, %c8_i32_33 : i32
    %c0_i32_34 = arith.constant 0 : i32
    %42 = arith.addi %41, %c0_i32_34 : i32
    %c0_35 = arith.constant 0 : index
    %43 = arith.index_cast %42 : i32 to index
    %c1_36 = arith.constant 1 : index
    %c0_37 = arith.constant 0 : index
    %c4_38 = arith.constant 4 : index
    %44 = vector.load %arg3[%c0_35, %43, %c1_36, %c0_37, %c4_38] : memref<1x9x2x17x8xbf16, #tpu.memory_space<vmem>>, vector<1x8x1x16x4xbf16>
    %45 = vector.shape_cast %44 : vector<1x8x1x16x4xbf16> to vector<8x16x4xbf16>
    %46 = vector.shape_cast %45 : vector<8x16x4xbf16> to vector<128x4xbf16>
    %c4_39 = arith.constant 4 : index
    %c0_40 = arith.constant 0 : index
    %c0_41 = arith.constant 0 : index
    %47 = vector.load %arg4[%c4_39, %c0_40, %c0_41] : memref<9x4x32xbf16, #tpu.memory_space<vmem>>, vector<1x4x32xbf16>
    %48 = vector.shape_cast %47 : vector<1x4x32xbf16> to vector<4x32xbf16>
    %cst_42 = arith.constant dense<0.000000e+00> : vector<128x32xf32>
    %49 = tpu.matmul %46, %48, %cst_42 {dimension_numbers = #tpu.dot_dimension_numbers<[1], [0], [0], [1], [0, 0, 1, 1], [], []>} : vector<128x4xbf16>, vector<4x32xbf16>, vector<128x32xf32> -> vector<128x32xf32>
    %50 = arith.addf %40, %49 : vector<128x32xf32>
    %c8_i32_43 = arith.constant 8 : i32
    %51 = arith.muli %arg1, %c8_i32_43 : i32
    %c0_i32_44 = arith.constant 0 : i32
    %52 = arith.addi %51, %c0_i32_44 : i32
    %c0_45 = arith.constant 0 : index
    %53 = arith.index_cast %52 : i32 to index
    %c1_46 = arith.constant 1 : index
    %c1_47 = arith.constant 1 : index
    %c0_48 = arith.constant 0 : index
    %54 = vector.load %arg3[%c0_45, %53, %c1_46, %c1_47, %c0_48] : memref<1x9x2x17x8xbf16, #tpu.memory_space<vmem>>, vector<1x8x1x16x4xbf16>
    %55 = vector.shape_cast %54 : vector<1x8x1x16x4xbf16> to vector<8x16x4xbf16>
    %56 = vector.shape_cast %55 : vector<8x16x4xbf16> to vector<128x4xbf16>
    %c5 = arith.constant 5 : index
    %c0_49 = arith.constant 0 : index
    %c0_50 = arith.constant 0 : index
    %57 = vector.load %arg4[%c5, %c0_49, %c0_50] : memref<9x4x32xbf16, #tpu.memory_space<vmem>>, vector<1x4x32xbf16>
    %58 = vector.shape_cast %57 : vector<1x4x32xbf16> to vector<4x32xbf16>
    %cst_51 = arith.constant dense<0.000000e+00> : vector<128x32xf32>
    %59 = tpu.matmul %56, %58, %cst_51 {dimension_numbers = #tpu.dot_dimension_numbers<[1], [0], [0], [1], [0, 0, 1, 1], [], []>} : vector<128x4xbf16>, vector<4x32xbf16>, vector<128x32xf32> -> vector<128x32xf32>
    %60 = arith.addf %50, %59 : vector<128x32xf32>
    %c8_i32_52 = arith.constant 8 : i32
    %61 = arith.muli %arg1, %c8_i32_52 : i32
    %c1_i32 = arith.constant 1 : i32
    %62 = arith.addi %61, %c1_i32 : i32
    %c0_53 = arith.constant 0 : index
    %63 = arith.index_cast %62 : i32 to index
    %c0_54 = arith.constant 0 : index
    %c0_55 = arith.constant 0 : index
    %c0_56 = arith.constant 0 : index
    %64 = vector.load %arg3[%c0_53, %63, %c0_54, %c0_55, %c0_56] : memref<1x9x2x17x8xbf16, #tpu.memory_space<vmem>>, vector<1x8x1x16x4xbf16>
    %65 = vector.shape_cast %64 : vector<1x8x1x16x4xbf16> to vector<8x16x4xbf16>
    %66 = vector.shape_cast %65 : vector<8x16x4xbf16> to vector<128x4xbf16>
    %c6 = arith.constant 6 : index
    %c0_57 = arith.constant 0 : index
    %c0_58 = arith.constant 0 : index
    %67 = vector.load %arg4[%c6, %c0_57, %c0_58] : memref<9x4x32xbf16, #tpu.memory_space<vmem>>, vector<1x4x32xbf16>
    %68 = vector.shape_cast %67 : vector<1x4x32xbf16> to vector<4x32xbf16>
    %cst_59 = arith.constant dense<0.000000e+00> : vector<128x32xf32>
    %69 = tpu.matmul %66, %68, %cst_59 {dimension_numbers = #tpu.dot_dimension_numbers<[1], [0], [0], [1], [0, 0, 1, 1], [], []>} : vector<128x4xbf16>, vector<4x32xbf16>, vector<128x32xf32> -> vector<128x32xf32>
    %70 = arith.addf %60, %69 : vector<128x32xf32>
    %c8_i32_60 = arith.constant 8 : i32
    %71 = arith.muli %arg1, %c8_i32_60 : i32
    %c1_i32_61 = arith.constant 1 : i32
    %72 = arith.addi %71, %c1_i32_61 : i32
    %c0_62 = arith.constant 0 : index
    %73 = arith.index_cast %72 : i32 to index
    %c0_63 = arith.constant 0 : index
    %c0_64 = arith.constant 0 : index
    %c4_65 = arith.constant 4 : index
    %74 = vector.load %arg3[%c0_62, %73, %c0_63, %c0_64, %c4_65] : memref<1x9x2x17x8xbf16, #tpu.memory_space<vmem>>, vector<1x8x1x16x4xbf16>
    %75 = vector.shape_cast %74 : vector<1x8x1x16x4xbf16> to vector<8x16x4xbf16>
    %76 = vector.shape_cast %75 : vector<8x16x4xbf16> to vector<128x4xbf16>
    %c7 = arith.constant 7 : index
    %c0_66 = arith.constant 0 : index
    %c0_67 = arith.constant 0 : index
    %77 = vector.load %arg4[%c7, %c0_66, %c0_67] : memref<9x4x32xbf16, #tpu.memory_space<vmem>>, vector<1x4x32xbf16>
    %78 = vector.shape_cast %77 : vector<1x4x32xbf16> to vector<4x32xbf16>
    %cst_68 = arith.constant dense<0.000000e+00> : vector<128x32xf32>
    %79 = tpu.matmul %76, %78, %cst_68 {dimension_numbers = #tpu.dot_dimension_numbers<[1], [0], [0], [1], [0, 0, 1, 1], [], []>} : vector<128x4xbf16>, vector<4x32xbf16>, vector<128x32xf32> -> vector<128x32xf32>
    %80 = arith.addf %70, %79 : vector<128x32xf32>
    %c8_i32_69 = arith.constant 8 : i32
    %81 = arith.muli %arg1, %c8_i32_69 : i32
    %c1_i32_70 = arith.constant 1 : i32
    %82 = arith.addi %81, %c1_i32_70 : i32
    %c0_71 = arith.constant 0 : index
    %83 = arith.index_cast %82 : i32 to index
    %c0_72 = arith.constant 0 : index
    %c1_73 = arith.constant 1 : index
    %c0_74 = arith.constant 0 : index
    %84 = vector.load %arg3[%c0_71, %83, %c0_72, %c1_73, %c0_74] : memref<1x9x2x17x8xbf16, #tpu.memory_space<vmem>>, vector<1x8x1x16x4xbf16>
    %85 = vector.shape_cast %84 : vector<1x8x1x16x4xbf16> to vector<8x16x4xbf16>
    %86 = vector.shape_cast %85 : vector<8x16x4xbf16> to vector<128x4xbf16>
    %c8 = arith.constant 8 : index
    %c0_75 = arith.constant 0 : index
    %c0_76 = arith.constant 0 : index
    %87 = vector.load %arg4[%c8, %c0_75, %c0_76] : memref<9x4x32xbf16, #tpu.memory_space<vmem>>, vector<1x4x32xbf16>
    %88 = vector.shape_cast %87 : vector<1x4x32xbf16> to vector<4x32xbf16>
    %cst_77 = arith.constant dense<0.000000e+00> : vector<128x32xf32>
    %89 = tpu.matmul %86, %88, %cst_77 {dimension_numbers = #tpu.dot_dimension_numbers<[1], [0], [0], [1], [0, 0, 1, 1], [], []>} : vector<128x4xbf16>, vector<4x32xbf16>, vector<128x32xf32> -> vector<128x32xf32>
    %90 = arith.addf %80, %89 : vector<128x32xf32>
    %c0_78 = arith.constant 0 : index
    %c0_79 = arith.constant 0 : index
    %91 = vector.load %arg5[%c0_78, %c0_79] : memref<1x32xf32, #tpu.memory_space<vmem>>, vector<1x32xf32>
    %92 = vector.broadcast %91 : vector<1x32xf32> to vector<128x32xf32>
    %93 = arith.addf %90, %92 : vector<128x32xf32>
    %cst_80 = arith.constant 0.000000e+00 : f32
    %94 = vector.broadcast %cst_80 : f32 to vector<128x32xf32>
    %95 = arith.maximumf %93, %94 : vector<128x32xf32>
    %96 = vector.shape_cast %95 : vector<128x32xf32> to vector<8x16x32xf32>
    %c0_81 = arith.constant 0 : index
    %c0_82 = arith.constant 0 : index
    %c0_83 = arith.constant 0 : index
    %c0_84 = arith.constant 0 : index
    %97 = vector.load %arg6[%c0_81, %c0_82, %c0_83, %c0_84] : memref<1x8x16x32xf32, #tpu.memory_space<vmem>>, vector<1x8x16x32xf32>
    %98 = vector.shape_cast %97 : vector<1x8x16x32xf32> to vector<8x16x32xf32>
    %99 = vector.shape_cast %96 : vector<8x16x32xf32> to vector<1x8x16x32xf32>
    tpu.vector_store %arg6[%c0_81, %c0_82, %c0_83, %c0_84], %99 {strides = array<i32>} : memref<1x8x16x32xf32, #tpu.memory_space<vmem>>, vector<1x8x16x32xf32>,
    return
  }
  func.func @transform_0(%arg0: i32, %arg1: i32, %arg2: i32) -> (i32, i32, i32, i32, i32) {
    %c0_i32 = arith.constant 0 : i32
    %c0_i32_0 = arith.constant 0 : i32
    %c0_i32_1 = arith.constant 0 : i32
    %c0_i32_2 = arith.constant 0 : i32
    %c0_i32_3 = arith.constant 0 : i32
    return %arg0, %c0_i32, %c0_i32_0, %c0_i32_1, %c0_i32_2 : i32, i32, i32, i32, i32
  }
  func.func @transform_1(%arg0: i32, %arg1: i32, %arg2: i32) -> (i32, i32, i32) {
    %c0_i32 = arith.constant 0 : i32
    %c0_i32_0 = arith.constant 0 : i32
    %c0_i32_1 = arith.constant 0 : i32
    return %c0_i32, %c0_i32_0, %arg2 : i32, i32, i32
  }
  func.func @transform_2(%arg0: i32, %arg1: i32, %arg2: i32) -> (i32, i32) {
    %c0_i32 = arith.constant 0 : i32
    %c0_i32_0 = arith.constant 0 : i32
    return %c0_i32, %arg2 : i32, i32
  }
  func.func @transform_3(%arg0: i32, %arg1: i32, %arg2: i32) -> (i32, i32, i32, i32) {
    %c0_i32 = arith.constant 0 : i32
    %c0_i32_0 = arith.constant 0 : i32
    return %arg0, %arg1, %c0_i32, %arg2 : i32, i32, i32, i32
  }
}

</mosaic_0001>

<bundles_post_ra>
// kernel: tpu_custom_call.1
= control target key start
LH: loop header
LB: loop body
LE: loop exit
PB: predicated region body
PF: predicated region fallthrough
CT: control target
= control target key end

     0   :  { %8 = vsyncpa [#allocation3], 0  ;;  %s4094_s0 = inlined_call_operand.vmem [shape: bf16[2,9,2,17,8], index: 0, kind: input, shape index: {}]   ;;  %s4095_s1 = inlined_call_operand.vmem [shape: bf16[9,4,32], index: 1, kind: input, shape index: {}]   ;;  %s4096_s2 = inlined_call_operand.vmem [shape: f32[1,32], index: 2, kind: input, shape index: {}]   ;;  %s4097_s3 = inlined_call_operand.hbm [shape: f32[2,8,16,32], index: 3, kind: output, shape index: {}]  }
   0x1   :  { %10 = vsyncpa [#allocation3 + $0x1], 0  ;;  %s3412_s12 = smov 0   ;;  %s3414_s13 = smov 0  }
   0x2   :  { %s3416_s14 = smov 0   ;;  %s3418_s15 = smov 0  }
   0x3   :  { %s3420_s16 = smov 0   ;;  %s3422_s17 = smov 0  }
   0x4 LB: > { %s2610_s18 = sadd.s32 4294967295, %s3386_s17   ;;  %s2611_s19 = sadd.s32 4294967294, %s3386_s17   ;;  %s3386_s17 = sphi %s3422_s17, %s16_s17   ;;  %s3382_s16 = sphi %s3420_s16, %s4106_s16   ;;  %s3378_s15 = sphi %s3418_s15, %s4105_s15   ;;  %s3374_s14 = sphi %s3416_s14, %s4104_s14   ;;  %s3370_s13 = sphi %s3414_s13, %s4103_s13   ;;  %s3366_s12 = sphi %s3412_s12, %s4102_s12  }
   0x5   : > { %s35_s20 = sadd.s32 1, %s3382_s16  ;;  %s124_s21 = sadd.s32 1, %s3374_s14 }
   0x6   : > { %p37_p0 = scmp.ge.s32.totalorder %s35_s20, 2  ;;  %p134_p1 = scmp.ne.s32.totalorder %s3374_s14, %s3370_s13 }
   0x7   : > { %p135_p2 = scmp.eq.s32.totalorder %s2610_s18, 1  ;;  %p140_p3 = scmp.ne.s32.totalorder %s3370_s13, %s3366_s12 }
   0x8   : > { %s4108_s20 = smov (%p37_p0, %s35_s20), 0  ;;  %p141_p5 = scmp.eq.s32.totalorder %s2611_s19, 1 }
   0x9   : > { %p3452_p4 = por %p135_p2, %p134_p1  ;;  %s117_s23 = ssub.s32 %s3382_s16, %s4108_s20 }
   0xa   : > { %p2616_p6 = scmp.ge.s32.totalorder %s3386_s17, 1  ;;  %p122_p7 = scmp.eq.s32.totalorder %s117_s23, 0 }
   0xb   : > { %p3459_p8 = por %p141_p5, %p140_p3  ;;  %p180_p9 = scmp.lt.s32.totalorder %s3386_s17, 3 }
   0xc   : > { %s3465_s25 = scalar_select %p122_p7, %s3374_s14, %s124_s21  }
   0xd   : > { %p181_p10 = pnand %p2616_p6, %p180_p9 }
   0xe   : > { %p211_p11 = scmp.lt.s32.totalorder (!%p181_p10), %s3378_s15, 1  ;;  %v2619_v0 = vld [vmem:[%s4095_s1 + $0x2] sm:$0x3] (!%p181_p10)  ;;  %vm329_vm0 = vcmask (!%p181_p10), 1041408   ;;  %v3476_v2 = vld [vmem:[%s4095_s1 + $0x8] sm:$0x3] (!%p181_p10) }
   0xf   : > { %184 = sbr.rel (%p181_p10) target bundleno = 520 (0x208), region = 32  ;;  %3207 = vmatprep.subr.msk.bf16.mxu1 (!%p181_p10), %vm329_vm0, %v2619_v0  ;;  %v331_v1 = vsel (!%p181_p10), %vm329_vm0, %v2619_v0, 0  ;;  %v3481_v3 = vld [vmem:[%s4095_s1] sm:$0x3] (!%p181_p10)  ;;  %3211 = vmatprep.subr.msk.bf16.mxu0 (!%p181_p10), %vm329_vm0, %v3476_v2  ;;  %v3488_v4 = vsel (!%p181_p10), %vm329_vm0, %v3476_v2, 0  ;;  %s3388_s18 = smov (!%p181_p10), 124  }
  0x10   : > { %2916 = vmatpush3.bf16.msra.mxu1 (!%p181_p10), %v331_v1  ;;  %v3493_v5 = vld [vmem:[%s4095_s1 + $0xa] sm:$0x3] (!%p181_p10)  ;;  %2988 = vmatpush3.bf16.msra.mxu0 (!%p181_p10), %v3488_v4  ;;  %vm304_vm1 = vcmask (!%p181_p10), 31744   ;;  %v455_v56 = vsel (!%p181_p10), %vm329_vm0, %v3481_v3, 0  ;;  %vm578_vm2 = vsmask.f32 (!%p181_p10), 3328 }
  0x11   : > { %3208 = vmatprep.subr.msk.bf16.mxu1 (!%p181_p10), %vm329_vm0, %v3481_v3  ;;  %3213 = vmatprep.subr.msk.bf16.mxu0 (!%p181_p10), %vm329_vm0, %v3493_v5  ;;  %vm579_vm3 = vsmask.f32 (!%p181_p10), 7440  ;;  %v3621_v3 = vld [vmem:[%s4095_s1 + $0x4] sm:$0x3] (!%p181_p10)  ;;  %s208_s6 = sand.u32 (!%p181_p10), 1, %s3370_s13   ;;  %vm2461_vm5 = vcmask (!%p181_p10), 261120  }
  0x12   : > { %vm3631_vm4 = vmor (!%p181_p10), %vm578_vm2, %vm579_vm3  ;;  %s2617_s9 = sshll.u32 (!%p181_p10), %s208_s6, 7  ;;  %s3389_s27 = smov (!%p181_p10), [#allocation2]  }
  0x13   : > { %s3991_s10 = scalar_lea.vmem (!%p181_p10), [#allocation2], %s2617_s9  ;;  %s3312_s28 = sshll.u32 (!%p181_p10), %s3389_s27, 4  ;;  %s3313_s28 = int_to_ptr.vmem [resolvable:$false] %s3312_s28 }
  0x14   : > { %s3314_s29 = scalar_lea.vmem (!%p181_p10), %s3313_s28, 4096 }
  0x16   : > { %s212_s5 = scalar_select %p211_p11, %s3378_s15, 1 }
  0x18   : > { %s3217_s8 = smul.u32 216, %s212_s5 }
  0x1a   : > { %s3503_s11 = scalar_lea.vmem %s4094_s0, %s3217_s8 }
  0x1b   : > { %v3506_v6 = vld [vmem:[%s3503_s11] sm:$0xff]   ;;  %v3509_v7 = vld [vmem:[%s3503_s11 + $0x18] sm:$0xff]   ;;  %v3278_v8 = vld [vmem:[%s3503_s11 + $0xc] sm:$0xff]  }
  0x1c   : > { %288 = vrot.lane.b32.xlu0 %v3506_v6, %s3388_s18  ;;  %290 = vrot.lane.b32.xlu1 %v3509_v7, %s3388_s18  ;;  %v3279_v9 = vld [vmem:[%s3503_s11 + $0x24] sm:$0xff]   ;;  %v3519_v10 = vld [vmem:[%s3503_s11 + $0x30] sm:$0xff]  }
  0x1d   : > { %v3281_v11 = vld [vmem:[%s3503_s11 + $0x3c] sm:$0xff]   ;;  %v3526_v12 = vld [vmem:[%s3503_s11 + $0x48] sm:$0xff]   ;;  %v3283_v13 = vld [vmem:[%s3503_s11 + $0x54] sm:$0xff]  }
  0x1e   : > { %v3533_v14 = vld [vmem:[%s3503_s11 + $0x60] sm:$0xff]   ;;  %v3537_v15 = vld [vmem:[%s3503_s11 + $0x78] sm:$0xff]   ;;  %v3542_v16 = vld [vmem:[%s3503_s11 + $0x90] sm:$0xff]  }
  0x1f   : > { %v3547_v17 = vld [vmem:[%s3503_s11 + $0xa8] sm:$0xff]   ;;  %v3552_v18 = vld [vmem:[%s3503_s11 + $0x18] sm:$0xff]   ;;  %v3557_v19 = vld [vmem:[%s3503_s11 + $0x30] sm:$0xff]  }
  0x20   : > { %1142 = vrot.lane.b32.xlu0 %v3278_v8, %s3388_s18  ;;  %1144 = vrot.lane.b32.xlu1 %v3279_v9, %s3388_s18  ;;  %v3562_v20 = vld [vmem:[%s3503_s11 + $0x48] sm:$0xff]   ;;  %v3567_v21 = vld [vmem:[%s3503_s11 + $0x60] sm:$0xff]  }
  0x21   : > { %v3572_v22 = vld [vmem:[%s3503_s11 + $0x78] sm:$0xff]   ;;  %v3577_v23 = vld [vmem:[%s3503_s11 + $0x90] sm:$0xff]   ;;  %v3582_v24 = vld [vmem:[%s3503_s11 + $0xa8] sm:$0xff]  }
  0x22   : > { %v3587_v25 = vld [vmem:[%s3503_s11 + $0xc0] sm:$0xff]   ;;  %v3296_v26 = vld [vmem:[%s3503_s11 + $0x6c] sm:$0xff]   ;;  %v3299_v29 = vld [vmem:[%s3503_s11 + $0xb4] sm:$0xff]  }
  0x23   : > { %v3297_v27 = vld [vmem:[%s3503_s11 + $0x84] sm:$0xff]   ;;  %v3298_v28 = vld [vmem:[%s3503_s11 + $0x9c] sm:$0xff]   ;;  %v2703_v30 = vld [vmem:[%s3503_s11 + $0xc] sm:$0xf] }
  0x24   : > { %292 = vrot.lane.b32.xlu0 %v3519_v10, %s3388_s18  ;;  %1146 = vrot.lane.b32.xlu1 %v3281_v11, %s3388_s18  ;;  %v2704_v31 = vld [vmem:[%s3503_s11 + $0x10] sm:$0xf]  ;;  %v1323_v32 = vshrl.u32 %v2703_v30, 16  ;;  %v1326_v33 = vshll.u32 %v2703_v30, 16  ;;  %v2705_v36 = vld [vmem:[%s3503_s11 + $0x14] sm:$0x1] }
  0x25   : > { %v1332_v34 = vshll.u32 %v2704_v31, 16  ;;  %v1336_v35 = vshrl.u32 %v2704_v31, 16  ;;  %v2706_v37 = vld [vmem:[%s3503_s11 + $0x24] sm:$0xf]  ;;  %v2707_v38 = vld [vmem:[%s3503_s11 + $0x28] sm:$0xf] }
  0x26   : > { %v1325_v39 = vrot.slane %v1323_v32, 4  ;;  %v1328_v40 = vrot.slane %v1326_v33, 5  ;;  %v2709_v43 = vld [vmem:[%s3503_s11 + $0x3c] sm:$0xf]  ;;  %v1342_v44 = vshll.u32 %v2705_v36, 16  ;;  %v1347_v46 = vshrl.u32 %v2706_v37, 16 }
  0x27   : > { %v3606_v41 = vrot.slane %v1332_v34, 5  ;;  %v1338_v42 = vrot.slane %v1336_v35, 4  ;;  %v2710_v45 = vld [vmem:[%s3503_s11 + $0x40] sm:$0xf]  ;;  %v1350_v47 = vshll.u32 %v2706_v37, 16  ;;  %v1356_v48 = vshll.u32 %v2707_v38, 16 }
  0x28   : > { %294 = vrot.lane.b32.xlu0 %v3526_v12, %s3388_s18  ;;  %1148 = vrot.lane.b32.xlu1 %v3283_v13, %s3388_s18  ;;  %v1360_v49 = vshrl.u32 %v2707_v38, 16  ;;  %v1371_v50 = vshrl.u32 %v2709_v43, 16  ;;  %v1374_v51 = vshll.u32 %v2709_v43, 16  ;;  %v1329_v52 = vor.u32 %v1328_v40, %v1325_v39  ;;  %v2708_v59 = vld [vmem:[%s3503_s11 + $0x2c] sm:$0x1] }
  0x29   : > { %v1339_v53 = vor.u32 %v1338_v42, %v3606_v41  ;;  %v1380_v54 = vshll.u32 %v2710_v45, 16  ;;  %v1384_v55 = vshrl.u32 %v2710_v45, 16  ;;  %v1344_v57 = vrot.slane %v1342_v44, 5  ;;  %v2712_v9 = vld [vmem:[%s3503_s11 + $0x54] sm:$0xf] }
  0x2a   : > { %v1349_v60 = vrot.slane %v1347_v46, 4  ;;  %v1352_v61 = vrot.slane %v1350_v47, 5  ;;  %v3614_v62 = vrot.slane %v1356_v48, 5  ;;  %v1362_v63 = vrot.slane %v1360_v49, 4  ;;  %v2711_v31 = vld [vmem:[%s3503_s11 + $0x44] sm:$0x1] }
  0x2b   : > { %v1373_v1 = vrot.slane %v1371_v50, 4  ;;  %v1376_v8 = vrot.slane %v1374_v51, 5  ;;  %v1330_v11 = vrot.slane %v1329_v52, 4  ;;  %v1340_v13 = vrot.slane %v1339_v53, 4  ;;  %v2715_v37 = vld [vmem:[%s3503_s11 + $0x6c] sm:$0xf] }
  0x2c   : > { %296 = vrot.lane.b32.xlu0 %v3533_v14, %s3388_s18  ;;  %298 = vrot.lane.b32.xlu1 %v3537_v15, %s3388_s18  ;;  %v1353_v33 = vor.u32 %v1352_v61, %v1349_v60  ;;  %v1363_v34 = vor.u32 %v1362_v63, %v3614_v62  ;;  %v1366_v35 = vshll.u32 %v2708_v59, 16  ;;  %v1395_v36 = vshrl.u32 %v2712_v9, 16  ;;  %v2716_v38 = vld [vmem:[%s3503_s11 + $0x70] sm:$0xf]  ;;  %v3983_v30 = vld [vmem:[%s4096_s2] ss:$0 sm:$0xff] }
  0x2d   : > { %v1377_v40 = vor.u32 %v1376_v8, %v1373_v1  ;;  %v1398_v42 = vshll.u32 %v2712_v9, 16  ;;  %v1335_v45 = vsel %vm3631_vm4, %v1330_v11, %v3606_v41  ;;  %v1345_v46 = vsel %vm3631_vm4, %v1340_v13, %v1344_v57  ;;  %v2714_v8 = vld [vmem:[%s3503_s11 + $0x5c] sm:$0x1]  ;;  %v2717_v9 = vld [vmem:[%s3503_s11 + $0x74] sm:$0x1] }
  0x2e   : > { %v1390_v48 = vshll.u32 %v2711_v31, 16  ;;  %v1419_v49 = vshrl.u32 %v2715_v37, 16  ;;  %v1422_v50 = vshll.u32 %v2715_v37, 16  ;;  %v1428_v51 = vshll.u32 %v2716_v38, 16 }
  0x2f   : > { %v1432_v52 = vshrl.u32 %v2716_v38, 16  ;;  %v1397_v41 = vrot.slane %v1395_v36, 4  ;;  %v1378_v57 = vrot.slane %v1377_v40, 4  ;;  %v1400_v59 = vrot.slane %v1398_v42, 5  ;;  %v2721_v42 = vld [vmem:[%s3503_s11 + $0x9c] sm:$0xf] }
  0x30   : > { %300 = vrot.lane.b32.xlu0 %v3542_v16, %s3388_s18  ;;  %302 = vrot.lane.b32.xlu1 %v3547_v17, %s3388_s18  ;;  %v2728_v63 = vcombine.low %v1335_v45, %v1345_v46  ;;  %v1392_v1 = vrot.slane %v1390_v48, 5  ;;  %v1421_v11 = vrot.slane %v1419_v49, 4  ;;  %v1424_v13 = vrot.slane %v1422_v50, 5 }
  0x31   : > { %v1401_v38 = vor.u32 %v1400_v59, %v1397_v41  ;;  %v1414_v40 = vshll.u32 %v2714_v8, 16  ;;  %v1467_v50 = vshrl.u32 %v2721_v42, 16 }
  0x32   : > { %v1425_v46 = vor.u32 %v1424_v13, %v1421_v11  ;;  %v2724_v13 = vld [vmem:[%s3503_s11 + $0xb4] sm:$0xf] }
  0x33   : > { %v1416_v41 = vrot.slane %v1414_v40, 5 }
  0x34   : > { %1884 = vrot.lane.b32.xlu0 %v3552_v18, %s3388_s18  ;;  %1886 = vrot.lane.b32.xlu1 %v3557_v19, %s3388_s18 }
  0x38   : > { %1888 = vrot.lane.b32.xlu0 %v3562_v20, %s3388_s18  ;;  %1890 = vrot.lane.b32.xlu1 %v3567_v21, %s3388_s18 }
  0x3c   : > { %1892 = vrot.lane.b32.xlu0 %v3572_v22, %s3388_s18  ;;  %1894 = vrot.lane.b32.xlu1 %v3577_v23, %s3388_s18 }
  0x40   : > { %1896 = vrot.lane.b32.xlu0 %v3582_v24, %s3388_s18  ;;  %1898 = vrot.lane.b32.xlu1 %v3587_v25, %s3388_s18 }
  0x44   : > { %1150 = vrot.lane.b32.xlu0 %v3296_v26, %s3388_s18  ;;  %1152 = vrot.lane.b32.xlu1 %v3297_v27, %s3388_s18  ;;  %v3624_v26 = vrot.slane %v1380_v54, 5  ;;  %v1386_v27 = vrot.slane %v1384_v55, 4  ;;  %v1354_v54 = vrot.slane %v1353_v33, 4  ;;  %v1364_v55 = vrot.slane %v1363_v34, 4 }
  0x46   : > { %v1387_v47 = vor.u32 %v1386_v27, %v3624_v26  ;;  %v3659_v27 = vrot.slane %v1428_v51, 5  ;;  %v1383_v37 = vsel %vm3631_vm4, %v1378_v57, %v3624_v26  ;;  %v1470_v51 = vshll.u32 %v2721_v42, 16 }
  0x48   : > { %1154 = vrot.lane.b32.xlu0 %v3298_v28, %s3388_s18  ;;  %1156 = vrot.lane.b32.xlu1 %v3299_v29, %s3388_s18  ;;  %v2713_v28 = vld [vmem:[%s3503_s11 + $0x58] sm:$0xf]  ;;  %v1565_v29 = vsel %vm329_vm0, %v3493_v5, 0  ;;  %v2760_v5 = vld [vmem:[%s4095_s1 + $0xc] sm:$0x3]  ;;  %s2496_s18 = sshll.u32 %s3991_s10, 4  ;;  %s4038_s18 = int_to_ptr.vmem [resolvable:$true] %s2496_s18 }
  0x49   : > { %v1404_v43 = vshll.u32 %v2713_v28, 16  ;;  %v1408_v44 = vshrl.u32 %v2713_v28, 16  ;;  %v1434_v28 = vrot.slane %v1432_v52, 4  ;;  %v1767_v34 = vsel %vm329_vm0, %v2760_v5, 0  ;;  %s3308_s26 = scalar_lea.vmem %s4038_s18, 2048  ;;  %p3315_p1 = scmp.lt.s32.totalorder %s4038_s18, %s3313_s28 }
  0x4a   : > { %p3309_p12 = scmp.ne.s32.totalorder %s4038_s18, %s3308_s26  ;;  %p3316_p2 = scmp.lt.s32.totalorder %s3314_s29, %s3308_s26 }
  0x4b   : > { %v3654_v60 = vrot.slane %v1404_v43, 5  ;;  %v1410_v61 = vrot.slane %v1408_v44, 4  ;;  %v2722_v43 = vld [vmem:[%s3503_s11 + $0xa0] sm:$0xf] }
  0x4c   : > { %v1476_v52 = vshll.u32 %v2722_v43, 16  ;;  %p3310_p13 = pnand %p3309_p12, %p3452_p4  ;;  %p3317_p3 = por %p3316_p2, %p3315_p1 }
  0x4e   : > { %p3311_p0 = pneg %p3310_p13 }
  0x50   : > { %p3318_p5 = pnand %p3317_p3, %p3311_p0 }
  0x8e   : > { %v289_v58 = vpop.permute.xlu0 %288  ;;  %v291_v0 = vpop.permute.xlu1 %290 }
  0x8f   : > { %2917 = vmatprep.mubr.msk.bf16.mxu1 %vm304_vm1, %v289_v58 }
  0x90   : > { %2918 = vmatmul.mubr.msk.bf16.vlgmr.msra.gmra.mrb[0].mxu1 %vm304_vm1, %v291_v0  ;;  %v1388_v0 = vrot.slane %v1387_v47, 4  ;;  %v1435_v47 = vor.u32 %v1434_v28, %v3659_v27 }
  0x91   : > { %2934 = vmatpush3.bf16.msra.mxu1 %v455_v56  ;;  %v1368_v56 = vrot.slane %v1366_v35, 5  ;;  %v2719_v35 = vld [vmem:[%s3503_s11 + $0x88] sm:$0xf] }
  0x92   : > { %v1143_v32 = vpop.permute.xlu0 %1142  ;;  %3209 = vmatprep.subr.msk.bf16.mxu1 %vm329_vm0, %v3621_v3  ;;  %v1145_v39 = vpop.permute.xlu1 %1144  ;;  %v1452_v26 = vshll.u32 %v2719_v35, 16  ;;  %v1456_v48 = vshrl.u32 %v2719_v35, 16  ;;  %v1436_v8 = vrot.slane %v1435_v47, 4  ;;  %v2725_v35 = vld [vmem:[%s3503_s11 + $0xb8] sm:$0xf] }
  0x93   : > { %2989 = vmatprep.mubr.msk.bf16.mxu0 %vm304_vm1, %v1143_v32  ;;  %v1359_v32 = vsel %vm3631_vm4, %v1354_v54, %v3614_v62  ;;  %v1369_v33 = vsel %vm3631_vm4, %v1364_v55, %v1368_v56  ;;  %v1393_v62 = vsel %vm3631_vm4, %v1388_v0, %v1392_v1  ;;  %v1402_v55 = vrot.slane %v1401_v38, 4  ;;  %v2723_v38 = vld [vmem:[%s3503_s11 + $0xa4] sm:$0x1] }
  0x94   : > { %2990 = vmatmul.mubr.msk.bf16.vlgmr.msra.gmra.mrb[0].mxu0 %vm304_vm1, %v1145_v39  ;;  %v1411_v39 = vor.u32 %v1410_v61, %v3654_v60  ;;  %v2729_v54 = vcombine.low %v1359_v32, %v1369_v33  ;;  %v2730_v57 = vcombine.low %v1383_v37, %v1393_v62  ;;  %v2720_v61 = vld [vmem:[%s3503_s11 + $0x8c] sm:$0x1]  ;;  %v1426_v1 = vrot.slane %v1425_v46, 4 }
  0x95   : > { %3006 = vmatpush3.bf16.msra.mxu0 %v1565_v29  ;;  %v2718_v29 = vld [vmem:[%s3503_s11 + $0x84] sm:$0xf]  ;;  %v1458_v11 = vrot.slane %v1456_v48, 4  ;;  %v1478_v32 = vrot.slane %v1476_v52, 5  ;;  %v1462_v42 = vshll.u32 %v2720_v61, 16  ;;  %v1494_v62 = vshll.u32 %v2724_v13, 16 }
  0x96   : > { %v293_v53 = vpop.permute.xlu0 %292  ;;  %3214 = vmatprep.subr.msk.bf16.mxu0 %vm329_vm0, %v2760_v5  ;;  %v1147_v58 = vpop.permute.xlu1 %1146  ;;  %v1438_v5 = vshll.u32 %v2717_v9, 16  ;;  %v1443_v44 = vshrl.u32 %v2718_v29, 16  ;;  %v1446_v45 = vshll.u32 %v2718_v29, 16  ;;  %v1412_v56 = vrot.slane %v1411_v39, 4  ;;  %v3695_v39 = vld [vmem:[%s4095_s1 + $0xe] sm:$0x3] }
  0x97   : > { %2921 = vmatprep.mubr.msk.bf16.mxu1 %vm304_vm1, %v293_v53  ;;  %2993 = vmatprep.mubr.msk.bf16.mxu0 %vm304_vm1, %v1147_v58  ;;  %v1480_v53 = vshrl.u32 %v2722_v43, 16  ;;  %v1454_v9 = vrot.slane %v1452_v26, 5  ;;  %v1469_v29 = vrot.slane %v1467_v50, 4  ;;  %v1491_v43 = vshrl.u32 %v2724_v13, 16 }
  0x98   : > { %v1440_v59 = vrot.slane %v1438_v5, 5  ;;  %v1448_v0 = vrot.slane %v1446_v45, 5  ;;  %v1417_v37 = vsel %vm3631_vm4, %v1412_v56, %v1416_v41  ;;  %v1504_v45 = vshrl.u32 %v2725_v35, 16 }
  0x99   : > { %v1482_v33 = vrot.slane %v1480_v53, 4  ;;  %v1459_v5 = vor.u32 %v1458_v11, %v1454_v9  ;;  %v1486_v48 = vshll.u32 %v2723_v38, 16  ;;  %v1493_v52 = vrot.slane %v1491_v43, 4  ;;  %v554_v11 = vld [vmem:[%s3503_s11] sm:$0xf] }
  0x9a   : > { %v295_v31 = vpop.permute.xlu0 %294  ;;  %v1149_v36 = vpop.permute.xlu1 %1148  ;;  %v1441_v46 = vsel %vm3631_vm4, %v1436_v8, %v1440_v59  ;;  %v1496_v53 = vrot.slane %v1494_v62, 5  ;;  %v1506_v56 = vrot.slane %v1504_v45, 4  ;;  %v2726_v59 = vld [vmem:[%s3503_s11 + $0xbc] sm:$0x1]  ;;  %v3732_v62 = vld [vmem:[%s4095_s1 + $0x6] sm:$0x3] }
  0x9b   : > { %2922 = vmatmul.mubr.msk.bf16.gmra.mrb[4].mxu1 %vm304_vm1, %v295_v31  ;;  %v1472_v31 = vrot.slane %v1470_v51, 5  ;;  %v1483_v26 = vor.u32 %v1482_v33, %v1478_v32  ;;  %v1464_v51 = vrot.slane %v1462_v42, 5  ;;  %v1510_v8 = vshll.u32 %v2726_v59, 16  ;;  %v558_v42 = vld [vmem:[%s3503_s11 + $0x1c] sm:$0xf] }
  0x9c   : > { %2994 = vmatmul.mubr.msk.bf16.gmra.mrb[4].mxu0 %vm304_vm1, %v1149_v36  ;;  %v1407_v36 = vsel %vm3631_vm4, %v1402_v55, %v3654_v60  ;;  %v1431_v60 = vsel %vm3631_vm4, %v1426_v1, %v3659_v27  ;;  %v1497_v61 = vor.u32 %v1496_v53, %v1493_v52  ;;  %v582_v33 = vshrl.u32 %v554_v11, 16 }
  0x9d   : > { %3007 = vmatprep.mubr.msk.bf16.mxu0 %vm304_vm1, %v2728_v63  ;;  %v1445_v63 = vrot.slane %v1443_v44, 4  ;;  %v1500_v44 = vshll.u32 %v2725_v35, 16  ;;  %v1473_v47 = vor.u32 %v1472_v31, %v1469_v29  ;;  %v2732_v27 = vcombine.low %v1431_v60, %v1441_v46  ;;  %v555_v31 = vld [vmem:[%s3503_s11 + $0x4] sm:$0xf] }
  0x9e   : > { %v297_v49 = vpop.permute.xlu0 %296  ;;  %v299_v58 = vpop.permute.xlu1 %298  ;;  %v1498_v29 = vrot.slane %v1497_v61, 4  ;;  %v585_v35 = vshll.u32 %v554_v11, 16  ;;  %v1512_v38 = vrot.slane %v1510_v8, 5  ;;  %v595_v43 = vshrl.u32 %v555_v31, 16  ;;  %v563_v8 = vld [vmem:[%s3503_s11 + $0x48] sm:$0xf] }
  0x9f   : > { %2925 = vmatprep.mubr.msk.bf16.mxu1 %vm304_vm1, %v297_v49  ;;  %v1449_v40 = vor.u32 %v1448_v0, %v1445_v63  ;;  %v1502_v55 = vrot.slane %v1500_v44, 5  ;;  %v1474_v41 = vrot.slane %v1473_v47, 4  ;;  %v584_v60 = vrot.slane %v582_v33, 4  ;;  %v566_v33 = vld [vmem:[%s3503_s11 + $0x60] sm:$0xf] }
  0xa0   : > { %v615_v46 = vshll.u32 %v558_v42, 16  ;;  %v619_v47 = vshrl.u32 %v558_v42, 16  ;;  %v1925_v11 = vsel %vm329_vm0, %v3695_v39, 0 }
  0xa1   : > { %v1450_v50 = vrot.slane %v1449_v40, 4  ;;  %v1507_v1 = vor.u32 %v1506_v56, %v1502_v55  ;;  %v1479_v13 = vsel %vm3631_vm4, %v1474_v41, %v1478_v32  ;;  %v557_v40 = vld [vmem:[%s3503_s11 + $0x18] sm:$0xf]  ;;  %v591_v32 = vshll.u32 %v555_v31, 16 }
  0xa2   : > { %v301_v28 = vpop.permute.xlu0 %300  ;;  %v303_v49 = vpop.permute.xlu1 %302  ;;  %v606_v44 = vshrl.u32 %v557_v40, 16  ;;  %v609_v45 = vshll.u32 %v557_v40, 16  ;;  %v3748_v53 = vrot.slane %v615_v46, 5  ;;  %v3780_v46 = vld [vmem:[%s4095_s1 + $0x10] sm:$0x3] }
  0xa3   : > { %2926 = vmatmul.mubr.msk.bf16.gmra.mrb[8].mxu1 %vm304_vm1, %v299_v58  ;;  %v1484_v58 = vrot.slane %v1483_v26, 4  ;;  %v1455_v63 = vsel %vm3631_vm4, %v1450_v50, %v1454_v9  ;;  %v824_v9 = vsel %vm329_vm0, %v3621_v3, 0  ;;  %v1503_v3 = vsel %vm3631_vm4, %v1498_v29, %v1502_v55  ;;  %v559_v55 = vld [vmem:[%s3503_s11 + $0x20] sm:$0x1] }
  0xa4   : > { %3008 = vmatmul.mubr.msk.bf16.vlgmr.msra.gmra.mrb[0].mxu0 %vm304_vm1, %v2729_v54  ;;  %2929 = vmatprep.mubr.msk.bf16.mxu1 %vm304_vm1, %v301_v28  ;;  %v1460_v54 = vrot.slane %v1459_v5, 4  ;;  %v587_v5 = vrot.slane %v585_v35, 5  ;;  %v3744_v26 = vrot.slane %v591_v32, 5  ;;  %v611_v52 = vrot.slane %v609_v45, 5 }
  0xa5   : > { %3024 = vmatpush3.bf16.msra.mxu0 %v1767_v34  ;;  %3011 = vmatprep.mubr.msk.bf16.mxu0 %vm304_vm1, %v2730_v57  ;;  %v2731_v34 = vcombine.low %v1407_v36, %v1417_v37  ;;  %v1488_v57 = vrot.slane %v1486_v48, 5  ;;  %v1508_v37 = vrot.slane %v1507_v1, 4  ;;  %v597_v48 = vrot.slane %v595_v43, 4 }
  0xa6   : > { %3215 = vmatprep.subr.msk.bf16.mxu0 %vm329_vm0, %v3695_v39  ;;  %v1465_v0 = vsel %vm3631_vm4, %v1460_v54, %v1464_v51  ;;  %v588_v50 = vor.u32 %v587_v5, %v584_v60  ;;  %v608_v51 = vrot.slane %v606_v44, 4  ;;  %v561_v54 = vld [vmem:[%s3503_s11 + $0x34] sm:$0xf]  ;;  %v625_v1 = vshll.u32 %v559_v55, 16 }
  0xa7   : > { %v2733_v28 = vcombine.low %v1455_v63, %v1465_v0  ;;  %v598_v56 = vor.u32 %v597_v48, %v3744_v26  ;;  %v639_v59 = vshll.u32 %v561_v54, 16  ;;  %v643_v61 = vshrl.u32 %v561_v54, 16  ;;  %v568_v54 = vld [vmem:[%s3503_s11 + $0x68] sm:$0x1] }
  0xa8   : > { %v589_v63 = vrot.slane %v588_v50, 4  ;;  %v627_v39 = vrot.slane %v625_v1, 5  ;;  %v681_v60 = vshll.u32 %v566_v33, 16 }
  0xa9   : > { %v3767_v35 = vrot.slane %v639_v59, 5  ;;  %v570_v59 = vld [vmem:[%s3503_s11 + $0x7c] sm:$0xf] }
  0xab   : > { %2930 = vmatmul.mubr.msk.bf16.gmra.mrb[12].mxu1 %vm304_vm1, %v303_v49  ;;  %v556_v49 = vld [vmem:[%s3503_s11 + $0x8] sm:$0x1] }
  0xac   : > { %3012 = vmatmul.mubr.msk.bf16.gmra.mrb[4].mxu0 %vm304_vm1, %v2731_v34  ;;  %2935 = vmatprep.mubr.msk.bf16.mxu1 %vm304_vm1, %v3506_v6  ;;  %v1489_v6 = vsel %vm3631_vm4, %v1484_v58, %v1488_v57  ;;  %v601_v41 = vshll.u32 %v556_v49, 16  ;;  %v565_v49 = vld [vmem:[%s3503_s11 + $0x50] sm:$0x1] }
  0xad   : > { %3015 = vmatprep.mubr.msk.bf16.mxu0 %vm304_vm1, %v2732_v27  ;;  %v2734_v36 = vcombine.low %v1479_v13, %v1489_v6  ;;  %v621_v27 = vrot.slane %v619_v47, 4  ;;  %v562_v13 = vld [vmem:[%s3503_s11 + $0x38] sm:$0x1]  ;;  %v564_v6 = vld [vmem:[%s3503_s11 + $0x4c] sm:$0xf] }
  0xae   : > { %v663_v32 = vshll.u32 %v564_v6, 16  ;;  %v667_v43 = vshrl.u32 %v564_v6, 16  ;;  %v649_v44 = vshll.u32 %v562_v13, 16 }
  0xaf   : > { %v622_v0 = vor.u32 %v621_v27, %v3748_v53 }
  0xb0   : > { %v669_v50 = vrot.slane %v667_v43, 4  ;;  %v651_v27 = vrot.slane %v649_v44, 5 }
  0xb1   : > { %v623_v42 = vrot.slane %v622_v0, 4  ;;  %v697_v0 = vshll.u32 %v568_v54, 16 }
  0xb3   : > { %2936 = vmatmul.mubr.msk.bf16.vlgmr.msra.gmra.mrb[0].mxu1 %vm304_vm1, %v3509_v7  ;;  %v1513_v7 = vsel %vm3631_vm4, %v1508_v37, %v1512_v38  ;;  %v567_v37 = vld [vmem:[%s3503_s11 + $0x64] sm:$0xf]  ;;  %v594_v38 = vsel %vm3631_vm4, %v589_v63, %v3744_v26 }
  0xb4   : > { %2952 = vmatpush3.bf16.msra.mxu1 %v824_v9  ;;  %3016 = vmatmul.mubr.msk.bf16.gmra.mrb[8].mxu0 %vm304_vm1, %v2733_v28  ;;  %v2735_v34 = vcombine.low %v1503_v3, %v1513_v7  ;;  %v599_v28 = vrot.slane %v598_v56, 4  ;;  %v654_v9 = vshrl.u32 %v563_v8, 16  ;;  %v678_v3 = vshrl.u32 %v566_v33, 16 }
  0xb5   : > { %2939 = vmatprep.mubr.msk.bf16.mxu1 %vm304_vm1, %v3519_v10  ;;  %3019 = vmatprep.mubr.msk.bf16.mxu0 %vm304_vm1, %v2734_v36  ;;  %v560_v10 = vld [vmem:[%s3503_s11 + $0x30] sm:$0xf]  ;;  %v657_v36 = vshll.u32 %v563_v8, 16  ;;  %v687_v7 = vshll.u32 %v567_v37, 16  ;;  %v691_v45 = vshrl.u32 %v567_v37, 16 }
  0xb6   : > { %3210 = vmatprep.subr.msk.bf16.mxu1 %vm329_vm0, %v3732_v62  ;;  %v630_v58 = vshrl.u32 %v560_v10, 16  ;;  %v633_v57 = vshll.u32 %v560_v10, 16  ;;  %v656_v26 = vrot.slane %v654_v9, 4  ;;  %v680_v10 = vrot.slane %v678_v3, 4  ;;  %v572_v8 = vld [vmem:[%s3503_s11 + $0x90] sm:$0xf] }
  0xb7   : > { %v659_v48 = vrot.slane %v657_v36, 5  ;;  %v693_v55 = vrot.slane %v691_v45, 4  ;;  %v729_v9 = vshll.u32 %v572_v8, 16 }
  0xb8   : > { %v632_v29 = vrot.slane %v630_v58, 4  ;;  %v635_v31 = vrot.slane %v633_v57, 5  ;;  %v673_v57 = vshll.u32 %v565_v49, 16 }
  0xb9   : > { %v660_v58 = vor.u32 %v659_v48, %v656_v26 }
  0xbb   : > { %2940 = vmatmul.mubr.msk.bf16.gmra.mrb[4].mxu1 %vm304_vm1, %v3526_v12  ;;  %v612_v12 = vor.u32 %v611_v52, %v608_v51  ;;  %v683_v51 = vrot.slane %v681_v60, 5  ;;  %v569_v52 = vld [vmem:[%s3503_s11 + $0x78] sm:$0xf]  ;;  %v661_v33 = vrot.slane %v660_v58, 4  ;;  %v1025_v60 = vsel %vm329_vm0, %v3732_v62, 0 }
  0xbc   : > { %3020 = vmatmul.mubr.msk.bf16.gmra.mrb[12].mxu0 %vm304_vm1, %v2735_v34  ;;  %2943 = vmatprep.mubr.msk.bf16.mxu1 %vm304_vm1, %v3533_v14  ;;  %v603_v14 = vrot.slane %v601_v41, 5  ;;  %v702_v1 = vshrl.u32 %v569_v52, 16  ;;  %v705_v6 = vshll.u32 %v569_v52, 16 }
  0xbd   : > { %3025 = vmatprep.mubr.msk.bf16.mxu0 %vm304_vm1, %v3552_v18  ;;  %v645_v18 = vrot.slane %v643_v61, 4  ;;  %v613_v40 = vrot.slane %v612_v12, 4  ;;  %v684_v12 = vor.u32 %v683_v51, %v680_v10 }
  0xbe   : > { %v604_v5 = vsel %vm3631_vm4, %v599_v28, %v603_v14  ;;  %v711_v28 = vshll.u32 %v570_v59, 16  ;;  %v715_v14 = vshrl.u32 %v570_v59, 16 }
  0xbf   : > { %v646_v47 = vor.u32 %v645_v18, %v3767_v35  ;;  %v618_v34 = vsel %vm3631_vm4, %v613_v40, %v3748_v53  ;;  %v3801_v53 = vrot.slane %v687_v7, 5  ;;  %v726_v18 = vshrl.u32 %v572_v8, 16  ;;  %v1885_v8 = vpop.permute.xlu0 %1884 }
  0xc0   : > { %v699_v40 = vrot.slane %v697_v0, 5  ;;  %v713_v43 = vrot.slane %v711_v28, 5  ;;  %v717_v3 = vrot.slane %v715_v14, 4  ;;  %v731_v7 = vrot.slane %v729_v9, 5  ;;  %v2786_v9 = vld [vmem:[%s3503_s11 + $0x18] sm:$0xf] }
  0xc1   : > { %v647_v41 = vrot.slane %v646_v47, 4  ;;  %v694_v13 = vor.u32 %v693_v55, %v3801_v53  ;;  %v728_v44 = vrot.slane %v726_v18, 4  ;;  %v576_v47 = vld [vmem:[%s3503_s11 + $0xac] sm:$0xf] }
  0xc2   : > { %v718_v10 = vor.u32 %v717_v3, %v713_v43  ;;  %v759_v52 = vshll.u32 %v576_v47, 16 }
  0xc3   : > { %2944 = vmatmul.mubr.msk.bf16.gmra.mrb[8].mxu1 %vm304_vm1, %v3537_v15  ;;  %v636_v15 = vor.u32 %v635_v31, %v632_v29  ;;  %v652_v31 = vsel %vm3631_vm4, %v647_v41, %v651_v27  ;;  %v732_v27 = vor.u32 %v731_v7, %v728_v44 }
  0xc4   : > { %3026 = vmatmul.mubr.msk.bf16.vlgmr.msra.gmra.mrb[0].mxu0 %vm304_vm1, %v3557_v19  ;;  %2947 = vmatprep.mubr.msk.bf16.mxu1 %vm304_vm1, %v3542_v16  ;;  %v628_v19 = vsel %vm3631_vm4, %v623_v42, %v627_v39  ;;  %v3795_v16 = vrot.slane %v663_v32, 5  ;;  %v704_v42 = vrot.slane %v702_v1, 4  ;;  %v695_v39 = vrot.slane %v694_v13, 4 }
  0xc5   : > { %3042 = vmatpush3.bf16.msra.mxu0 %v1925_v11  ;;  %3029 = vmatprep.mubr.msk.bf16.mxu0 %vm304_vm1, %v3562_v20  ;;  %v2645_v20 = vcombine.low %v594_v38, %v604_v5  ;;  %v637_v56 = vrot.slane %v636_v15, 4  ;;  %v2646_v61 = vcombine.low %v618_v34, %v628_v19  ;;  %v573_v11 = vld [vmem:[%s3503_s11 + $0x94] sm:$0xf]  ;;  %v685_v38 = vrot.slane %v684_v12, 4  ;;  %v575_v5 = vld [vmem:[%s3503_s11 + $0xa8] sm:$0xf] }
  0xc6   : > { %3216 = vmatprep.subr.msk.bf16.mxu0 %vm329_vm0, %v3780_v46  ;;  %v670_v63 = vor.u32 %v669_v50, %v3795_v16  ;;  %v735_v36 = vshll.u32 %v573_v11, 16  ;;  %v707_v32 = vrot.slane %v705_v6, 5  ;;  %v666_v26 = vsel %vm3631_vm4, %v661_v33, %v3795_v16  ;;  %v574_v19 = vld [vmem:[%s3503_s11 + $0x98] sm:$0x1] }
  0xc7   : > { %v642_v29 = vsel %vm3631_vm4, %v637_v56, %v3767_v35  ;;  %v571_v35 = vld [vmem:[%s3503_s11 + $0x80] sm:$0x1]  ;;  %v690_v62 = vsel %vm3631_vm4, %v685_v38, %v3801_v53  ;;  %v700_v49 = vsel %vm3631_vm4, %v695_v39, %v699_v40  ;;  %v750_v16 = vshrl.u32 %v575_v5, 16  ;;  %v1889_v38 = vpop.permute.xlu0 %1888  ;;  %v2789_v40 = vld [vmem:[%s3503_s11 + $0x30] sm:$0xf] }
  0xc8   : > { %v671_v37 = vrot.slane %v670_v63, 4  ;;  %v737_v45 = vrot.slane %v735_v36, 5  ;;  %v721_v34 = vshll.u32 %v571_v35, 16  ;;  %v708_v50 = vor.u32 %v707_v32, %v704_v42  ;;  %v1887_v36 = vpop.permute.xlu1 %1886  ;;  %v2790_v35 = vld [vmem:[%s3503_s11 + $0x34] sm:$0xf] }
  0xc9   : > { %v753_v51 = vshll.u32 %v575_v5, 16  ;;  %v745_v53 = vshll.u32 %v574_v19, 16  ;;  %v2649_v56 = vcombine.low %v690_v62, %v700_v49  ;;  %v733_v12 = vrot.slane %v732_v27, 4  ;;  %v2788_v19 = vld [vmem:[%s3503_s11 + $0x20] sm:$0x1] }
  0xca   : > { %v709_v41 = vrot.slane %v708_v50, 4  ;;  %v723_v58 = vrot.slane %v721_v34, 5  ;;  %v2065_v42 = vshrl.u32 %v2786_v9, 16  ;;  %v2068_v39 = vshll.u32 %v2786_v9, 16 }
  0xcb   : > { %2948 = vmatmul.mubr.msk.bf16.gmra.mrb[12].mxu1 %vm304_vm1, %v3547_v17  ;;  %v675_v17 = vrot.slane %v673_v57, 5  ;;  %v752_v57 = vrot.slane %v750_v16, 4  ;;  %v755_v59 = vrot.slane %v753_v51, 5  ;;  %v747_v1 = vrot.slane %v745_v53, 5  ;;  %v1893_v50 = vpop.permute.xlu0 %1892  ;;  %v2793_v51 = vld [vmem:[%s3503_s11 + $0x4c] sm:$0xf] }
  0xcc   : > { %3030 = vmatmul.mubr.msk.bf16.gmra.mrb[4].mxu0 %vm304_vm1, %v3567_v21  ;;  %2953 = vmatprep.mubr.msk.bf16.mxu1 %vm304_vm1, %v2645_v20  ;;  %v739_v21 = vshrl.u32 %v573_v11, 16  ;;  %v763_v20 = vshrl.u32 %v576_v47, 16  ;;  %v714_v11 = vsel %vm3631_vm4, %v709_v41, %v713_v43  ;;  %v738_v14 = vsel %vm3631_vm4, %v733_v12, %v737_v45  ;;  %v2792_v47 = vld [vmem:[%s3503_s11 + $0x48] sm:$0xf]  ;;  %v1891_v34 = vpop.permute.xlu1 %1890  ;;  %v3300_v53 = vld [vmem:[%s3503_s11 + $0xc] sm:$0xff]  }
  0xcd   : > { %3033 = vmatprep.mubr.msk.bf16.mxu0 %vm304_vm1, %v3572_v22  ;;  %v2647_v22 = vcombine.low %v642_v29, %v652_v31  ;;  %v676_v48 = vsel %vm3631_vm4, %v671_v37, %v675_v17  ;;  %v756_v13 = vor.u32 %v755_v59, %v752_v57  ;;  %v2307_v37 = vsel %vm329_vm0, %v3780_v46, 0  ;;  %v2795_v12 = vld [vmem:[%s3503_s11 + $0x60] sm:$0xf] }
  0xce   : > { %v741_v15 = vrot.slane %v739_v21, 4  ;;  %v2648_v55 = vcombine.low %v666_v26, %v676_v48  ;;  %v765_v63 = vrot.slane %v763_v20, 4  ;;  %v2787_v21 = vld [vmem:[%s3503_s11 + $0x1c] sm:$0xf]  ;;  %v2098_v5 = vshll.u32 %v2790_v35, 16 }
  0xcf   : > { %v757_v33 = vrot.slane %v756_v13, 4  ;;  %v2074_v46 = vshll.u32 %v2787_v21, 16  ;;  %v2078_v3 = vshrl.u32 %v2787_v21, 16  ;;  %v2102_v44 = vshrl.u32 %v2790_v35, 16 }
  0xd0   : > { %v742_v54 = vor.u32 %v741_v15, %v737_v45  ;;  %v2067_v45 = vrot.slane %v2065_v42, 4  ;;  %v2070_v15 = vrot.slane %v2068_v39, 5  ;;  %v2116_v20 = vshll.u32 %v2792_v47, 16 }
  0xd1   : > { %v3873_v26 = vrot.slane %v2074_v46, 5  ;;  %v2080_v48 = vrot.slane %v2078_v3, 4  ;;  %v2104_v16 = vrot.slane %v2102_v44, 4 }
  0xd2   : > { %v743_v0 = vrot.slane %v742_v54, 4  ;;  %v2071_v27 = vor.u32 %v2070_v15, %v2067_v45  ;;  %v2791_v54 = vld [vmem:[%s3503_s11 + $0x38] sm:$0x1] }
  0xd3   : > { %2954 = vmatmul.mubr.msk.bf16.vlgmr.msra.gmra.mrb[0].mxu1 %vm304_vm1, %v2646_v61  ;;  %v761_v61 = vrot.slane %v759_v52, 5  ;;  %v2113_v52 = vshrl.u32 %v2792_v47, 16  ;;  %v2108_v59 = vshll.u32 %v2791_v54, 16  ;;  %v3303_v54 = vld [vmem:[%s3503_s11 + $0x54] sm:$0xff]  }
  0xd4   : > { %2970 = vmatpush3.bf16.msra.mxu1 %v1025_v60  ;;  %3034 = vmatmul.mubr.msk.bf16.gmra.mrb[8].mxu0 %vm304_vm1, %v3577_v23  ;;  %v719_v23 = vrot.slane %v718_v10, 4  ;;  %v748_v29 = vsel %vm3631_vm4, %v743_v0, %v747_v1  ;;  %v2089_v60 = vshrl.u32 %v2789_v40, 16  ;;  %v3876_v10 = vrot.slane %v2098_v5, 5 }
  0xd5   : > { %2957 = vmatprep.mubr.msk.bf16.mxu1 %vm304_vm1, %v2647_v22  ;;  %3037 = vmatprep.mubr.msk.bf16.mxu0 %vm304_vm1, %v3582_v24  ;;  %v577_v24 = vld [vmem:[%s3503_s11 + $0xb0] sm:$0x1]  ;;  %v766_v6 = vor.u32 %v765_v63, %v761_v61  ;;  %v2651_v31 = vcombine.low %v738_v14, %v748_v29  ;;  %v762_v32 = vsel %vm3631_vm4, %v757_v33, %v761_v61  ;;  %v2092_v22 = vshll.u32 %v2789_v40, 16  ;;  %v2799_v29 = vld [vmem:[%s3503_s11 + $0x7c] sm:$0xf] }
  0xd6   : > { %3212 = vmatprep.subr.msk.bf16.mxu1 %vm329_vm0, %v3476_v2  ;;  %v724_v2 = vsel %vm3631_vm4, %v719_v23, %v723_v58  ;;  %v769_v28 = vshll.u32 %v577_v24, 16  ;;  %v2091_v62 = vrot.slane %v2089_v60, 4  ;;  %v2122_v23 = vshll.u32 %v2793_v51, 16 }
  0xd7   : > { %v767_v17 = vrot.slane %v766_v6, 4  ;;  %v2094_v49 = vrot.slane %v2092_v22, 5  ;;  %v2126_v58 = vshrl.u32 %v2793_v51, 16  ;;  %v2105_v57 = vor.u32 %v2104_v16, %v3876_v10 }
  0xd8   : > { %v771_v18 = vrot.slane %v769_v28, 5  ;;  %v2115_v61 = vrot.slane %v2113_v52, 4  ;;  %v2118_v63 = vrot.slane %v2116_v20, 5  ;;  %v2072_v0 = vrot.slane %v2071_v27, 4  ;;  %v2802_v20 = vld [vmem:[%s3503_s11 + $0x94] sm:$0xf] }
  0xd9   : > { %v2095_v41 = vor.u32 %v2094_v49, %v2091_v62  ;;  %v3890_v13 = vrot.slane %v2122_v23, 5  ;;  %v2128_v6 = vrot.slane %v2126_v58, 4  ;;  %v2137_v28 = vshrl.u32 %v2795_v12, 16  ;;  %v2801_v49 = vld [vmem:[%s3503_s11 + $0x90] sm:$0xf] }
  0xda   : > { %v772_v43 = vsel %vm3631_vm4, %v767_v17, %v771_v18  ;;  %v2140_v14 = vshll.u32 %v2795_v12, 16  ;;  %v2106_v33 = vrot.slane %v2105_v57, 4  ;;  %v2110_v17 = vrot.slane %v2108_v59, 5  ;;  %v2794_v18 = vld [vmem:[%s3503_s11 + $0x50] sm:$0x1] }
  0xdb   : > { %2958 = vmatmul.mubr.msk.bf16.gmra.mrb[4].mxu1 %vm304_vm1, %v2648_v55  ;;  %v2652_v7 = vcombine.low %v762_v32, %v772_v43  ;;  %v2081_v55 = vor.u32 %v2080_v48, %v3873_v26  ;;  %v2119_v9 = vor.u32 %v2118_v63, %v2115_v61  ;;  %v2077_v42 = vsel %vm3631_vm4, %v2072_v0, %v3873_v26  ;;  %v3302_v43 = vld [vmem:[%s3503_s11 + $0x3c] sm:$0xff]   ;;  %v2804_v23 = vld [vmem:[%s3503_s11 + $0xa8] sm:$0xf]  ;;  %v2805_v58 = vld [vmem:[%s3503_s11 + $0xac] sm:$0xf] }
  0xdc   : > { %3038 = vmatmul.mubr.msk.bf16.gmra.mrb[12].mxu0 %vm304_vm1, %v3587_v25  ;;  %2961 = vmatprep.mubr.msk.bf16.mxu1 %vm304_vm1, %v2649_v56  ;;  %v2650_v25 = vcombine.low %v714_v11, %v724_v2  ;;  %v2084_v56 = vshll.u32 %v2788_v19, 16  ;;  %v2798_v11 = vld [vmem:[%s3503_s11 + $0x78] sm:$0xf]  ;;  %v1895_v2 = vpop.permute.xlu1 %1894  ;;  %v2170_v35 = vshll.u32 %v2799_v29, 16  ;;  %v2174_v32 = vshrl.u32 %v2799_v29, 16  ;;  %v3304_v57 = vld [vmem:[%s3503_s11 + $0x6c] sm:$0xff]  }
  0xdd   : > { %3043 = vmatprep.mubr.msk.bf16.mxu0 %vm304_vm1, %v1885_v8  ;;  %v2082_v1 = vrot.slane %v2081_v55, 4  ;;  %v2796_v8 = vld [vmem:[%s3503_s11 + $0x64] sm:$0xf]  ;;  %v2164_v40 = vshll.u32 %v2798_v11, 16  ;;  %v2132_v46 = vshll.u32 %v2794_v18, 16  ;;  %v2139_v3 = vrot.slane %v2137_v28, 4 }
  0xde   : > { %v2086_v24 = vrot.slane %v2084_v56, 5  ;;  %v2146_v21 = vshll.u32 %v2796_v8, 16  ;;  %v2142_v60 = vrot.slane %v2140_v14, 5  ;;  %v2111_v5 = vsel %vm3631_vm4, %v2106_v33, %v2110_v17 }
  0xdf   : > { %v2120_v44 = vrot.slane %v2119_v9, 4  ;;  %v2166_v26 = vrot.slane %v2164_v40, 5  ;;  %v3916_v19 = vrot.slane %v2170_v35, 5  ;;  %v2176_v62 = vrot.slane %v2174_v32, 4  ;;  %v3305_v35 = vld [vmem:[%s3503_s11 + $0x84] sm:$0xff]  }
  0xe0   : > { %v2087_v39 = vsel %vm3631_vm4, %v2082_v1, %v2086_v24  ;;  %v3913_v45 = vrot.slane %v2146_v21, 5  ;;  %v2134_v16 = vrot.slane %v2132_v46, 5  ;;  %v2143_v51 = vor.u32 %v2142_v60, %v2139_v3  ;;  %v2807_v21 = vld [vmem:[%s3503_s11 + $0xc0] sm:$0xf]  ;;  %v2806_v46 = vld [vmem:[%s3503_s11 + $0xb0] sm:$0x1] }
  0xe1   : > { %v2811_v48 = vcombine.low %v2077_v42, %v2087_v39  ;;  %v2177_v59 = vor.u32 %v2176_v62, %v3916_v19  ;;  %v2188_v61 = vshll.u32 %v2801_v49, 16  ;;  %v2194_v63 = vshll.u32 %v2802_v20, 16  ;;  %v2808_v39 = vld [vmem:[%s3503_s11 + $0xc4] sm:$0xf]  ;;  %v3306_v3 = vld [vmem:[%s3503_s11 + $0x9c] sm:$0xff]  }
  0xe2   : > { %v2198_v12 = vshrl.u32 %v2802_v20, 16  ;;  %v2125_v0 = vsel %vm3631_vm4, %v2120_v44, %v3890_v13  ;;  %v2144_v24 = vrot.slane %v2143_v51, 4  ;;  %v2222_v28 = vshrl.u32 %v2805_v58, 16 }
  0xe3   : > { %2962 = vmatmul.mubr.msk.bf16.gmra.mrb[8].mxu1 %vm304_vm1, %v2650_v25  ;;  %v1897_v25 = vpop.permute.xlu0 %1896  ;;  %v2178_v33 = vrot.slane %v2177_v59, 4  ;;  %v2190_v17 = vrot.slane %v2188_v61, 5 }
  0xe4   : > { %3044 = vmatmul.mubr.msk.bf16.vlgmr.msra.gmra.mrb[0].mxu0 %vm304_vm1, %v1887_v36  ;;  %2965 = vmatprep.mubr.msk.bf16.mxu1 %vm304_vm1, %v2651_v31  ;;  %v2096_v31 = vrot.slane %v2095_v41, 4  ;;  %v3301_v36 = vld [vmem:[%s3503_s11 + $0x24] sm:$0xff]   ;;  %v2185_v41 = vshrl.u32 %v2801_v49, 16  ;;  %v2200_v18 = vrot.slane %v2198_v12, 4  ;;  %v2224_v42 = vrot.slane %v2222_v28, 4 }
  0xe5   : > { %3060 = vmatpush3.bf16.msra.mxu0 %v2307_v37  ;;  %3047 = vmatprep.mubr.msk.bf16.mxu0 %vm304_vm1, %v1889_v38  ;;  %v2150_v37 = vshrl.u32 %v2796_v8, 16  ;;  %v2161_v38 = vshrl.u32 %v2798_v11, 16  ;;  %v2209_v11 = vshrl.u32 %v2804_v23, 16  ;;  %v2149_v32 = vsel %vm3631_vm4, %v2144_v24, %v3913_v45 }
  0xe6   : > { %v2101_v22 = vsel %vm3631_vm4, %v2096_v31, %v3876_v10  ;;  %v2187_v31 = vrot.slane %v2185_v41, 4  ;;  %v3307_v41 = vld [vmem:[%s3503_s11 + $0xb4] sm:$0xff]  }
  0xe7   : > { %v2152_v15 = vrot.slane %v2150_v37, 4  ;;  %v2163_v47 = vrot.slane %v2161_v38, 4  ;;  %v2812_v27 = vcombine.low %v2101_v22, %v2111_v5  ;;  %v2211_v37 = vrot.slane %v2209_v11, 4 }
  0xe8   : > { %v2191_v22 = vor.u32 %v2190_v17, %v2187_v31 }
  0xe9   : > { %v2167_v55 = vor.u32 %v2166_v26, %v2163_v47  ;;  %v2246_v47 = vshrl.u32 %v2808_v39, 16 }
  0xea   : > { %v2192_v49 = vrot.slane %v2191_v22, 4 }
  0xeb   : > { %2966 = vmatmul.mubr.msk.bf16.gmra.mrb[12].mxu1 %vm304_vm1, %v2652_v7  ;;  %v2797_v7 = vld [vmem:[%s3503_s11 + $0x68] sm:$0x1]  ;;  %v2168_v29 = vrot.slane %v2167_v55, 4 }
  0xec   : > { %3048 = vmatmul.mubr.msk.bf16.gmra.mrb[4].mxu0 %vm304_vm1, %v1891_v34  ;;  %2971 = vmatprep.mubr.msk.bf16.mxu1 %vm304_vm1, %v3300_v53  ;;  %v2800_v34 = vld [vmem:[%s3503_s11 + $0x80] sm:$0x1]  ;;  %v2156_v52 = vshll.u32 %v2797_v7, 16  ;;  %v2153_v53 = vor.u32 %v2152_v15, %v3913_v45  ;;  %v2233_v7 = vshrl.u32 %v2807_v21, 16  ;;  %v2236_v45 = vshll.u32 %v2807_v21, 16 }
  0xed   : > { %3051 = vmatprep.mubr.msk.bf16.mxu0 %vm304_vm1, %v1893_v50  ;;  %v1899_v50 = vpop.permute.xlu1 %1898  ;;  %v2180_v56 = vshll.u32 %v2800_v34, 16  ;;  %v2242_v15 = vshll.u32 %v2808_v39, 16  ;;  %v2228_v34 = vshll.u32 %v2806_v46, 16 }
  0xee   : > { %v2158_v8 = vrot.slane %v2156_v52, 5  ;;  %v2154_v14 = vrot.slane %v2153_v53, 4  ;;  %v2235_v51 = vrot.slane %v2233_v7, 4  ;;  %v2238_v52 = vrot.slane %v2236_v45, 5 }
  0xef   : > { %v2244_v20 = vrot.slane %v2242_v15, 5  ;;  %v2230_v55 = vrot.slane %v2228_v34, 5 }
  0xf3   : > { %2972 = vmatmul.mubr.msk.bf16.vlgmr.msra.gmra.mrb[0].mxu1 %vm304_vm1, %v3301_v36  ;;  %v2803_v36 = vld [vmem:[%s3503_s11 + $0x98] sm:$0x1] }
  0xf4   : > { %3078 = vmatpush3.bf16.msra.mxu1 %v3488_v4  ;;  %3052 = vmatmul.mubr.msk.bf16.gmra.mrb[8].mxu0 %vm304_vm1, %v1895_v2  ;;  %v2129_v4 = vor.u32 %v2128_v6, %v3890_v13  ;;  %v2212_v2 = vshll.u32 %v2804_v23, 16  ;;  %v2218_v6 = vshll.u32 %v2805_v58, 16  ;;  %v2196_v13 = vrot.slane %v2194_v63, 5 }
  0xf5   : > { %2975 = vmatprep.mubr.msk.bf16.mxu1 %vm304_vm1, %v3302_v43  ;;  %3055 = vmatprep.mubr.msk.bf16.mxu0 %vm304_vm1, %v1897_v25  ;;  %v2182_v25 = vrot.slane %v2180_v56, 5  ;;  %v2159_v43 = vsel %vm3631_vm4, %v2154_v14, %v2158_v8  ;;  %v2204_v44 = vshll.u32 %v2803_v36, 16  ;;  %v2809_v56 = vld [vmem:[%s3503_s11 + $0xc8] sm:$0x1]  ;;  %s2833_s11 = sshll.u32 %s3378_s15, 11  ;;  %s4048_s15 = scalar_lea.sflag [#allocation3], %s208_s6 }
  0xf6   : > { %v2130_v10 = vrot.slane %v2129_v4, 4  ;;  %v2214_v38 = vrot.slane %v2212_v2, 5  ;;  %v2220_v40 = vrot.slane %v2218_v6, 5  ;;  %v2173_v4 = vsel %vm3631_vm4, %v2168_v29, %v3916_v19  ;;  %s4036_s23 = scalar_lea.hbm %s4097_s3, %s2833_s11 }
  0xf7   : > { %v2183_v60 = vsel %vm3631_vm4, %v2178_v33, %v2182_v25  ;;  %v2201_v5 = vor.u32 %v2200_v18, %v2196_v13  ;;  %v2814_v19 = vcombine.low %v2149_v32, %v2159_v43  ;;  %v2197_v23 = vsel %vm3631_vm4, %v2192_v49, %v2196_v13 }
  0xf8   : > { %v2135_v1 = vsel %vm3631_vm4, %v2130_v10, %v2134_v16  ;;  %v2215_v26 = vor.u32 %v2214_v38, %v2211_v37  ;;  %v2815_v62 = vcombine.low %v2173_v4, %v2183_v60  ;;  %v2206_v10 = vrot.slane %v2204_v44, 5  ;;  %v1151_v16 = vpop.permute.xlu0 %1150 }
  0xf9   : > { %v2813_v9 = vcombine.low %v2125_v0, %v2135_v1  ;;  %v2252_v61 = vshll.u32 %v2809_v56, 16  ;;  %v1153_v0 = vpop.permute.xlu1 %1152 }
  0xfb   : > { %2976 = vmatmul.mubr.msk.bf16.gmra.mrb[4].mxu1 %vm304_vm1, %v3303_v54  ;;  %v2216_v54 = vrot.slane %v2215_v26, 4  ;;  %v2254_v6 = vrot.slane %v2252_v61, 5 }
  0xfc   : > { %3056 = vmatmul.mubr.msk.bf16.gmra.mrb[12].mxu0 %vm304_vm1, %v1899_v50  ;;  %2979 = vmatprep.mubr.msk.bf16.mxu1 %vm304_vm1, %v3304_v57  ;;  %v2202_v50 = vrot.slane %v2201_v5, 4  ;;  %v2239_v57 = vor.u32 %v2238_v52, %v2235_v51  ;;  %v1155_v24 = vpop.permute.xlu0 %1154 }
  0xfd   : > { %3061 = vmatprep.mubr.msk.bf16.mxu0 %vm304_vm1, %v2811_v48  ;;  %v2225_v48 = vor.u32 %v2224_v42, %v2220_v40  ;;  %v2221_v63 = vsel %vm3631_vm4, %v2216_v54, %v2220_v40  ;;  %v1157_v29 = vpop.permute.xlu1 %1156 }
  0xfe   : > { %v2207_v58 = vsel %vm3631_vm4, %v2202_v50, %v2206_v10  ;;  %v2240_v11 = vrot.slane %v2239_v57, 4 }
  0xff   : > { %v2226_v53 = vrot.slane %v2225_v48, 4  ;;  %v2816_v1 = vcombine.low %v2197_v23, %v2207_v58 }
 0x100   : > { %v2245_v28 = vsel %vm3631_vm4, %v2240_v11, %v2244_v20 }
 0x101   : > { %v2231_v12 = vsel %vm3631_vm4, %v2226_v53, %v2230_v55 }
 0x102   : > { %v2817_v8 = vcombine.low %v2221_v63, %v2231_v12 }
 0x103   : > { %2980 = vmatmul.mubr.msk.bf16.gmra.mrb[8].mxu1 %vm304_vm1, %v3305_v35 }
 0x104   : > { %3062 = vmatmul.mubr.msk.bf16.vlgmr.msra.gmra.mrb[0].mxu0 %vm304_vm1, %v2812_v27  ;;  %2983 = vmatprep.mubr.msk.bf16.mxu1 %vm304_vm1, %v3306_v3  ;;  %v2248_v27 = vrot.slane %v2246_v47, 4 }
 0x105   : > { %3065 = vmatprep.mubr.msk.bf16.mxu0 %vm304_vm1, %v2813_v9 }
 0x106   : > { %v2249_v59 = vor.u32 %v2248_v27, %v2244_v20 }
 0x108   : > { %v2250_v2 = vrot.slane %v2249_v59, 4 }
 0x10a   : > { %v2255_v14 = vsel %vm3631_vm4, %v2250_v2, %v2254_v6 }
 0x10b   : > { %2984 = vmatmul.mubr.msk.bf16.gmra.mrb[12].mxu1 %vm304_vm1, %v3307_v41  ;;  %v2818_v25 = vcombine.low %v2245_v28, %v2255_v14 }
 0x10c   : > { %3066 = vmatmul.mubr.msk.bf16.gmra.mrb[4].mxu0 %vm304_vm1, %v2814_v19  ;;  %2997 = vmatprep.mubr.msk.bf16.mxu1 %vm304_vm1, %v1151_v16 }
 0x10d   : > { %3069 = vmatprep.mubr.msk.bf16.mxu0 %vm304_vm1, %v2815_v62 }
 0x113   : > { %2998 = vmatmul.mubr.msk.bf16.vlgmr.msra.gmra.mrb[8].mxu1 %vm304_vm1, %v1153_v0 }
 0x114   : > { %3070 = vmatmul.mubr.msk.bf16.gmra.mrb[8].mxu0 %vm304_vm1, %v2816_v1  ;;  %3001 = vmatprep.mubr.msk.bf16.mxu1 %vm304_vm1, %v1155_v24 }
 0x115   : > { %3073 = vmatprep.mubr.msk.bf16.mxu0 %vm304_vm1, %v2817_v8 }
 0x11b   : > { %3002 = vmatmul.mubr.msk.bf16.gmra.mrb[12].mxu1 %vm304_vm1, %v1157_v29 }
 0x11c   : > { %3074 = vmatmul.mubr.msk.bf16.gmra.mrb[12].mxu0 %vm304_vm1, %v2818_v25 }
 0x1c6   : > { %v2973_v31 = vpop.f32.mrb[0].mxu1 }
 0x1c7   : > { %v1061_v33 = vpop.f32.mrb[1].mxu1 }
 0x1c8   : > { %v2974_v17 = vpop.f32.mrb[2].mxu1 }
 0x1c9   : > { %v1064_v13 = vpop.f32.mrb[3].mxu1 }
 0x1ce   : > { %v2977_v18 = vpop.f32.mrb[4].mxu1 }
 0x1cf   : > { %v1077_v9 = vpop.f32.mrb[5].mxu1 }
 0x1d0   : > { %v2978_v36 = vpop.f32.mrb[6].mxu1 }
 0x1d1   : > { %v1080_v21 = vpop.f32.mrb[7].mxu1 }
 0x1d7   : > { %v3063_v37 = vpop.f32.mrb[0].mxu0 }
 0x1d8   : > { %v3079_v38 = vadd.f32 %v3063_v37, %v2973_v31  ;;  %v2343_v40 = vpop.f32.mrb[1].mxu0 }
 0x1d9   : > { %v3080_v42 = vadd.f32 %v2343_v40, %v1061_v33  ;;  %v3064_v39 = vpop.f32.mrb[2].mxu0 }
 0x1da   : > { %v2431_v35 = vadd.f32 %v3079_v38, %v3983_v30  ;;  %v3081_v32 = vadd.f32 %v3064_v39, %v2974_v17  ;;  %v2346_v43 = vpop.f32.mrb[3].mxu0 }
 0x1db   : > { %v2429_v4 = vadd.f32 %v3080_v42, %v3983_v30  ;;  %v3082_v46 = vadd.f32 %v2346_v43, %v1064_v13 }
 0x1dc   : > { %v2447_v3 = vmax.f32 %v2431_v35, 0.0  ;;  %v2432_v60 = vadd.f32 %v3081_v32, %v3983_v30 }
 0x1dd   : > { %v2445_v22 = vmax.f32 %v2429_v4, 0.0  ;;  %v2430_v5 = vadd.f32 %v3082_v46, %v3983_v30 }
 0x1de   : > { %2464 = vst.msk [vmem:[%s3991_s10 + $0x10] sm:$0xff] %vm2461_vm5, %v2447_v3  ;;  %v2448_v44 = vmax.f32 %v2432_v60, 0.0 }
 0x1df   : > { %2462 = vst.msk [vmem:[%s3991_s10] sm:$0xff] %vm2461_vm5, %v2445_v22  ;;  %v2446_v7 = vmax.f32 %v2430_v5, 0.0  ;;  %v3067_v45 = vpop.f32.mrb[4].mxu0 }
 0x1e0   : > { %2465 = vst.msk [vmem:[%s3991_s10 + $0x18] sm:$0xff] %vm2461_vm5, %v2448_v44  ;;  %v3083_v15 = vadd.f32 %v3067_v45, %v2977_v18  ;;  %v2359_v47 = vpop.f32.mrb[5].mxu0 }
 0x1e1   : > { %2463 = vst.msk [vmem:[%s3991_s10 + $0x8] sm:$0xff] %vm2461_vm5, %v2446_v7  ;;  %v3084_v26 = vadd.f32 %v2359_v47, %v1077_v9  ;;  %v3068_v48 = vpop.f32.mrb[6].mxu0 }
 0x1e2   : > { %v2435_v34 = vadd.f32 %v3083_v15, %v3983_v30  ;;  %v3085_v19 = vadd.f32 %v3068_v48, %v2978_v36  ;;  %v2362_v62 = vpop.f32.mrb[7].mxu0 }
 0x1e3   : > { %v2433_v49 = vadd.f32 %v3084_v26, %v3983_v30  ;;  %v3086_v50 = vadd.f32 %v2362_v62, %v1080_v21 }
 0x1e4   : > { %v2451_v10 = vmax.f32 %v2435_v34, 0.0  ;;  %v2436_v16 = vadd.f32 %v3085_v19, %v3983_v30 }
 0x1e5   : > { %v2449_v51 = vmax.f32 %v2433_v49, 0.0  ;;  %v2434_v52 = vadd.f32 %v3086_v50, %v3983_v30 }
 0x1e6   : > { %2468 = vst.msk [vmem:[%s3991_s10 + $0x30] sm:$0xff] %vm2461_vm5, %v2451_v10  ;;  %v2452_v20 = vmax.f32 %v2436_v16, 0.0  ;;  %v2999_v27 = vpop.f32.mrb[8].mxu1 }
 0x1e7   : > { %2466 = vst.msk [vmem:[%s3991_s10 + $0x20] sm:$0xff] %vm2461_vm5, %v2449_v51  ;;  %v2450_v54 = vmax.f32 %v2434_v52, 0.0  ;;  %v1251_v53 = vpop.f32.mrb[9].mxu1  ;;  %v3071_v55 = vpop.f32.mrb[8].mxu0 }
 0x1e8   : > { %2469 = vst.msk [vmem:[%s3991_s10 + $0x38] sm:$0xff] %vm2461_vm5, %v2452_v20  ;;  %v3087_v56 = vadd.f32 %v3071_v55, %v2999_v27  ;;  %v3000_v41 = vpop.f32.mrb[10].mxu1  ;;  %v2375_v23 = vpop.f32.mrb[9].mxu0 }
 0x1e9   : > { %2467 = vst.msk [vmem:[%s3991_s10 + $0x28] sm:$0xff] %vm2461_vm5, %v2450_v54  ;;  %v3088_v58 = vadd.f32 %v2375_v23, %v1251_v53  ;;  %v1254_v57 = vpop.f32.mrb[11].mxu1  ;;  %v3072_v59 = vpop.f32.mrb[10].mxu0 }
 0x1ea   : > { %v2439_v61 = vadd.f32 %v3087_v56, %v3983_v30  ;;  %v3089_v63 = vadd.f32 %v3072_v59, %v3000_v41  ;;  %v2378_v12 = vpop.f32.mrb[11].mxu0 }
 0x1eb   : > { %v2437_v0 = vadd.f32 %v3088_v58, %v3983_v30  ;;  %v3090_v1 = vadd.f32 %v2378_v12, %v1254_v57 }
 0x1ec   : > { %v2455_v24 = vmax.f32 %v2439_v61, 0.0  ;;  %v2440_v8 = vadd.f32 %v3089_v63, %v3983_v30 }
 0x1ed   : > { %v2453_v11 = vmax.f32 %v2437_v0, 0.0  ;;  %v2438_v2 = vadd.f32 %v3090_v1, %v3983_v30 }
 0x1ee   : > { %2472 = vst.msk [vmem:[%s3991_s10 + $0x50] sm:$0xff] %vm2461_vm5, %v2455_v24  ;;  %v2456_v6 = vmax.f32 %v2440_v8, 0.0  ;;  %v3003_v28 = vpop.f32.mrb[12].mxu1 }
 0x1ef   : > { %2470 = vst.msk [vmem:[%s3991_s10 + $0x40] sm:$0xff] %vm2461_vm5, %v2453_v11  ;;  %v2454_v14 = vmax.f32 %v2438_v2, 0.0  ;;  %v1267_v29 = vpop.f32.mrb[13].mxu1  ;;  %v3075_v25 = vpop.f32.mrb[12].mxu0 }
 0x1f0   : > { %2473 = vst.msk [vmem:[%s3991_s10 + $0x58] sm:$0xff] %vm2461_vm5, %v2456_v6  ;;  %v3091_v31 = vadd.f32 %v3075_v25, %v3003_v28  ;;  %v3004_v33 = vpop.f32.mrb[14].mxu1  ;;  %v2391_v17 = vpop.f32.mrb[13].mxu0 }
 0x1f1   : > { %2471 = vst.msk [vmem:[%s3991_s10 + $0x48] sm:$0xff] %vm2461_vm5, %v2454_v14  ;;  %v3092_v13 = vadd.f32 %v2391_v17, %v1267_v29  ;;  %v1270_v18 = vpop.f32.mrb[15].mxu1  ;;  %v3076_v9 = vpop.f32.mrb[14].mxu0 }
 0x1f2   : > { %v2443_v36 = vadd.f32 %v3091_v31, %v3983_v30  ;;  %v3093_v21 = vadd.f32 %v3076_v9, %v3004_v33  ;;  %v2394_v37 = vpop.f32.mrb[15].mxu0 }
 0x1f3   : > { %v2441_v38 = vadd.f32 %v3092_v13, %v3983_v30  ;;  %v3094_v40 = vadd.f32 %v2394_v37, %v1270_v18 }
 0x1f4   : > { %v2459_v42 = vmax.f32 %v2443_v36, 0.0  ;;  %v2444_v39 = vadd.f32 %v3093_v21, %v3983_v30 }
 0x1f5   : > { %v2457_v35 = vmax.f32 %v2441_v38, 0.0  ;;  %v2442_v32 = vadd.f32 %v3094_v40, %v3983_v30 }
 0x1f6   : > { %2476 = vst.msk [vmem:[%s3991_s10 + $0x70] sm:$0xff] %vm2461_vm5, %v2459_v42  ;;  %v2460_v43 = vmax.f32 %v2444_v39, 0.0 }
 0x1f7   : > { %2474 = vst.msk [vmem:[%s3991_s10 + $0x60] sm:$0xff] %vm2461_vm5, %v2457_v35  ;;  %v2458_v4 = vmax.f32 %v2442_v32, 0.0 }
 0x1f8   : > { %2477 = vst.msk [vmem:[%s3991_s10 + $0x78] sm:$0xff] %vm2461_vm5, %v2460_v43 }
 0x1f9   : > { %2475 = vst.msk [vmem:[%s3991_s10 + $0x68] sm:$0xff] %vm2461_vm5, %v2458_v4 }
 0x1fa   : > { %3321 = shalt.err (!%p3318_p5)
}
 0x1fb   : > { %s3322_s30 = scalar_lea.hbm %s4036_s23, 2048  ;;  %s3326_s6 = scalar_lea.hbm %s4097_s3, 4096 }
 0x1fc   : > { %p3323_p6 = scmp.ne.s32.totalorder %s4036_s23, %s3322_s30  ;;  %p3327_p10 = scmp.lt.u32.totalorder %s4036_s23, %s4097_s3 }
 0x1fd   : > { %p3328_p11 = scmp.lt.u32.totalorder %s3326_s6, %s3322_s30  ;;  %p3330_p13 = scmp.lt.u32.totalorder %s3322_s30, %s4036_s23 }
 0x1fe   : > { %p3324_p7 = pnand %p3323_p6, %p3452_p4 }
 0x1ff   : > { %p3329_p12 = por %p3328_p11, %p3327_p10 }
 0x200   : > { %p3325_p9 = pneg %p3324_p7 }
 0x201   : > { %p3331_p0 = por %p3330_p13, %p3329_p12 }
 0x203   : > { %p3332_p1 = pnand %p3331_p0, %p3325_p9 }
 0x205   : > { %3335 = shalt.err (!%p3332_p1)
}
 0x206   : > { %s3390_s9 = smov 128   ;;  %s3391_s10 = smov 8  }
 0x207   : > { %3218 = dma.vmem_to_hbm [thread:$0]  (%p3452_p4), %s4038_s18, 2048, %s4036_s23, %s4048_s15, %s3390_s9, %s3390_s9, %s3391_s10  }
 0x208 PF: > { %p3224_p2 = scmp.ge.s32.totalorder %s3386_s17, 2  ;;  %s2511_s11 = sand.u32 1, %s3366_s12  }
 0x209   : > { %s2512_s19 = scalar_lea.sflag [#allocation3], %s2511_s11 }
 0x20a   : > { %p3221_p3 = pnand %p3224_p2, %p3459_p8 }
 0x20c   : > { %3361 = dma.done.wait (!%p3221_p3), %s2512_s19, 2048  }
 0x20d   : > { %3363 = vsyncadd (!%p3221_p3), %s2512_s19, 4294965248  ;;  %s16_s17 = sadd.s32 1, %s3386_s17   ;;  %s4102_s12 = smov %s3370_s13 }
 0x20e   : > { %p13_p5 = scmp.ge.s32.totalorder %s16_s17, 4   ;;  %s4103_s13 = smov %s3374_s14 }
 0x20f   : > { %s4104_s14 = smov %s3465_s25  ;;  %s4105_s15 = smov %s3382_s16 }
 0x210   : > { %s4106_s16 = smov %s4108_s20  ;;  %15 = sbr.rel (!%p13_p5) target bundleno = 4 (0x4), region = 84 }
 0x217   :  { %2517 = vsyncpa [#allocation3], 1 }
 0x218   :  { %2519 = vsyncpa [#allocation3 + $0x1], 1 }

// kernel: tpu_custom_call.1
= control target key start
LH: loop header
LB: loop body
LE: loop exit
PB: predicated region body
PF: predicated region fallthrough
CT: control target
= control target key end

     0   :  { %8 = vsyncpa [#allocation3], 0  ;;  %s4094_s0 = inlined_call_operand.vmem [shape: bf16[2,9,2,17,8], index: 0, kind: input, shape index: {}]   ;;  %s4095_s1 = inlined_call_operand.vmem [shape: bf16[9,4,32], index: 1, kind: input, shape index: {}]   ;;  %s4096_s2 = inlined_call_operand.vmem [shape: f32[1,32], index: 2, kind: input, shape index: {}]   ;;  %s4097_s3 = inlined_call_operand.hbm [shape: f32[2,8,16,32], index: 3, kind: output, shape index: {}]  }
   0x1   :  { %10 = vsyncpa [#allocation3 + $0x1], 0  ;;  %s3412_s12 = smov 0   ;;  %s3414_s13 = smov 0  }
   0x2   :  { %s3416_s14 = smov 0   ;;  %s3418_s15 = smov 0  }
   0x3   :  { %s3420_s16 = smov 0   ;;  %s3422_s17 = smov 0  }
   0x4 LB: > { %s2610_s18 = sadd.s32 4294967295, %s3386_s17   ;;  %s2611_s19 = sadd.s32 4294967294, %s3386_s17   ;;  %s3386_s17 = sphi %s3422_s17, %s16_s17   ;;  %s3382_s16 = sphi %s3420_s16, %s4106_s16   ;;  %s3378_s15 = sphi %s3418_s15, %s4105_s15   ;;  %s3374_s14 = sphi %s3416_s14, %s4104_s14   ;;  %s3370_s13 = sphi %s3414_s13, %s4103_s13   ;;  %s3366_s12 = sphi %s3412_s12, %s4102_s12  }
   0x5   : > { %s35_s20 = sadd.s32 1, %s3382_s16  ;;  %s124_s21 = sadd.s32 1, %s3374_s14 }
   0x6   : > { %p37_p0 = scmp.ge.s32.totalorder %s35_s20, 2  ;;  %p134_p1 = scmp.ne.s32.totalorder %s3374_s14, %s3370_s13 }
   0x7   : > { %p135_p2 = scmp.eq.s32.totalorder %s2610_s18, 1  ;;  %p140_p3 = scmp.ne.s32.totalorder %s3370_s13, %s3366_s12 }
   0x8   : > { %s4108_s20 = smov (%p37_p0, %s35_s20), 0  ;;  %p141_p5 = scmp.eq.s32.totalorder %s2611_s19, 1 }
   0x9   : > { %p3452_p4 = por %p135_p2, %p134_p1  ;;  %s117_s23 = ssub.s32 %s3382_s16, %s4108_s20 }
   0xa   : > { %p2616_p6 = scmp.ge.s32.totalorder %s3386_s17, 1  ;;  %p122_p7 = scmp.eq.s32.totalorder %s117_s23, 0 }
   0xb   : > { %p3459_p8 = por %p141_p5, %p140_p3  ;;  %p180_p9 = scmp.lt.s32.totalorder %s3386_s17, 3 }
   0xc   : > { %s3465_s25 = scalar_select %p122_p7, %s3374_s14, %s124_s21  }
   0xd   : > { %p181_p10 = pnand %p2616_p6, %p180_p9 }
   0xe   : > { %p211_p11 = scmp.lt.s32.totalorder (!%p181_p10), %s3378_s15, 1  ;;  %v2619_v0 = vld [vmem:[%s4095_s1 + $0x2] sm:$0x3] (!%p181_p10)  ;;  %vm329_vm0 = vcmask (!%p181_p10), 1041408   ;;  %v3476_v2 = vld [vmem:[%s4095_s1 + $0x8] sm:$0x3] (!%p181_p10) }
   0xf   : > { %184 = sbr.rel (%p181_p10) target bundleno = 520 (0x208), region = 32  ;;  %3207 = vmatprep.subr.msk.bf16.mxu1 (!%p181_p10), %vm329_vm0, %v2619_v0  ;;  %v331_v1 = vsel (!%p181_p10), %vm329_vm0, %v2619_v0, 0  ;;  %v3481_v3 = vld [vmem:[%s4095_s1] sm:$0x3] (!%p181_p10)  ;;  %3211 = vmatprep.subr.msk.bf16.mxu0 (!%p181_p10), %vm329_vm0, %v3476_v2  ;;  %v3488_v4 = vsel (!%p181_p10), %vm329_vm0, %v3476_v2, 0  ;;  %s3388_s18 = smov (!%p181_p10), 124  }
  0x10   : > { %2916 = vmatpush3.bf16.msra.mxu1 (!%p181_p10), %v331_v1  ;;  %v3493_v5 = vld [vmem:[%s4095_s1 + $0xa] sm:$0x3] (!%p181_p10)  ;;  %2988 = vmatpush3.bf16.msra.mxu0 (!%p181_p10), %v3488_v4  ;;  %vm304_vm1 = vcmask (!%p181_p10), 31744   ;;  %v455_v56 = vsel (!%p181_p10), %vm329_vm0, %v3481_v3, 0  ;;  %vm578_vm2 = vsmask.f32 (!%p181_p10), 3328 }
  0x11   : > { %3208 = vmatprep.subr.msk.bf16.mxu1 (!%p181_p10), %vm329_vm0, %v3481_v3  ;;  %3213 = vmatprep.subr.msk.bf16.mxu0 (!%p181_p10), %vm329_vm0, %v3493_v5  ;;  %vm579_vm3 = vsmask.f32 (!%p181_p10), 7440  ;;  %v3621_v3 = vld [vmem:[%s4095_s1 + $0x4] sm:$0x3] (!%p181_p10)  ;;  %s208_s6 = sand.u32 (!%p181_p10), 1, %s3370_s13   ;;  %vm2461_vm5 = vcmask (!%p181_p10), 261120  }
  0x12   : > { %vm3631_vm4 = vmor (!%p181_p10), %vm578_vm2, %vm579_vm3  ;;  %s2617_s9 = sshll.u32 (!%p181_p10), %s208_s6, 7  ;;  %s3389_s27 = smov (!%p181_p10), [#allocation2]  }
  0x13   : > { %s3991_s10 = scalar_lea.vmem (!%p181_p10), [#allocation2], %s2617_s9  ;;  %s3312_s28 = sshll.u32 (!%p181_p10), %s3389_s27, 4  ;;  %s3313_s28 = int_to_ptr.vmem [resolvable:$false] %s3312_s28 }
  0x14   : > { %s3314_s29 = scalar_lea.vmem (!%p181_p10), %s3313_s28, 4096 }
  0x16   : > { %s212_s5 = scalar_select %p211_p11, %s3378_s15, 1 }
  0x18   : > { %s3217_s8 = smul.u32 216, %s212_s5 }
  0x1a   : > { %s3503_s11 = scalar_lea.vmem %s4094_s0, %s3217_s8 }
  0x1b   : > { %v3506_v6 = vld [vmem:[%s3503_s11] sm:$0xff]   ;;  %v3509_v7 = vld [vmem:[%s3503_s11 + $0x18] sm:$0xff]   ;;  %v3278_v8 = vld [vmem:[%s3503_s11 + $0xc] sm:$0xff]  }
  0x1c   : > { %288 = vrot.lane.b32.xlu0 %v3506_v6, %s3388_s18  ;;  %290 = vrot.lane.b32.xlu1 %v3509_v7, %s3388_s18  ;;  %v3279_v9 = vld [vmem:[%s3503_s11 + $0x24] sm:$0xff]   ;;  %v3519_v10 = vld [vmem:[%s3503_s11 + $0x30] sm:$0xff]  }
  0x1d   : > { %v3281_v11 = vld [vmem:[%s3503_s11 + $0x3c] sm:$0xff]   ;;  %v3526_v12 = vld [vmem:[%s3503_s11 + $0x48] sm:$0xff]   ;;  %v3283_v13 = vld [vmem:[%s3503_s11 + $0x54] sm:$0xff]  }
  0x1e   : > { %v3533_v14 = vld [vmem:[%s3503_s11 + $0x60] sm:$0xff]   ;;  %v3537_v15 = vld [vmem:[%s3503_s11 + $0x78] sm:$0xff]   ;;  %v3542_v16 = vld [vmem:[%s3503_s11 + $0x90] sm:$0xff]  }
  0x1f   : > { %v3547_v17 = vld [vmem:[%s3503_s11 + $0xa8] sm:$0xff]   ;;  %v3552_v18 = vld [vmem:[%s3503_s11 + $0x18] sm:$0xff]   ;;  %v3557_v19 = vld [vmem:[%s3503_s11 + $0x30] sm:$0xff]  }
  0x20   : > { %1142 = vrot.lane.b32.xlu0 %v3278_v8, %s3388_s18  ;;  %1144 = vrot.lane.b32.xlu1 %v3279_v9, %s3388_s18  ;;  %v3562_v20 = vld [vmem:[%s3503_s11 + $0x48] sm:$0xff]   ;;  %v3567_v21 = vld [vmem:[%s3503_s11 + $0x60] sm:$0xff]  }
  0x21   : > { %v3572_v22 = vld [vmem:[%s3503_s11 + $0x78] sm:$0xff]   ;;  %v3577_v23 = vld [vmem:[%s3503_s11 + $0x90] sm:$0xff]   ;;  %v3582_v24 = vld [vmem:[%s3503_s11 + $0xa8] sm:$0xff]  }
  0x22   : > { %v3587_v25 = vld [vmem:[%s3503_s11 + $0xc0] sm:$0xff]   ;;  %v3296_v26 = vld [vmem:[%s3503_s11 + $0x6c] sm:$0xff]   ;;  %v3299_v29 = vld [vmem:[%s3503_s11 + $0xb4] sm:$0xff]  }
  0x23   : > { %v3297_v27 = vld [vmem:[%s3503_s11 + $0x84] sm:$0xff]   ;;  %v3298_v28 = vld [vmem:[%s3503_s11 + $0x9c] sm:$0xff]   ;;  %v2703_v30 = vld [vmem:[%s3503_s11 + $0xc] sm:$0xf] }
  0x24   : > { %292 = vrot.lane.b32.xlu0 %v3519_v10, %s3388_s18  ;;  %1146 = vrot.lane.b32.xlu1 %v3281_v11, %s3388_s18  ;;  %v2704_v31 = vld [vmem:[%s3503_s11 + $0x10] sm:$0xf]  ;;  %v1323_v32 = vshrl.u32 %v2703_v30, 16  ;;  %v1326_v33 = vshll.u32 %v2703_v30, 16  ;;  %v2705_v36 = vld [vmem:[%s3503_s11 + $0x14] sm:$0x1] }
  0x25   : > { %v1332_v34 = vshll.u32 %v2704_v31, 16  ;;  %v1336_v35 = vshrl.u32 %v2704_v31, 16  ;;  %v2706_v37 = vld [vmem:[%s3503_s11 + $0x24] sm:$0xf]  ;;  %v2707_v38 = vld [vmem:[%s3503_s11 + $0x28] sm:$0xf] }
  0x26   : > { %v1325_v39 = vrot.slane %v1323_v32, 4  ;;  %v1328_v40 = vrot.slane %v1326_v33, 5  ;;  %v2709_v43 = vld [vmem:[%s3503_s11 + $0x3c] sm:$0xf]  ;;  %v1342_v44 = vshll.u32 %v2705_v36, 16  ;;  %v1347_v46 = vshrl.u32 %v2706_v37, 16 }
  0x27   : > { %v3606_v41 = vrot.slane %v1332_v34, 5  ;;  %v1338_v42 = vrot.slane %v1336_v35, 4  ;;  %v2710_v45 = vld [vmem:[%s3503_s11 + $0x40] sm:$0xf]  ;;  %v1350_v47 = vshll.u32 %v2706_v37, 16  ;;  %v1356_v48 = vshll.u32 %v2707_v38, 16 }
  0x28   : > { %294 = vrot.lane.b32.xlu0 %v3526_v12, %s3388_s18  ;;  %1148 = vrot.lane.b32.xlu1 %v3283_v13, %s3388_s18  ;;  %v1360_v49 = vshrl.u32 %v2707_v38, 16  ;;  %v1371_v50 = vshrl.u32 %v2709_v43, 16  ;;  %v1374_v51 = vshll.u32 %v2709_v43, 16  ;;  %v1329_v52 = vor.u32 %v1328_v40, %v1325_v39  ;;  %v2708_v59 = vld [vmem:[%s3503_s11 + $0x2c] sm:$0x1] }
  0x29   : > { %v1339_v53 = vor.u32 %v1338_v42, %v3606_v41  ;;  %v1380_v54 = vshll.u32 %v2710_v45, 16  ;;  %v1384_v55 = vshrl.u32 %v2710_v45, 16  ;;  %v1344_v57 = vrot.slane %v1342_v44, 5  ;;  %v2712_v9 = vld [vmem:[%s3503_s11 + $0x54] sm:$0xf] }
  0x2a   : > { %v1349_v60 = vrot.slane %v1347_v46, 4  ;;  %v1352_v61 = vrot.slane %v1350_v47, 5  ;;  %v3614_v62 = vrot.slane %v1356_v48, 5  ;;  %v1362_v63 = vrot.slane %v1360_v49, 4  ;;  %v2711_v31 = vld [vmem:[%s3503_s11 + $0x44] sm:$0x1] }
  0x2b   : > { %v1373_v1 = vrot.slane %v1371_v50, 4  ;;  %v1376_v8 = vrot.slane %v1374_v51, 5  ;;  %v1330_v11 = vrot.slane %v1329_v52, 4  ;;  %v1340_v13 = vrot.slane %v1339_v53, 4  ;;  %v2715_v37 = vld [vmem:[%s3503_s11 + $0x6c] sm:$0xf] }
  0x2c   : > { %296 = vrot.lane.b32.xlu0 %v3533_v14, %s3388_s18  ;;  %298 = vrot.lane.b32.xlu1 %v3537_v15, %s3388_s18  ;;  %v1353_v33 = vor.u32 %v1352_v61, %v1349_v60  ;;  %v1363_v34 = vor.u32 %v1362_v63, %v3614_v62  ;;  %v1366_v35 = vshll.u32 %v2708_v59, 16  ;;  %v1395_v36 = vshrl.u32 %v2712_v9, 16  ;;  %v2716_v38 = vld [vmem:[%s3503_s11 + $0x70] sm:$0xf]  ;;  %v3983_v30 = vld [vmem:[%s4096_s2] ss:$0 sm:$0xff] }
  0x2d   : > { %v1377_v40 = vor.u32 %v1376_v8, %v1373_v1  ;;  %v1398_v42 = vshll.u32 %v2712_v9, 16  ;;  %v1335_v45 = vsel %vm3631_vm4, %v1330_v11, %v3606_v41  ;;  %v1345_v46 = vsel %vm3631_vm4, %v1340_v13, %v1344_v57  ;;  %v2714_v8 = vld [vmem:[%s3503_s11 + $0x5c] sm:$0x1]  ;;  %v2717_v9 = vld [vmem:[%s3503_s11 + $0x74] sm:$0x1] }
  0x2e   : > { %v1390_v48 = vshll.u32 %v2711_v31, 16  ;;  %v1419_v49 = vshrl.u32 %v2715_v37, 16  ;;  %v1422_v50 = vshll.u32 %v2715_v37, 16  ;;  %v1428_v51 = vshll.u32 %v2716_v38, 16 }
  0x2f   : > { %v1432_v52 = vshrl.u32 %v2716_v38, 16  ;;  %v1397_v41 = vrot.slane %v1395_v36, 4  ;;  %v1378_v57 = vrot.slane %v1377_v40, 4  ;;  %v1400_v59 = vrot.slane %v1398_v42, 5  ;;  %v2721_v42 = vld [vmem:[%s3503_s11 + $0x9c] sm:$0xf] }
  0x30   : > { %300 = vrot.lane.b32.xlu0 %v3542_v16, %s3388_s18  ;;  %302 = vrot.lane.b32.xlu1 %v3547_v17, %s3388_s18  ;;  %v2728_v63 = vcombine.low %v1335_v45, %v1345_v46  ;;  %v1392_v1 = vrot.slane %v1390_v48, 5  ;;  %v1421_v11 = vrot.slane %v1419_v49, 4  ;;  %v1424_v13 = vrot.slane %v1422_v50, 5 }
  0x31   : > { %v1401_v38 = vor.u32 %v1400_v59, %v1397_v41  ;;  %v1414_v40 = vshll.u32 %v2714_v8, 16  ;;  %v1467_v50 = vshrl.u32 %v2721_v42, 16 }
  0x32   : > { %v1425_v46 = vor.u32 %v1424_v13, %v1421_v11  ;;  %v2724_v13 = vld [vmem:[%s3503_s11 + $0xb4] sm:$0xf] }
  0x33   : > { %v1416_v41 = vrot.slane %v1414_v40, 5 }
  0x34   : > { %1884 = vrot.lane.b32.xlu0 %v3552_v18, %s3388_s18  ;;  %1886 = vrot.lane.b32.xlu1 %v3557_v19, %s3388_s18 }
  0x38   : > { %1888 = vrot.lane.b32.xlu0 %v3562_v20, %s3388_s18  ;;  %1890 = vrot.lane.b32.xlu1 %v3567_v21, %s3388_s18 }
  0x3c   : > { %1892 = vrot.lane.b32.xlu0 %v3572_v22, %s3388_s18  ;;  %1894 = vrot.lane.b32.xlu1 %v3577_v23, %s3388_s18 }
  0x40   : > { %1896 = vrot.lane.b32.xlu0 %v3582_v24, %s3388_s18  ;;  %1898 = vrot.lane.b32.xlu1 %v3587_v25, %s3388_s18 }
  0x44   : > { %1150 = vrot.lane.b32.xlu0 %v3296_v26, %s3388_s18  ;;  %1152 = vrot.lane.b32.xlu1 %v3297_v27, %s3388_s18  ;;  %v3624_v26 = vrot.slane %v1380_v54, 5  ;;  %v1386_v27 = vrot.slane %v1384_v55, 4  ;;  %v1354_v54 = vrot.slane %v1353_v33, 4  ;;  %v1364_v55 = vrot.slane %v1363_v34, 4 }
  0x46   : > { %v1387_v47 = vor.u32 %v1386_v27, %v3624_v26  ;;  %v3659_v27 = vrot.slane %v1428_v51, 5  ;;  %v1383_v37 = vsel %vm3631_vm4, %v1378_v57, %v3624_v26  ;;  %v1470_v51 = vshll.u32 %v2721_v42, 16 }
  0x48   : > { %1154 = vrot.lane.b32.xlu0 %v3298_v28, %s3388_s18  ;;  %1156 = vrot.lane.b32.xlu1 %v3299_v29, %s3388_s18  ;;  %v2713_v28 = vld [vmem:[%s3503_s11 + $0x58] sm:$0xf]  ;;  %v1565_v29 = vsel %vm329_vm0, %v3493_v5, 0  ;;  %v2760_v5 = vld [vmem:[%s4095_s1 + $0xc] sm:$0x3]  ;;  %s2496_s18 = sshll.u32 %s3991_s10, 4  ;;  %s4038_s18 = int_to_ptr.vmem [resolvable:$true] %s2496_s18 }
  0x49   : > { %v1404_v43 = vshll.u32 %v2713_v28, 16  ;;  %v1408_v44 = vshrl.u32 %v2713_v28, 16  ;;  %v1434_v28 = vrot.slane %v1432_v52, 4  ;;  %v1767_v34 = vsel %vm329_vm0, %v2760_v5, 0  ;;  %s3308_s26 = scalar_lea.vmem %s4038_s18, 2048  ;;  %p3315_p1 = scmp.lt.s32.totalorder %s4038_s18, %s3313_s28 }
  0x4a   : > { %p3309_p12 = scmp.ne.s32.totalorder %s4038_s18, %s3308_s26  ;;  %p3316_p2 = scmp.lt.s32.totalorder %s3314_s29, %s3308_s26 }
  0x4b   : > { %v3654_v60 = vrot.slane %v1404_v43, 5  ;;  %v1410_v61 = vrot.slane %v1408_v44, 4  ;;  %v2722_v43 = vld [vmem:[%s3503_s11 + $0xa0] sm:$0xf] }
  0x4c   : > { %v1476_v52 = vshll.u32 %v2722_v43, 16  ;;  %p3310_p13 = pnand %p3309_p12, %p3452_p4  ;;  %p3317_p3 = por %p3316_p2, %p3315_p1 }
  0x4e   : > { %p3311_p0 = pneg %p3310_p13 }
  0x50   : > { %p3318_p5 = pnand %p3317_p3, %p3311_p0 }
  0x8e   : > { %v289_v58 = vpop.permute.xlu0 %288  ;;  %v291_v0 = vpop.permute.xlu1 %290 }
  0x8f   : > { %2917 = vmatprep.mubr.msk.bf16.mxu1 %vm304_vm1, %v289_v58 }
  0x90   : > { %2918 = vmatmul.mubr.msk.bf16.vlgmr.msra.gmra.mrb[0].mxu1 %vm304_vm1, %v291_v0  ;;  %v1388_v0 = vrot.slane %v1387_v47, 4  ;;  %v1435_v47 = vor.u32 %v1434_v28, %v3659_v27 }
  0x91   : > { %2934 = vmatpush3.bf16.msra.mxu1 %v455_v56  ;;  %v1368_v56 = vrot.slane %v1366_v35, 5  ;;  %v2719_v35 = vld [vmem:[%s3503_s11 + $0x88] sm:$0xf] }
  0x92   : > { %v1143_v32 = vpop.permute.xlu0 %1142  ;;  %3209 = vmatprep.subr.msk.bf16.mxu1 %vm329_vm0, %v3621_v3  ;;  %v1145_v39 = vpop.permute.xlu1 %1144  ;;  %v1452_v26 = vshll.u32 %v2719_v35, 16  ;;  %v1456_v48 = vshrl.u32 %v2719_v35, 16  ;;  %v1436_v8 = vrot.slane %v1435_v47, 4  ;;  %v2725_v35 = vld [vmem:[%s3503_s11 + $0xb8] sm:$0xf] }
  0x93   : > { %2989 = vmatprep.mubr.msk.bf16.mxu0 %vm304_vm1, %v1143_v32  ;;  %v1359_v32 = vsel %vm3631_vm4, %v1354_v54, %v3614_v62  ;;  %v1369_v33 = vsel %vm3631_vm4, %v1364_v55, %v1368_v56  ;;  %v1393_v62 = vsel %vm3631_vm4, %v1388_v0, %v1392_v1  ;;  %v1402_v55 = vrot.slane %v1401_v38, 4  ;;  %v2723_v38 = vld [vmem:[%s3503_s11 + $0xa4] sm:$0x1] }
  0x94   : > { %2990 = vmatmul.mubr.msk.bf16.vlgmr.msra.gmra.mrb[0].mxu0 %vm304_vm1, %v1145_v39  ;;  %v1411_v39 = vor.u32 %v1410_v61, %v3654_v60  ;;  %v2729_v54 = vcombine.low %v1359_v32, %v1369_v33  ;;  %v2730_v57 = vcombine.low %v1383_v37, %v1393_v62  ;;  %v2720_v61 = vld [vmem:[%s3503_s11 + $0x8c] sm:$0x1]  ;;  %v1426_v1 = vrot.slane %v1425_v46, 4 }
  0x95   : > { %3006 = vmatpush3.bf16.msra.mxu0 %v1565_v29  ;;  %v2718_v29 = vld [vmem:[%s3503_s11 + $0x84] sm:$0xf]  ;;  %v1458_v11 = vrot.slane %v1456_v48, 4  ;;  %v1478_v32 = vrot.slane %v1476_v52, 5  ;;  %v1462_v42 = vshll.u32 %v2720_v61, 16  ;;  %v1494_v62 = vshll.u32 %v2724_v13, 16 }
  0x96   : > { %v293_v53 = vpop.permute.xlu0 %292  ;;  %3214 = vmatprep.subr.msk.bf16.mxu0 %vm329_vm0, %v2760_v5  ;;  %v1147_v58 = vpop.permute.xlu1 %1146  ;;  %v1438_v5 = vshll.u32 %v2717_v9, 16  ;;  %v1443_v44 = vshrl.u32 %v2718_v29, 16  ;;  %v1446_v45 = vshll.u32 %v2718_v29, 16  ;;  %v1412_v56 = vrot.slane %v1411_v39, 4  ;;  %v3695_v39 = vld [vmem:[%s4095_s1 + $0xe] sm:$0x3] }
  0x97   : > { %2921 = vmatprep.mubr.msk.bf16.mxu1 %vm304_vm1, %v293_v53  ;;  %2993 = vmatprep.mubr.msk.bf16.mxu0 %vm304_vm1, %v1147_v58  ;;  %v1480_v53 = vshrl.u32 %v2722_v43, 16  ;;  %v1454_v9 = vrot.slane %v1452_v26, 5  ;;  %v1469_v29 = vrot.slane %v1467_v50, 4  ;;  %v1491_v43 = vshrl.u32 %v2724_v13, 16 }
  0x98   : > { %v1440_v59 = vrot.slane %v1438_v5, 5  ;;  %v1448_v0 = vrot.slane %v1446_v45, 5  ;;  %v1417_v37 = vsel %vm3631_vm4, %v1412_v56, %v1416_v41  ;;  %v1504_v45 = vshrl.u32 %v2725_v35, 16 }
  0x99   : > { %v1482_v33 = vrot.slane %v1480_v53, 4  ;;  %v1459_v5 = vor.u32 %v1458_v11, %v1454_v9  ;;  %v1486_v48 = vshll.u32 %v2723_v38, 16  ;;  %v1493_v52 = vrot.slane %v1491_v43, 4  ;;  %v554_v11 = vld [vmem:[%s3503_s11] sm:$0xf] }
  0x9a   : > { %v295_v31 = vpop.permute.xlu0 %294  ;;  %v1149_v36 = vpop.permute.xlu1 %1148  ;;  %v1441_v46 = vsel %vm3631_vm4, %v1436_v8, %v1440_v59  ;;  %v1496_v53 = vrot.slane %v1494_v62, 5  ;;  %v1506_v56 = vrot.slane %v1504_v45, 4  ;;  %v2726_v59 = vld [vmem:[%s3503_s11 + $0xbc] sm:$0x1]  ;;  %v3732_v62 = vld [vmem:[%s4095_s1 + $0x6] sm:$0x3] }
  0x9b   : > { %2922 = vmatmul.mubr.msk.bf16.gmra.mrb[4].mxu1 %vm304_vm1, %v295_v31  ;;  %v1472_v31 = vrot.slane %v1470_v51, 5  ;;  %v1483_v26 = vor.u32 %v1482_v33, %v1478_v32  ;;  %v1464_v51 = vrot.slane %v1462_v42, 5  ;;  %v1510_v8 = vshll.u32 %v2726_v59, 16  ;;  %v558_v42 = vld [vmem:[%s3503_s11 + $0x1c] sm:$0xf] }
  0x9c   : > { %2994 = vmatmul.mubr.msk.bf16.gmra.mrb[4].mxu0 %vm304_vm1, %v1149_v36  ;;  %v1407_v36 = vsel %vm3631_vm4, %v1402_v55, %v3654_v60  ;;  %v1431_v60 = vsel %vm3631_vm4, %v1426_v1, %v3659_v27  ;;  %v1497_v61 = vor.u32 %v1496_v53, %v1493_v52  ;;  %v582_v33 = vshrl.u32 %v554_v11, 16 }
  0x9d   : > { %3007 = vmatprep.mubr.msk.bf16.mxu0 %vm304_vm1, %v2728_v63  ;;  %v1445_v63 = vrot.slane %v1443_v44, 4  ;;  %v1500_v44 = vshll.u32 %v2725_v35, 16  ;;  %v1473_v47 = vor.u32 %v1472_v31, %v1469_v29  ;;  %v2732_v27 = vcombine.low %v1431_v60, %v1441_v46  ;;  %v555_v31 = vld [vmem:[%s3503_s11 + $0x4] sm:$0xf] }
  0x9e   : > { %v297_v49 = vpop.permute.xlu0 %296  ;;  %v299_v58 = vpop.permute.xlu1 %298  ;;  %v1498_v29 = vrot.slane %v1497_v61, 4  ;;  %v585_v35 = vshll.u32 %v554_v11, 16  ;;  %v1512_v38 = vrot.slane %v1510_v8, 5  ;;  %v595_v43 = vshrl.u32 %v555_v31, 16  ;;  %v563_v8 = vld [vmem:[%s3503_s11 + $0x48] sm:$0xf] }
  0x9f   : > { %2925 = vmatprep.mubr.msk.bf16.mxu1 %vm304_vm1, %v297_v49  ;;  %v1449_v40 = vor.u32 %v1448_v0, %v1445_v63  ;;  %v1502_v55 = vrot.slane %v1500_v44, 5  ;;  %v1474_v41 = vrot.slane %v1473_v47, 4  ;;  %v584_v60 = vrot.slane %v582_v33, 4  ;;  %v566_v33 = vld [vmem:[%s3503_s11 + $0x60] sm:$0xf] }
  0xa0   : > { %v615_v46 = vshll.u32 %v558_v42, 16  ;;  %v619_v47 = vshrl.u32 %v558_v42, 16  ;;  %v1925_v11 = vsel %vm329_vm0, %v3695_v39, 0 }
  0xa1   : > { %v1450_v50 = vrot.slane %v1449_v40, 4  ;;  %v1507_v1 = vor.u32 %v1506_v56, %v1502_v55  ;;  %v1479_v13 = vsel %vm3631_vm4, %v1474_v41, %v1478_v32  ;;  %v557_v40 = vld [vmem:[%s3503_s11 + $0x18] sm:$0xf]  ;;  %v591_v32 = vshll.u32 %v555_v31, 16 }
  0xa2   : > { %v301_v28 = vpop.permute.xlu0 %300  ;;  %v303_v49 = vpop.permute.xlu1 %302  ;;  %v606_v44 = vshrl.u32 %v557_v40, 16  ;;  %v609_v45 = vshll.u32 %v557_v40, 16  ;;  %v3748_v53 = vrot.slane %v615_v46, 5  ;;  %v3780_v46 = vld [vmem:[%s4095_s1 + $0x10] sm:$0x3] }
  0xa3   : > { %2926 = vmatmul.mubr.msk.bf16.gmra.mrb[8].mxu1 %vm304_vm1, %v299_v58  ;;  %v1484_v58 = vrot.slane %v1483_v26, 4  ;;  %v1455_v63 = vsel %vm3631_vm4, %v1450_v50, %v1454_v9  ;;  %v824_v9 = vsel %vm329_vm0, %v3621_v3, 0  ;;  %v1503_v3 = vsel %vm3631_vm4, %v1498_v29, %v1502_v55  ;;  %v559_v55 = vld [vmem:[%s3503_s11 + $0x20] sm:$0x1] }
  0xa4   : > { %3008 = vmatmul.mubr.msk.bf16.vlgmr.msra.gmra.mrb[0].mxu0 %vm304_vm1, %v2729_v54  ;;  %2929 = vmatprep.mubr.msk.bf16.mxu1 %vm304_vm1, %v301_v28  ;;  %v1460_v54 = vrot.slane %v1459_v5, 4  ;;  %v587_v5 = vrot.slane %v585_v35, 5  ;;  %v3744_v26 = vrot.slane %v591_v32, 5  ;;  %v611_v52 = vrot.slane %v609_v45, 5 }
  0xa5   : > { %3024 = vmatpush3.bf16.msra.mxu0 %v1767_v34  ;;  %3011 = vmatprep.mubr.msk.bf16.mxu0 %vm304_vm1, %v2730_v57  ;;  %v2731_v34 = vcombine.low %v1407_v36, %v1417_v37  ;;  %v1488_v57 = vrot.slane %v1486_v48, 5  ;;  %v1508_v37 = vrot.slane %v1507_v1, 4  ;;  %v597_v48 = vrot.slane %v595_v43, 4 }
  0xa6   : > { %3215 = vmatprep.subr.msk.bf16.mxu0 %vm329_vm0, %v3695_v39  ;;  %v1465_v0 = vsel %vm3631_vm4, %v1460_v54, %v1464_v51  ;;  %v588_v50 = vor.u32 %v587_v5, %v584_v60  ;;  %v608_v51 = vrot.slane %v606_v44, 4  ;;  %v561_v54 = vld [vmem:[%s3503_s11 + $0x34] sm:$0xf]  ;;  %v625_v1 = vshll.u32 %v559_v55, 16 }
  0xa7   : > { %v2733_v28 = vcombine.low %v1455_v63, %v1465_v0  ;;  %v598_v56 = vor.u32 %v597_v48, %v3744_v26  ;;  %v639_v59 = vshll.u32 %v561_v54, 16  ;;  %v643_v61 = vshrl.u32 %v561_v54, 16  ;;  %v568_v54 = vld [vmem:[%s3503_s11 + $0x68] sm:$0x1] }
  0xa8   : > { %v589_v63 = vrot.slane %v588_v50, 4  ;;  %v627_v39 = vrot.slane %v625_v1, 5  ;;  %v681_v60 = vshll.u32 %v566_v33, 16 }
  0xa9   : > { %v3767_v35 = vrot.slane %v639_v59, 5  ;;  %v570_v59 = vld [vmem:[%s3503_s11 + $0x7c] sm:$0xf] }
  0xab   : > { %2930 = vmatmul.mubr.msk.bf16.gmra.mrb[12].mxu1 %vm304_vm1, %v303_v49  ;;  %v556_v49 = vld [vmem:[%s3503_s11 + $0x8] sm:$0x1] }
  0xac   : > { %3012 = vmatmul.mubr.msk.bf16.gmra.mrb[4].mxu0 %vm304_vm1, %v2731_v34  ;;  %2935 = vmatprep.mubr.msk.bf16.mxu1 %vm304_vm1, %v3506_v6  ;;  %v1489_v6 = vsel %vm3631_vm4, %v1484_v58, %v1488_v57  ;;  %v601_v41 = vshll.u32 %v556_v49, 16  ;;  %v565_v49 = vld [vmem:[%s3503_s11 + $0x50] sm:$0x1] }
  0xad   : > { %3015 = vmatprep.mubr.msk.bf16.mxu0 %vm304_vm1, %v2732_v27  ;;  %v2734_v36 = vcombine.low %v1479_v13, %v1489_v6  ;;  %v621_v27 = vrot.slane %v619_v47, 4  ;;  %v562_v13 = vld [vmem:[%s3503_s11 + $0x38] sm:$0x1]  ;;  %v564_v6 = vld [vmem:[%s3503_s11 + $0x4c] sm:$0xf] }
  0xae   : > { %v663_v32 = vshll.u32 %v564_v6, 16  ;;  %v667_v43 = vshrl.u32 %v564_v6, 16  ;;  %v649_v44 = vshll.u32 %v562_v13, 16 }
  0xaf   : > { %v622_v0 = vor.u32 %v621_v27, %v3748_v53 }
  0xb0   : > { %v669_v50 = vrot.slane %v667_v43, 4  ;;  %v651_v27 = vrot.slane %v649_v44, 5 }
  0xb1   : > { %v623_v42 = vrot.slane %v622_v0, 4  ;;  %v697_v0 = vshll.u32 %v568_v54, 16 }
  0xb3   : > { %2936 = vmatmul.mubr.msk.bf16.vlgmr.msra.gmra.mrb[0].mxu1 %vm304_vm1, %v3509_v7  ;;  %v1513_v7 = vsel %vm3631_vm4, %v1508_v37, %v1512_v38  ;;  %v567_v37 = vld [vmem:[%s3503_s11 + $0x64] sm:$0xf]  ;;  %v594_v38 = vsel %vm3631_vm4, %v589_v63, %v3744_v26 }
  0xb4   : > { %2952 = vmatpush3.bf16.msra.mxu1 %v824_v9  ;;  %3016 = vmatmul.mubr.msk.bf16.gmra.mrb[8].mxu0 %vm304_vm1, %v2733_v28  ;;  %v2735_v34 = vcombine.low %v1503_v3, %v1513_v7  ;;  %v599_v28 = vrot.slane %v598_v56, 4  ;;  %v654_v9 = vshrl.u32 %v563_v8, 16  ;;  %v678_v3 = vshrl.u32 %v566_v33, 16 }
  0xb5   : > { %2939 = vmatprep.mubr.msk.bf16.mxu1 %vm304_vm1, %v3519_v10  ;;  %3019 = vmatprep.mubr.msk.bf16.mxu0 %vm304_vm1, %v2734_v36  ;;  %v560_v10 = vld [vmem:[%s3503_s11 + $0x30] sm:$0xf]  ;;  %v657_v36 = vshll.u32 %v563_v8, 16  ;;  %v687_v7 = vshll.u32 %v567_v37, 16  ;;  %v691_v45 = vshrl.u32 %v567_v37, 16 }
  0xb6   : > { %3210 = vmatprep.subr.msk.bf16.mxu1 %vm329_vm0, %v3732_v62  ;;  %v630_v58 = vshrl.u32 %v560_v10, 16  ;;  %v633_v57 = vshll.u32 %v560_v10, 16  ;;  %v656_v26 = vrot.slane %v654_v9, 4  ;;  %v680_v10 = vrot.slane %v678_v3, 4  ;;  %v572_v8 = vld [vmem:[%s3503_s11 + $0x90] sm:$0xf] }
  0xb7   : > { %v659_v48 = vrot.slane %v657_v36, 5  ;;  %v693_v55 = vrot.slane %v691_v45, 4  ;;  %v729_v9 = vshll.u32 %v572_v8, 16 }
  0xb8   : > { %v632_v29 = vrot.slane %v630_v58, 4  ;;  %v635_v31 = vrot.slane %v633_v57, 5  ;;  %v673_v57 = vshll.u32 %v565_v49, 16 }
  0xb9   : > { %v660_v58 = vor.u32 %v659_v48, %v656_v26 }
  0xbb   : > { %2940 = vmatmul.mubr.msk.bf16.gmra.mrb[4].mxu1 %vm304_vm1, %v3526_v12  ;;  %v612_v12 = vor.u32 %v611_v52, %v608_v51  ;;  %v683_v51 = vrot.slane %v681_v60, 5  ;;  %v569_v52 = vld [vmem:[%s3503_s11 + $0x78] sm:$0xf]  ;;  %v661_v33 = vrot.slane %v660_v58, 4  ;;  %v1025_v60 = vsel %vm329_vm0, %v3732_v62, 0 }
  0xbc   : > { %3020 = vmatmul.mubr.msk.bf16.gmra.mrb[12].mxu0 %vm304_vm1, %v2735_v34  ;;  %2943 = vmatprep.mubr.msk.bf16.mxu1 %vm304_vm1, %v3533_v14  ;;  %v603_v14 = vrot.slane %v601_v41, 5  ;;  %v702_v1 = vshrl.u32 %v569_v52, 16  ;;  %v705_v6 = vshll.u32 %v569_v52, 16 }
  0xbd   : > { %3025 = vmatprep.mubr.msk.bf16.mxu0 %vm304_vm1, %v3552_v18  ;;  %v645_v18 = vrot.slane %v643_v61, 4  ;;  %v613_v40 = vrot.slane %v612_v12, 4  ;;  %v684_v12 = vor.u32 %v683_v51, %v680_v10 }
  0xbe   : > { %v604_v5 = vsel %vm3631_vm4, %v599_v28, %v603_v14  ;;  %v711_v28 = vshll.u32 %v570_v59, 16  ;;  %v715_v14 = vshrl.u32 %v570_v59, 16 }
  0xbf   : > { %v646_v47 = vor.u32 %v645_v18, %v3767_v35  ;;  %v618_v34 = vsel %vm3631_vm4, %v613_v40, %v3748_v53  ;;  %v3801_v53 = vrot.slane %v687_v7, 5  ;;  %v726_v18 = vshrl.u32 %v572_v8, 16  ;;  %v1885_v8 = vpop.permute.xlu0 %1884 }
  0xc0   : > { %v699_v40 = vrot.slane %v697_v0, 5  ;;  %v713_v43 = vrot.slane %v711_v28, 5  ;;  %v717_v3 = vrot.slane %v715_v14, 4  ;;  %v731_v7 = vrot.slane %v729_v9, 5  ;;  %v2786_v9 = vld [vmem:[%s3503_s11 + $0x18] sm:$0xf] }
  0xc1   : > { %v647_v41 = vrot.slane %v646_v47, 4  ;;  %v694_v13 = vor.u32 %v693_v55, %v3801_v53  ;;  %v728_v44 = vrot.slane %v726_v18, 4  ;;  %v576_v47 = vld [vmem:[%s3503_s11 + $0xac] sm:$0xf] }
  0xc2   : > { %v718_v10 = vor.u32 %v717_v3, %v713_v43  ;;  %v759_v52 = vshll.u32 %v576_v47, 16 }
  0xc3   : > { %2944 = vmatmul.mubr.msk.bf16.gmra.mrb[8].mxu1 %vm304_vm1, %v3537_v15  ;;  %v636_v15 = vor.u32 %v635_v31, %v632_v29  ;;  %v652_v31 = vsel %vm3631_vm4, %v647_v41, %v651_v27  ;;  %v732_v27 = vor.u32 %v731_v7, %v728_v44 }
  0xc4   : > { %3026 = vmatmul.mubr.msk.bf16.vlgmr.msra.gmra.mrb[0].mxu0 %vm304_vm1, %v3557_v19  ;;  %2947 = vmatprep.mubr.msk.bf16.mxu1 %vm304_vm1, %v3542_v16  ;;  %v628_v19 = vsel %vm3631_vm4, %v623_v42, %v627_v39  ;;  %v3795_v16 = vrot.slane %v663_v32, 5  ;;  %v704_v42 = vrot.slane %v702_v1, 4  ;;  %v695_v39 = vrot.slane %v694_v13, 4 }
  0xc5   : > { %3042 = vmatpush3.bf16.msra.mxu0 %v1925_v11  ;;  %3029 = vmatprep.mubr.msk.bf16.mxu0 %vm304_vm1, %v3562_v20  ;;  %v2645_v20 = vcombine.low %v594_v38, %v604_v5  ;;  %v637_v56 = vrot.slane %v636_v15, 4  ;;  %v2646_v61 = vcombine.low %v618_v34, %v628_v19  ;;  %v573_v11 = vld [vmem:[%s3503_s11 + $0x94] sm:$0xf]  ;;  %v685_v38 = vrot.slane %v684_v12, 4  ;;  %v575_v5 = vld [vmem:[%s3503_s11 + $0xa8] sm:$0xf] }
  0xc6   : > { %3216 = vmatprep.subr.msk.bf16.mxu0 %vm329_vm0, %v3780_v46  ;;  %v670_v63 = vor.u32 %v669_v50, %v3795_v16  ;;  %v735_v36 = vshll.u32 %v573_v11, 16  ;;  %v707_v32 = vrot.slane %v705_v6, 5  ;;  %v666_v26 = vsel %vm3631_vm4, %v661_v33, %v3795_v16  ;;  %v574_v19 = vld [vmem:[%s3503_s11 + $0x98] sm:$0x1] }
  0xc7   : > { %v642_v29 = vsel %vm3631_vm4, %v637_v56, %v3767_v35  ;;  %v571_v35 = vld [vmem:[%s3503_s11 + $0x80] sm:$0x1]  ;;  %v690_v62 = vsel %vm3631_vm4, %v685_v38, %v3801_v53  ;;  %v700_v49 = vsel %vm3631_vm4, %v695_v39, %v699_v40  ;;  %v750_v16 = vshrl.u32 %v575_v5, 16  ;;  %v1889_v38 = vpop.permute.xlu0 %1888  ;;  %v2789_v40 = vld [vmem:[%s3503_s11 + $0x30] sm:$0xf] }
  0xc8   : > { %v671_v37 = vrot.slane %v670_v63, 4  ;;  %v737_v45 = vrot.slane %v735_v36, 5  ;;  %v721_v34 = vshll.u32 %v571_v35, 16  ;;  %v708_v50 = vor.u32 %v707_v32, %v704_v42  ;;  %v1887_v36 = vpop.permute.xlu1 %1886  ;;  %v2790_v35 = vld [vmem:[%s3503_s11 + $0x34] sm:$0xf] }
  0xc9   : > { %v753_v51 = vshll.u32 %v575_v5, 16  ;;  %v745_v53 = vshll.u32 %v574_v19, 16  ;;  %v2649_v56 = vcombine.low %v690_v62, %v700_v49  ;;  %v733_v12 = vrot.slane %v732_v27, 4  ;;  %v2788_v19 = vld [vmem:[%s3503_s11 + $0x20] sm:$0x1] }
  0xca   : > { %v709_v41 = vrot.slane %v708_v50, 4  ;;  %v723_v58 = vrot.slane %v721_v34, 5  ;;  %v2065_v42 = vshrl.u32 %v2786_v9, 16  ;;  %v2068_v39 = vshll.u32 %v2786_v9, 16 }
  0xcb   : > { %2948 = vmatmul.mubr.msk.bf16.gmra.mrb[12].mxu1 %vm304_vm1, %v3547_v17  ;;  %v675_v17 = vrot.slane %v673_v57, 5  ;;  %v752_v57 = vrot.slane %v750_v16, 4  ;;  %v755_v59 = vrot.slane %v753_v51, 5  ;;  %v747_v1 = vrot.slane %v745_v53, 5  ;;  %v1893_v50 = vpop.permute.xlu0 %1892  ;;  %v2793_v51 = vld [vmem:[%s3503_s11 + $0x4c] sm:$0xf] }
  0xcc   : > { %3030 = vmatmul.mubr.msk.bf16.gmra.mrb[4].mxu0 %vm304_vm1, %v3567_v21  ;;  %2953 = vmatprep.mubr.msk.bf16.mxu1 %vm304_vm1, %v2645_v20  ;;  %v739_v21 = vshrl.u32 %v573_v11, 16  ;;  %v763_v20 = vshrl.u32 %v576_v47, 16  ;;  %v714_v11 = vsel %vm3631_vm4, %v709_v41, %v713_v43  ;;  %v738_v14 = vsel %vm3631_vm4, %v733_v12, %v737_v45  ;;  %v2792_v47 = vld [vmem:[%s3503_s11 + $0x48] sm:$0xf]  ;;  %v1891_v34 = vpop.permute.xlu1 %1890  ;;  %v3300_v53 = vld [vmem:[%s3503_s11 + $0xc] sm:$0xff]  }
  0xcd   : > { %3033 = vmatprep.mubr.msk.bf16.mxu0 %vm304_vm1, %v3572_v22  ;;  %v2647_v22 = vcombine.low %v642_v29, %v652_v31  ;;  %v676_v48 = vsel %vm3631_vm4, %v671_v37, %v675_v17  ;;  %v756_v13 = vor.u32 %v755_v59, %v752_v57  ;;  %v2307_v37 = vsel %vm329_vm0, %v3780_v46, 0  ;;  %v2795_v12 = vld [vmem:[%s3503_s11 + $0x60] sm:$0xf] }
  0xce   : > { %v741_v15 = vrot.slane %v739_v21, 4  ;;  %v2648_v55 = vcombine.low %v666_v26, %v676_v48  ;;  %v765_v63 = vrot.slane %v763_v20, 4  ;;  %v2787_v21 = vld [vmem:[%s3503_s11 + $0x1c] sm:$0xf]  ;;  %v2098_v5 = vshll.u32 %v2790_v35, 16 }
  0xcf   : > { %v757_v33 = vrot.slane %v756_v13, 4  ;;  %v2074_v46 = vshll.u32 %v2787_v21, 16  ;;  %v2078_v3 = vshrl.u32 %v2787_v21, 16  ;;  %v2102_v44 = vshrl.u32 %v2790_v35, 16 }
  0xd0   : > { %v742_v54 = vor.u32 %v741_v15, %v737_v45  ;;  %v2067_v45 = vrot.slane %v2065_v42, 4  ;;  %v2070_v15 = vrot.slane %v2068_v39, 5  ;;  %v2116_v20 = vshll.u32 %v2792_v47, 16 }
  0xd1   : > { %v3873_v26 = vrot.slane %v2074_v46, 5  ;;  %v2080_v48 = vrot.slane %v2078_v3, 4  ;;  %v2104_v16 = vrot.slane %v2102_v44, 4 }
  0xd2   : > { %v743_v0 = vrot.slane %v742_v54, 4  ;;  %v2071_v27 = vor.u32 %v2070_v15, %v2067_v45  ;;  %v2791_v54 = vld [vmem:[%s3503_s11 + $0x38] sm:$0x1] }
  0xd3   : > { %2954 = vmatmul.mubr.msk.bf16.vlgmr.msra.gmra.mrb[0].mxu1 %vm304_vm1, %v2646_v61  ;;  %v761_v61 = vrot.slane %v759_v52, 5  ;;  %v2113_v52 = vshrl.u32 %v2792_v47, 16  ;;  %v2108_v59 = vshll.u32 %v2791_v54, 16  ;;  %v3303_v54 = vld [vmem:[%s3503_s11 + $0x54] sm:$0xff]  }
  0xd4   : > { %2970 = vmatpush3.bf16.msra.mxu1 %v1025_v60  ;;  %3034 = vmatmul.mubr.msk.bf16.gmra.mrb[8].mxu0 %vm304_vm1, %v3577_v23  ;;  %v719_v23 = vrot.slane %v718_v10, 4  ;;  %v748_v29 = vsel %vm3631_vm4, %v743_v0, %v747_v1  ;;  %v2089_v60 = vshrl.u32 %v2789_v40, 16  ;;  %v3876_v10 = vrot.slane %v2098_v5, 5 }
  0xd5   : > { %2957 = vmatprep.mubr.msk.bf16.mxu1 %vm304_vm1, %v2647_v22  ;;  %3037 = vmatprep.mubr.msk.bf16.mxu0 %vm304_vm1, %v3582_v24  ;;  %v577_v24 = vld [vmem:[%s3503_s11 + $0xb0] sm:$0x1]  ;;  %v766_v6 = vor.u32 %v765_v63, %v761_v61  ;;  %v2651_v31 = vcombine.low %v738_v14, %v748_v29  ;;  %v762_v32 = vsel %vm3631_vm4, %v757_v33, %v761_v61  ;;  %v2092_v22 = vshll.u32 %v2789_v40, 16  ;;  %v2799_v29 = vld [vmem:[%s3503_s11 + $0x7c] sm:$0xf] }
  0xd6   : > { %3212 = vmatprep.subr.msk.bf16.mxu1 %vm329_vm0, %v3476_v2  ;;  %v724_v2 = vsel %vm3631_vm4, %v719_v23, %v723_v58  ;;  %v769_v28 = vshll.u32 %v577_v24, 16  ;;  %v2091_v62 = vrot.slane %v2089_v60, 4  ;;  %v2122_v23 = vshll.u32 %v2793_v51, 16 }
  0xd7   : > { %v767_v17 = vrot.slane %v766_v6, 4  ;;  %v2094_v49 = vrot.slane %v2092_v22, 5  ;;  %v2126_v58 = vshrl.u32 %v2793_v51, 16  ;;  %v2105_v57 = vor.u32 %v2104_v16, %v3876_v10 }
  0xd8   : > { %v771_v18 = vrot.slane %v769_v28, 5  ;;  %v2115_v61 = vrot.slane %v2113_v52, 4  ;;  %v2118_v63 = vrot.slane %v2116_v20, 5  ;;  %v2072_v0 = vrot.slane %v2071_v27, 4  ;;  %v2802_v20 = vld [vmem:[%s3503_s11 + $0x94] sm:$0xf] }
  0xd9   : > { %v2095_v41 = vor.u32 %v2094_v49, %v2091_v62  ;;  %v3890_v13 = vrot.slane %v2122_v23, 5  ;;  %v2128_v6 = vrot.slane %v2126_v58, 4  ;;  %v2137_v28 = vshrl.u32 %v2795_v12, 16  ;;  %v2801_v49 = vld [vmem:[%s3503_s11 + $0x90] sm:$0xf] }
  0xda   : > { %v772_v43 = vsel %vm3631_vm4, %v767_v17, %v771_v18  ;;  %v2140_v14 = vshll.u32 %v2795_v12, 16  ;;  %v2106_v33 = vrot.slane %v2105_v57, 4  ;;  %v2110_v17 = vrot.slane %v2108_v59, 5  ;;  %v2794_v18 = vld [vmem:[%s3503_s11 + $0x50] sm:$0x1] }
  0xdb   : > { %2958 = vmatmul.mubr.msk.bf16.gmra.mrb[4].mxu1 %vm304_vm1, %v2648_v55  ;;  %v2652_v7 = vcombine.low %v762_v32, %v772_v43  ;;  %v2081_v55 = vor.u32 %v2080_v48, %v3873_v26  ;;  %v2119_v9 = vor.u32 %v2118_v63, %v2115_v61  ;;  %v2077_v42 = vsel %vm3631_vm4, %v2072_v0, %v3873_v26  ;;  %v3302_v43 = vld [vmem:[%s3503_s11 + $0x3c] sm:$0xff]   ;;  %v2804_v23 = vld [vmem:[%s3503_s11 + $0xa8] sm:$0xf]  ;;  %v2805_v58 = vld [vmem:[%s3503_s11 + $0xac] sm:$0xf] }
  0xdc   : > { %3038 = vmatmul.mubr.msk.bf16.gmra.mrb[12].mxu0 %vm304_vm1, %v3587_v25  ;;  %2961 = vmatprep.mubr.msk.bf16.mxu1 %vm304_vm1, %v2649_v56  ;;  %v2650_v25 = vcombine.low %v714_v11, %v724_v2  ;;  %v2084_v56 = vshll.u32 %v2788_v19, 16  ;;  %v2798_v11 = vld [vmem:[%s3503_s11 + $0x78] sm:$0xf]  ;;  %v1895_v2 = vpop.permute.xlu1 %1894  ;;  %v2170_v35 = vshll.u32 %v2799_v29, 16  ;;  %v2174_v32 = vshrl.u32 %v2799_v29, 16  ;;  %v3304_v57 = vld [vmem:[%s3503_s11 + $0x6c] sm:$0xff]  }
  0xdd   : > { %3043 = vmatprep.mubr.msk.bf16.mxu0 %vm304_vm1, %v1885_v8  ;;  %v2082_v1 = vrot.slane %v2081_v55, 4  ;;  %v2796_v8 = vld [vmem:[%s3503_s11 + $0x64] sm:$0xf]  ;;  %v2164_v40 = vshll.u32 %v2798_v11, 16  ;;  %v2132_v46 = vshll.u32 %v2794_v18, 16  ;;  %v2139_v3 = vrot.slane %v2137_v28, 4 }
  0xde   : > { %v2086_v24 = vrot.slane %v2084_v56, 5  ;;  %v2146_v21 = vshll.u32 %v2796_v8, 16  ;;  %v2142_v60 = vrot.slane %v2140_v14, 5  ;;  %v2111_v5 = vsel %vm3631_vm4, %v2106_v33, %v2110_v17 }
  0xdf   : > { %v2120_v44 = vrot.slane %v2119_v9, 4  ;;  %v2166_v26 = vrot.slane %v2164_v40, 5  ;;  %v3916_v19 = vrot.slane %v2170_v35, 5  ;;  %v2176_v62 = vrot.slane %v2174_v32, 4  ;;  %v3305_v35 = vld [vmem:[%s3503_s11 + $0x84] sm:$0xff]  }
  0xe0   : > { %v2087_v39 = vsel %vm3631_vm4, %v2082_v1, %v2086_v24  ;;  %v3913_v45 = vrot.slane %v2146_v21, 5  ;;  %v2134_v16 = vrot.slane %v2132_v46, 5  ;;  %v2143_v51 = vor.u32 %v2142_v60, %v2139_v3  ;;  %v2807_v21 = vld [vmem:[%s3503_s11 + $0xc0] sm:$0xf]  ;;  %v2806_v46 = vld [vmem:[%s3503_s11 + $0xb0] sm:$0x1] }
  0xe1   : > { %v2811_v48 = vcombine.low %v2077_v42, %v2087_v39  ;;  %v2177_v59 = vor.u32 %v2176_v62, %v3916_v19  ;;  %v2188_v61 = vshll.u32 %v2801_v49, 16  ;;  %v2194_v63 = vshll.u32 %v2802_v20, 16  ;;  %v2808_v39 = vld [vmem:[%s3503_s11 + $0xc4] sm:$0xf]  ;;  %v3306_v3 = vld [vmem:[%s3503_s11 + $0x9c] sm:$0xff]  }
  0xe2   : > { %v2198_v12 = vshrl.u32 %v2802_v20, 16  ;;  %v2125_v0 = vsel %vm3631_vm4, %v2120_v44, %v3890_v13  ;;  %v2144_v24 = vrot.slane %v2143_v51, 4  ;;  %v2222_v28 = vshrl.u32 %v2805_v58, 16 }
  0xe3   : > { %2962 = vmatmul.mubr.msk.bf16.gmra.mrb[8].mxu1 %vm304_vm1, %v2650_v25  ;;  %v1897_v25 = vpop.permute.xlu0 %1896  ;;  %v2178_v33 = vrot.slane %v2177_v59, 4  ;;  %v2190_v17 = vrot.slane %v2188_v61, 5 }
  0xe4   : > { %3044 = vmatmul.mubr.msk.bf16.vlgmr.msra.gmra.mrb[0].mxu0 %vm304_vm1, %v1887_v36  ;;  %2965 = vmatprep.mubr.msk.bf16.mxu1 %vm304_vm1, %v2651_v31  ;;  %v2096_v31 = vrot.slane %v2095_v41, 4  ;;  %v3301_v36 = vld [vmem:[%s3503_s11 + $0x24] sm:$0xff]   ;;  %v2185_v41 = vshrl.u32 %v2801_v49, 16  ;;  %v2200_v18 = vrot.slane %v2198_v12, 4  ;;  %v2224_v42 = vrot.slane %v2222_v28, 4 }
  0xe5   : > { %3060 = vmatpush3.bf16.msra.mxu0 %v2307_v37  ;;  %3047 = vmatprep.mubr.msk.bf16.mxu0 %vm304_vm1, %v1889_v38  ;;  %v2150_v37 = vshrl.u32 %v2796_v8, 16  ;;  %v2161_v38 = vshrl.u32 %v2798_v11, 16  ;;  %v2209_v11 = vshrl.u32 %v2804_v23, 16  ;;  %v2149_v32 = vsel %vm3631_vm4, %v2144_v24, %v3913_v45 }
  0xe6   : > { %v2101_v22 = vsel %vm3631_vm4, %v2096_v31, %v3876_v10  ;;  %v2187_v31 = vrot.slane %v2185_v41, 4  ;;  %v3307_v41 = vld [vmem:[%s3503_s11 + $0xb4] sm:$0xff]  }
  0xe7   : > { %v2152_v15 = vrot.slane %v2150_v37, 4  ;;  %v2163_v47 = vrot.slane %v2161_v38, 4  ;;  %v2812_v27 = vcombine.low %v2101_v22, %v2111_v5  ;;  %v2211_v37 = vrot.slane %v2209_v11, 4 }
  0xe8   : > { %v2191_v22 = vor.u32 %v2190_v17, %v2187_v31 }
  0xe9   : > { %v2167_v55 = vor.u32 %v2166_v26, %v2163_v47  ;;  %v2246_v47 = vshrl.u32 %v2808_v39, 16 }
  0xea   : > { %v2192_v49 = vrot.slane %v2191_v22, 4 }
  0xeb   : > { %2966 = vmatmul.mubr.msk.bf16.gmra.mrb[12].mxu1 %vm304_vm1, %v2652_v7  ;;  %v2797_v7 = vld [vmem:[%s3503_s11 + $0x68] sm:$0x1]  ;;  %v2168_v29 = vrot.slane %v2167_v55, 4 }
  0xec   : > { %3048 = vmatmul.mubr.msk.bf16.gmra.mrb[4].mxu0 %vm304_vm1, %v1891_v34  ;;  %2971 = vmatprep.mubr.msk.bf16.mxu1 %vm304_vm1, %v3300_v53  ;;  %v2800_v34 = vld [vmem:[%s3503_s11 + $0x80] sm:$0x1]  ;;  %v2156_v52 = vshll.u32 %v2797_v7, 16  ;;  %v2153_v53 = vor.u32 %v2152_v15, %v3913_v45  ;;  %v2233_v7 = vshrl.u32 %v2807_v21, 16  ;;  %v2236_v45 = vshll.u32 %v2807_v21, 16 }
  0xed   : > { %3051 = vmatprep.mubr.msk.bf16.mxu0 %vm304_vm1, %v1893_v50  ;;  %v1899_v50 = vpop.permute.xlu1 %1898  ;;  %v2180_v56 = vshll.u32 %v2800_v34, 16  ;;  %v2242_v15 = vshll.u32 %v2808_v39, 16  ;;  %v2228_v34 = vshll.u32 %v2806_v46, 16 }
  0xee   : > { %v2158_v8 = vrot.slane %v2156_v52, 5  ;;  %v2154_v14 = vrot.slane %v2153_v53, 4  ;;  %v2235_v51 = vrot.slane %v2233_v7, 4  ;;  %v2238_v52 = vrot.slane %v2236_v45, 5 }
  0xef   : > { %v2244_v20 = vrot.slane %v2242_v15, 5  ;;  %v2230_v55 = vrot.slane %v2228_v34, 5 }
  0xf3   : > { %2972 = vmatmul.mubr.msk.bf16.vlgmr.msra.gmra.mrb[0].mxu1 %vm304_vm1, %v3301_v36  ;;  %v2803_v36 = vld [vmem:[%s3503_s11 + $0x98] sm:$0x1] }
  0xf4   : > { %3078 = vmatpush3.bf16.msra.mxu1 %v3488_v4  ;;  %3052 = vmatmul.mubr.msk.bf16.gmra.mrb[8].mxu0 %vm304_vm1, %v1895_v2  ;;  %v2129_v4 = vor.u32 %v2128_v6, %v3890_v13  ;;  %v2212_v2 = vshll.u32 %v2804_v23, 16  ;;  %v2218_v6 = vshll.u32 %v2805_v58, 16  ;;  %v2196_v13 = vrot.slane %v2194_v63, 5 }
  0xf5   : > { %2975 = vmatprep.mubr.msk.bf16.mxu1 %vm304_vm1, %v3302_v43  ;;  %3055 = vmatprep.mubr.msk.bf16.mxu0 %vm304_vm1, %v1897_v25  ;;  %v2182_v25 = vrot.slane %v2180_v56, 5  ;;  %v2159_v43 = vsel %vm3631_vm4, %v2154_v14, %v2158_v8  ;;  %v2204_v44 = vshll.u32 %v2803_v36, 16  ;;  %v2809_v56 = vld [vmem:[%s3503_s11 + $0xc8] sm:$0x1]  ;;  %s2833_s11 = sshll.u32 %s3378_s15, 11  ;;  %s4048_s15 = scalar_lea.sflag [#allocation3], %s208_s6 }
  0xf6   : > { %v2130_v10 = vrot.slane %v2129_v4, 4  ;;  %v2214_v38 = vrot.slane %v2212_v2, 5  ;;  %v2220_v40 = vrot.slane %v2218_v6, 5  ;;  %v2173_v4 = vsel %vm3631_vm4, %v2168_v29, %v3916_v19  ;;  %s4036_s23 = scalar_lea.hbm %s4097_s3, %s2833_s11 }
  0xf7   : > { %v2183_v60 = vsel %vm3631_vm4, %v2178_v33, %v2182_v25  ;;  %v2201_v5 = vor.u32 %v2200_v18, %v2196_v13  ;;  %v2814_v19 = vcombine.low %v2149_v32, %v2159_v43  ;;  %v2197_v23 = vsel %vm3631_vm4, %v2192_v49, %v2196_v13 }
  0xf8   : > { %v2135_v1 = vsel %vm3631_vm4, %v2130_v10, %v2134_v16  ;;  %v2215_v26 = vor.u32 %v2214_v38, %v2211_v37  ;;  %v2815_v62 = vcombine.low %v2173_v4, %v2183_v60  ;;  %v2206_v10 = vrot.slane %v2204_v44, 5  ;;  %v1151_v16 = vpop.permute.xlu0 %1150 }
  0xf9   : > { %v2813_v9 = vcombine.low %v2125_v0, %v2135_v1  ;;  %v2252_v61 = vshll.u32 %v2809_v56, 16  ;;  %v1153_v0 = vpop.permute.xlu1 %1152 }
  0xfb   : > { %2976 = vmatmul.mubr.msk.bf16.gmra.mrb[4].mxu1 %vm304_vm1, %v3303_v54  ;;  %v2216_v54 = vrot.slane %v2215_v26, 4  ;;  %v2254_v6 = vrot.slane %v2252_v61, 5 }
  0xfc   : > { %3056 = vmatmul.mubr.msk.bf16.gmra.mrb[12].mxu0 %vm304_vm1, %v1899_v50  ;;  %2979 = vmatprep.mubr.msk.bf16.mxu1 %vm304_vm1, %v3304_v57  ;;  %v2202_v50 = vrot.slane %v2201_v5, 4  ;;  %v2239_v57 = vor.u32 %v2238_v52, %v2235_v51  ;;  %v1155_v24 = vpop.permute.xlu0 %1154 }
  0xfd   : > { %3061 = vmatprep.mubr.msk.bf16.mxu0 %vm304_vm1, %v2811_v48  ;;  %v2225_v48 = vor.u32 %v2224_v42, %v2220_v40  ;;  %v2221_v63 = vsel %vm3631_vm4, %v2216_v54, %v2220_v40  ;;  %v1157_v29 = vpop.permute.xlu1 %1156 }
  0xfe   : > { %v2207_v58 = vsel %vm3631_vm4, %v2202_v50, %v2206_v10  ;;  %v2240_v11 = vrot.slane %v2239_v57, 4 }
  0xff   : > { %v2226_v53 = vrot.slane %v2225_v48, 4  ;;  %v2816_v1 = vcombine.low %v2197_v23, %v2207_v58 }
 0x100   : > { %v2245_v28 = vsel %vm3631_vm4, %v2240_v11, %v2244_v20 }
 0x101   : > { %v2231_v12 = vsel %vm3631_vm4, %v2226_v53, %v2230_v55 }
 0x102   : > { %v2817_v8 = vcombine.low %v2221_v63, %v2231_v12 }
 0x103   : > { %2980 = vmatmul.mubr.msk.bf16.gmra.mrb[8].mxu1 %vm304_vm1, %v3305_v35 }
 0x104   : > { %3062 = vmatmul.mubr.msk.bf16.vlgmr.msra.gmra.mrb[0].mxu0 %vm304_vm1, %v2812_v27  ;;  %2983 = vmatprep.mubr.msk.bf16.mxu1 %vm304_vm1, %v3306_v3  ;;  %v2248_v27 = vrot.slane %v2246_v47, 4 }
 0x105   : > { %3065 = vmatprep.mubr.msk.bf16.mxu0 %vm304_vm1, %v2813_v9 }
 0x106   : > { %v2249_v59 = vor.u32 %v2248_v27, %v2244_v20 }
 0x108   : > { %v2250_v2 = vrot.slane %v2249_v59, 4 }
 0x10a   : > { %v2255_v14 = vsel %vm3631_vm4, %v2250_v2, %v2254_v6 }
 0x10b   : > { %2984 = vmatmul.mubr.msk.bf16.gmra.mrb[12].mxu1 %vm304_vm1, %v3307_v41  ;;  %v2818_v25 = vcombine.low %v2245_v28, %v2255_v14 }
 0x10c   : > { %3066 = vmatmul.mubr.msk.bf16.gmra.mrb[4].mxu0 %vm304_vm1, %v2814_v19  ;;  %2997 = vmatprep.mubr.msk.bf16.mxu1 %vm304_vm1, %v1151_v16 }
 0x10d   : > { %3069 = vmatprep.mubr.msk.bf16.mxu0 %vm304_vm1, %v2815_v62 }
 0x113   : > { %2998 = vmatmul.mubr.msk.bf16.vlgmr.msra.gmra.mrb[8].mxu1 %vm304_vm1, %v1153_v0 }
 0x114   : > { %3070 = vmatmul.mubr.msk.bf16.gmra.mrb[8].mxu0 %vm304_vm1, %v2816_v1  ;;  %3001 = vmatprep.mubr.msk.bf16.mxu1 %vm304_vm1, %v1155_v24 }
 0x115   : > { %3073 = vmatprep.mubr.msk.bf16.mxu0 %vm304_vm1, %v2817_v8 }
 0x11b   : > { %3002 = vmatmul.mubr.msk.bf16.gmra.mrb[12].mxu1 %vm304_vm1, %v1157_v29 }
 0x11c   : > { %3074 = vmatmul.mubr.msk.bf16.gmra.mrb[12].mxu0 %vm304_vm1, %v2818_v25 }
 0x1c6   : > { %v2973_v31 = vpop.f32.mrb[0].mxu1 }
 0x1c7   : > { %v1061_v33 = vpop.f32.mrb[1].mxu1 }
 0x1c8   : > { %v2974_v17 = vpop.f32.mrb[2].mxu1 }
 0x1c9   : > { %v1064_v13 = vpop.f32.mrb[3].mxu1 }
 0x1ce   : > { %v2977_v18 = vpop.f32.mrb[4].mxu1 }
 0x1cf   : > { %v1077_v9 = vpop.f32.mrb[5].mxu1 }
 0x1d0   : > { %v2978_v36 = vpop.f32.mrb[6].mxu1 }
 0x1d1   : > { %v1080_v21 = vpop.f32.mrb[7].mxu1 }
 0x1d7   : > { %v3063_v37 = vpop.f32.mrb[0].mxu0 }
 0x1d8   : > { %v3079_v38 = vadd.f32 %v3063_v37, %v2973_v31  ;;  %v2343_v40 = vpop.f32.mrb[1].mxu0 }
 0x1d9   : > { %v3080_v42 = vadd.f32 %v2343_v40, %v1061_v33  ;;  %v3064_v39 = vpop.f32.mrb[2].mxu0 }
 0x1da   : > { %v2431_v35 = vadd.f32 %v3079_v38, %v3983_v30  ;;  %v3081_v32 = vadd.f32 %v3064_v39, %v2974_v17  ;;  %v2346_v43 = vpop.f32.mrb[3].mxu0 }
 0x1db   : > { %v2429_v4 = vadd.f32 %v3080_v42, %v3983_v30  ;;  %v3082_v46 = vadd.f32 %v2346_v43, %v1064_v13 }
 0x1dc   : > { %v2447_v3 = vmax.f32 %v2431_v35, 0.0  ;;  %v2432_v60 = vadd.f32 %v3081_v32, %v3983_v30 }
 0x1dd   : > { %v2445_v22 = vmax.f32 %v2429_v4, 0.0  ;;  %v2430_v5 = vadd.f32 %v3082_v46, %v3983_v30 }
 0x1de   : > { %2464 = vst.msk [vmem:[%s3991_s10 + $0x10] sm:$0xff] %vm2461_vm5, %v2447_v3  ;;  %v2448_v44 = vmax.f32 %v2432_v60, 0.0 }
 0x1df   : > { %2462 = vst.msk [vmem:[%s3991_s10] sm:$0xff] %vm2461_vm5, %v2445_v22  ;;  %v2446_v7 = vmax.f32 %v2430_v5, 0.0  ;;  %v3067_v45 = vpop.f32.mrb[4].mxu0 }
 0x1e0   : > { %2465 = vst.msk [vmem:[%s3991_s10 + $0x18] sm:$0xff] %vm2461_vm5, %v2448_v44  ;;  %v3083_v15 = vadd.f32 %v3067_v45, %v2977_v18  ;;  %v2359_v47 = vpop.f32.mrb[5].mxu0 }
 0x1e1   : > { %2463 = vst.msk [vmem:[%s3991_s10 + $0x8] sm:$0xff] %vm2461_vm5, %v2446_v7  ;;  %v3084_v26 = vadd.f32 %v2359_v47, %v1077_v9  ;;  %v3068_v48 = vpop.f32.mrb[6].mxu0 }
 0x1e2   : > { %v2435_v34 = vadd.f32 %v3083_v15, %v3983_v30  ;;  %v3085_v19 = vadd.f32 %v3068_v48, %v2978_v36  ;;  %v2362_v62 = vpop.f32.mrb[7].mxu0 }
 0x1e3   : > { %v2433_v49 = vadd.f32 %v3084_v26, %v3983_v30  ;;  %v3086_v50 = vadd.f32 %v2362_v62, %v1080_v21 }
 0x1e4   : > { %v2451_v10 = vmax.f32 %v2435_v34, 0.0  ;;  %v2436_v16 = vadd.f32 %v3085_v19, %v3983_v30 }
 0x1e5   : > { %v2449_v51 = vmax.f32 %v2433_v49, 0.0  ;;  %v2434_v52 = vadd.f32 %v3086_v50, %v3983_v30 }
 0x1e6   : > { %2468 = vst.msk [vmem:[%s3991_s10 + $0x30] sm:$0xff] %vm2461_vm5, %v2451_v10  ;;  %v2452_v20 = vmax.f32 %v2436_v16, 0.0  ;;  %v2999_v27 = vpop.f32.mrb[8].mxu1 }
 0x1e7   : > { %2466 = vst.msk [vmem:[%s3991_s10 + $0x20] sm:$0xff] %vm2461_vm5, %v2449_v51  ;;  %v2450_v54 = vmax.f32 %v2434_v52, 0.0  ;;  %v1251_v53 = vpop.f32.mrb[9].mxu1  ;;  %v3071_v55 = vpop.f32.mrb[8].mxu0 }
 0x1e8   : > { %2469 = vst.msk [vmem:[%s3991_s10 + $0x38] sm:$0xff] %vm2461_vm5, %v2452_v20  ;;  %v3087_v56 = vadd.f32 %v3071_v55, %v2999_v27  ;;  %v3000_v41 = vpop.f32.mrb[10].mxu1  ;;  %v2375_v23 = vpop.f32.mrb[9].mxu0 }
 0x1e9   : > { %2467 = vst.msk [vmem:[%s3991_s10 + $0x28] sm:$0xff] %vm2461_vm5, %v2450_v54  ;;  %v3088_v58 = vadd.f32 %v2375_v23, %v1251_v53  ;;  %v1254_v57 = vpop.f32.mrb[11].mxu1  ;;  %v3072_v59 = vpop.f32.mrb[10].mxu0 }
 0x1ea   : > { %v2439_v61 = vadd.f32 %v3087_v56, %v3983_v30  ;;  %v3089_v63 = vadd.f32 %v3072_v59, %v3000_v41  ;;  %v2378_v12 = vpop.f32.mrb[11].mxu0 }
 0x1eb   : > { %v2437_v0 = vadd.f32 %v3088_v58, %v3983_v30  ;;  %v3090_v1 = vadd.f32 %v2378_v12, %v1254_v57 }
 0x1ec   : > { %v2455_v24 = vmax.f32 %v2439_v61, 0.0  ;;  %v2440_v8 = vadd.f32 %v3089_v63, %v3983_v30 }
 0x1ed   : > { %v2453_v11 = vmax.f32 %v2437_v0, 0.0  ;;  %v2438_v2 = vadd.f32 %v3090_v1, %v3983_v30 }
 0x1ee   : > { %2472 = vst.msk [vmem:[%s3991_s10 + $0x50] sm:$0xff] %vm2461_vm5, %v2455_v24  ;;  %v2456_v6 = vmax.f32 %v2440_v8, 0.0  ;;  %v3003_v28 = vpop.f32.mrb[12].mxu1 }
 0x1ef   : > { %2470 = vst.msk [vmem:[%s3991_s10 + $0x40] sm:$0xff] %vm2461_vm5, %v2453_v11  ;;  %v2454_v14 = vmax.f32 %v2438_v2, 0.0  ;;  %v1267_v29 = vpop.f32.mrb[13].mxu1  ;;  %v3075_v25 = vpop.f32.mrb[12].mxu0 }
 0x1f0   : > { %2473 = vst.msk [vmem:[%s3991_s10 + $0x58] sm:$0xff] %vm2461_vm5, %v2456_v6  ;;  %v3091_v31 = vadd.f32 %v3075_v25, %v3003_v28  ;;  %v3004_v33 = vpop.f32.mrb[14].mxu1  ;;  %v2391_v17 = vpop.f32.mrb[13].mxu0 }
 0x1f1   : > { %2471 = vst.msk [vmem:[%s3991_s10 + $0x48] sm:$0xff] %vm2461_vm5, %v2454_v14  ;;  %v3092_v13 = vadd.f32 %v2391_v17, %v1267_v29  ;;  %v1270_v18 = vpop.f32.mrb[15].mxu1  ;;  %v3076_v9 = vpop.f32.mrb[14].mxu0 }
 0x1f2   : > { %v2443_v36 = vadd.f32 %v3091_v31, %v3983_v30  ;;  %v3093_v21 = vadd.f32 %v3076_v9, %v3004_v33  ;;  %v2394_v37 = vpop.f32.mrb[15].mxu0 }
 0x1f3   : > { %v2441_v38 = vadd.f32 %v3092_v13, %v3983_v30  ;;  %v3094_v40 = vadd.f32 %v2394_v37, %v1270_v18 }
 0x1f4   : > { %v2459_v42 = vmax.f32 %v2443_v36, 0.0  ;;  %v2444_v39 = vadd.f32 %v3093_v21, %v3983_v30 }
 0x1f5   : > { %v2457_v35 = vmax.f32 %v2441_v38, 0.0  ;;  %v2442_v32 = vadd.f32 %v3094_v40, %v3983_v30 }
 0x1f6   : > { %2476 = vst.msk [vmem:[%s3991_s10 + $0x70] sm:$0xff] %vm2461_vm5, %v2459_v42  ;;  %v2460_v43 = vmax.f32 %v2444_v39, 0.0 }
 0x1f7   : > { %2474 = vst.msk [vmem:[%s3991_s10 + $0x60] sm:$0xff] %vm2461_vm5, %v2457_v35  ;;  %v2458_v4 = vmax.f32 %v2442_v32, 0.0 }
 0x1f8   : > { %2477 = vst.msk [vmem:[%s3991_s10 + $0x78] sm:$0xff] %vm2461_vm5, %v2460_v43 }
 0x1f9   : > { %2475 = vst.msk [vmem:[%s3991_s10 + $0x68] sm:$0xff] %vm2461_vm5, %v2458_v4 }
 0x1fa   : > { %3321 = shalt.err (!%p3318_p5)
}
 0x1fb   : > { %s3322_s30 = scalar_lea.hbm %s4036_s23, 2048  ;;  %s3326_s6 = scalar_lea.hbm %s4097_s3, 4096 }
 0x1fc   : > { %p3323_p6 = scmp.ne.s32.totalorder %s4036_s23, %s3322_s30  ;;  %p3327_p10 = scmp.lt.u32.totalorder %s4036_s23, %s4097_s3 }
 0x1fd   : > { %p3328_p11 = scmp.lt.u32.totalorder %s3326_s6, %s3322_s30  ;;  %p3330_p13 = scmp.lt.u32.totalorder %s3322_s30, %s4036_s23 }
 0x1fe   : > { %p3324_p7 = pnand %p3323_p6, %p3452_p4 }
 0x1ff   : > { %p3329_p12 = por %p3328_p11, %p3327_p10 }
 0x200   : > { %p3325_p9 = pneg %p3324_p7 }
 0x201   : > { %p3331_p0 = por %p3330_p13, %p3329_p12 }
 0x203   : > { %p3332_p1 = pnand %p3331_p0, %p3325_p9 }
 0x205   : > { %3335 = shalt.err (!%p3332_p1)
}
 0x206   : > { %s3390_s9 = smov 128   ;;  %s3391_s10 = smov 8  }
 0x207   : > { %3218 = dma.vmem_to_hbm [thread:$0]  (%p3452_p4), %s4038_s18, 2048, %s4036_s23, %s4048_s15, %s3390_s9, %s3390_s9, %s3391_s10  }
 0x208 PF: > { %p3224_p2 = scmp.ge.s32.totalorder %s3386_s17, 2  ;;  %s2511_s11 = sand.u32 1, %s3366_s12  }
 0x209   : > { %s2512_s19 = scalar_lea.sflag [#allocation3], %s2511_s11 }
 0x20a   : > { %p3221_p3 = pnand %p3224_p2, %p3459_p8 }
 0x20c   : > { %3361 = dma.done.wait (!%p3221_p3), %s2512_s19, 2048  }
 0x20d   : > { %3363 = vsyncadd (!%p3221_p3), %s2512_s19, 4294965248  ;;  %s16_s17 = sadd.s32 1, %s3386_s17   ;;  %s4102_s12 = smov %s3370_s13 }
 0x20e   : > { %p13_p5 = scmp.ge.s32.totalorder %s16_s17, 4   ;;  %s4103_s13 = smov %s3374_s14 }
 0x20f   : > { %s4104_s14 = smov %s3465_s25  ;;  %s4105_s15 = smov %s3382_s16 }
 0x210   : > { %s4106_s16 = smov %s4108_s20  ;;  %15 = sbr.rel (!%p13_p5) target bundleno = 4 (0x4), region = 84 }
 0x217   :  { %2517 = vsyncpa [#allocation3], 1 }
 0x218   :  { %2519 = vsyncpa [#allocation3 + $0x1], 1 }

</bundles_post_ra>
